<compile_context>
chip_gen: v7x
topology: tpu7x:2x2x1
jax: 0.10.0
libtpu: 0.0.40
codegen_flags: <defaults>
</compile_context>

<pallas_src>
import functools

import jax
import jax.numpy as jnp
from jax import lax
from jax.experimental import pallas as pl
from jax.experimental.pallas import tpu as pltpu


def _vmem_budget_bytes():
    """Generation-aware usable VMEM: capacity minus 8 MiB headroom (64 MiB fallback)."""
    try:
        cap = int(pltpu.get_tpu_info().vmem_capacity_bytes)
    except Exception:  # query unavailable (interpret mode, old runtime, ...)
        cap = 64 << 20
    return max(cap - (8 << 20), 32 << 20)


def _vmem_limit(bytes_needed, budget):
    # This is a limit, not a reservation: slack over the per-step footprint, clamped to
    # the physical budget of the current generation.
    return int(min(max(2 * bytes_needed + (4 << 20), 32 << 20), budget))


# --------------------------------------------------------------------------- #
# Pass 1: per-column mean / inv_std (matches torch.std's unbiased default).
# --------------------------------------------------------------------------- #
def _stats_kernel(z1_ref, z2_ref, s1_ref, s2_ref, *, inv_n, inv_nm1):
    def column_stats(z):
        z = z.astype(jnp.float32)
        mean = jnp.sum(z, axis=0, keepdims=True) * jnp.float32(inv_n)
        centered = z - mean
        var = jnp.sum(centered * centered, axis=0, keepdims=True) * jnp.float32(inv_nm1)
        # NOTE: no epsilon -> inf/NaN for zero-variance columns, mirroring the PyTorch
        # reference's divide-by-zero behavior. rsqrt lowers to the EUP slot.
        return mean, lax.rsqrt(var)

    m1, istd1 = column_stats(z1_ref[...])
    m2, istd2 = column_stats(z2_ref[...])
    s1_ref[0:1, :] = m1
    s1_ref[1:2, :] = istd1
    s2_ref[0:1, :] = m2
    s2_ref[1:2, :] = istd2


def _column_stats(z1, z2, budget):
    n, d = z1.shape
    itemsize = jnp.dtype(z1.dtype).itemsize
    # Full-column slabs keep the numerically stable two-sweep mean/var; the feature tile
    # is shrunk so 2 inputs x 2 buffers x n x t_d fits the VMEM budget (important on the
    # 64 MiB v7x budget).
    # TODO(synk): for very large n, tile the batch axis (sum / sum-of-squares or a
    # two-sweep grid) instead of shrinking t_d.
    t_d = None
    for cand in (1024, 512, 256, 128):
        if cand <= d and d % cand == 0:
            if 2 * (2 * n * cand * itemsize) + (8 << 20) <= budget:
                t_d = cand
                break
    if t_d is None:
        t_d = d  # full extent is always a legal block shape

    footprint = 2 * (2 * n * t_d * itemsize) + 2 * (2 * 2 * t_d * 4)
    kernel = functools.partial(_stats_kernel, inv_n=1.0 / n, inv_nm1=1.0 / (n - 1))
    return pl.pallas_call(
        kernel,
        out_shape=(jax.ShapeDtypeStruct((2, d), jnp.float32),
                   jax.ShapeDtypeStruct((2, d), jnp.float32)),
        grid_spec=pltpu.PrefetchScalarGridSpec(
            num_scalar_prefetch=0,
            grid=(d // t_d,),
            in_specs=[pl.BlockSpec((n, t_d), lambda j: (0, j)),
                      pl.BlockSpec((n, t_d), lambda j: (0, j))],
            out_specs=(pl.BlockSpec((2, t_d), lambda j: (0, j)),
                       pl.BlockSpec((2, t_d), lambda j: (0, j))),
        ),
        compiler_params=pltpu.CompilerParams(
            dimension_semantics=("parallel",),
            vmem_limit_bytes=_vmem_limit(footprint, budget),
        ),
        cost_estimate=pl.CostEstimate(
            flops=8 * n * d,
            transcendentals=2 * d,
            bytes_accessed=int(2 * n * d * itemsize + 4 * d * 4),
        ),
    )(z1, z2)


# --------------------------------------------------------------------------- #
# Pass 2: tiled cross-correlation + fused Barlow reduction.
# --------------------------------------------------------------------------- #
def _barlow_tile_kernel(z1_ref, z2_ref, mean1_ref, s2_ref, istd1c_ref,
                        part_ref, c1_ref, acc_ref, *, lmbda, t_n):
    i = pl.program_id(0)
    j = pl.program_id(1)
    k = pl.program_id(2)
    last_k = pl.num_programs(2) - 1
    lmbda_f = jnp.float32(lmbda)

    @pl.when(jnp.logical_and(j == 0, k == 0))
    def _center_slab():
        # Center z1's resident column slab once per i (also casts to the MXU feed dtype)
        # so the (j, k) sweep never repeats the centering VPU work or the cast.
        c1_ref[...] = (z1_ref[...].astype(jnp.float32)
                       - mean1_ref[...]).astype(c1_ref.dtype)

    @pl.when(k == 0)
    def _init():
        acc_ref[...] = jnp.zeros_like(acc_ref)

    # Center z2's streamed tile; 1/std scaling is folded into the post-matmul scale.
    c2 = (z2_ref[...].astype(jnp.float32) - s2_ref[0:1, :]).astype(c1_ref.dtype)
    off = pl.multiple_of(k * t_n, t_n)
    c1 = c1_ref[pl.ds(off, t_n), :]
    acc_ref[...] += lax.dot_general(
        c1, c2,
        dimension_numbers=(((0,), (0,)), ((), ())),   # contract the batch axis
        preferred_element_type=jnp.float32,
    )

    @pl.when(k == last_k)
    def _finalize():
        # cor = (C1^T C2) * inv_std1[:, None] * (inv_std2 / n)[None, :], all in f32.
        cor = acc_ref[...] * s2_ref[1:2, :]     # lane broadcast: inv_std2 / n
        cor = cor * istd1c_ref[...]             # sublane broadcast: inv_std1
        base = lmbda_f * jnp.sum(cor * cor)

        def write_partial(value):
            rows = lax.broadcasted_iota(jnp.int32, part_ref.shape, 0)
            cols = lax.broadcasted_iota(jnp.int32, part_ref.shape, 1)
            part_ref[...] = jnp.where((rows == 0) & (cols == 0), value, 0.0)

        @pl.when(i != j)
        def _off_diag_tile():
            write_partial(base)

        @pl.when(i == j)
        def _diag_tile():
            # Only diagonal tiles pay for the iota mask / diagonal correction:
            #   loss = lmbda * sum(cor^2) + sum_diag((cor - 1)^2 - lmbda * cor^2)
            rows = lax.broadcasted_iota(jnp.int32, cor.shape, 0)
            cols = lax.broadcasted_iota(jnp.int32, cor.shape, 1)
            diag = rows == cols
            corr = jnp.sum(jnp.where(diag, (cor - 1.0) ** 2 - lmbda_f * cor * cor, 0.0))
            write_partial(base + corr)


def _pass2_footprint(n, t_d, t_n, itemsize, feed_itemsize):
    return (2 * n * t_d * itemsize          # resident z1 column slab (double-buffered)
            + n * t_d * feed_itemsize       # centered copy scratch
            + 2 * t_n * t_d * itemsize      # streamed z2 tile (double-buffered)
            + 2 * (2 + 1 + 1) * t_d * 4     # stats blocks
            + 2 * t_d * 4                   # inv_std1 column
            + t_d * t_d * 4                 # f32 accumulator scratch
            + 2 * 8 * 128 * 4)              # partial output block


@functools.partial(
    jax.jit,
    static_argnames=("lmbda", "reduction", "d_tile", "n_tile", "mxu_dtype"))
def barlow_loss(z1, z2, lmbda, reduction="mean", *, d_tile=None, n_tile=None,
                mxu_dtype=None):
    if reduction != "mean":
        raise ValueError("only reduction='mean' is supported")
    if z1.ndim != 2 or z1.shape != z2.shape:
        raise ValueError("z1/z2 must be 2-D with identical shapes")
    n, d = z1.shape
    if n < 2:
        raise ValueError("unbiased std (ddof=1) requires n > 1")

    budget = _vmem_budget_bytes()
    itemsize = jnp.dtype(z1.dtype).itemsize
    feed_dtype = jnp.dtype(mxu_dtype) if mxu_dtype is not None else jnp.dtype(jnp.float32)
    feed_itemsize = feed_dtype.itemsize

    # t_n is the MXU contraction depth: keep it >= 128 (full-n fallback for small /
    # awkward n); explicit n_tile overrides.
    if n_tile is not None:
        t_n = n_tile
    else:
        t_n = next((t for t in (512, 256, 128) if t <= n and n % t == 0), n)

    # t_d: largest of {d, 1024, 512, 256, 128} that divides d and fits the VMEM budget.
    # t_d == d is the single-feature-block fast path (z1 and z2 each stream from HBM
    # exactly once). Explicit d_tile overrides.
    if d_tile is not None:
        t_d = d_tile
    else:
        t_d = None
        for cand in sorted({d, 1024, 512, 256, 128}, reverse=True):
            if cand > d or d % cand:
                continue
            if _pass2_footprint(n, cand, t_n, itemsize, feed_itemsize) + (4 << 20) <= budget:
                t_d = cand
                break
        if t_d is None:
            t_d = next((t for t in (128, 256, 512, 1024) if t <= d and d % t == 0), d)

    if d % t_d or n % t_n:
        raise ValueError("tile sizes must evenly divide (n, d)")
    gi = gj = d // t_d
    gk = n // t_n

    # Pass 1: per-column statistics.
    stats1, stats2 = _column_stats(z1, z2, budget)
    mean1 = stats1[0:1]                                   # (1, d)
    istd1_col = stats1[1].reshape(d, 1)                   # (d, 1): sublane broadcast
    # Fold 1/n into inv_std2 so the finalize is two broadcast multiplies + reductions.
    s2 = jnp.concatenate([stats2[0:1], stats2[1:2] * jnp.float32(1.0 / n)], axis=0)

    kernel = functools.partial(_barlow_tile_kernel, lmbda=float(lmbda), t_n=t_n)
    footprint = _pass2_footprint(n, t_d, t_n, itemsize, feed_itemsize)

    partials = pl.pallas_call(
        kernel,
        out_shape=jax.ShapeDtypeStruct((gi * 8, gj * 128), jnp.float32),
        grid_spec=pltpu.PrefetchScalarGridSpec(
            num_scalar_prefetch=0,
            grid=(gi, gj, gk),
            in_specs=[
                # z1 column slab: block index depends only on i, so it stays resident
                # in VMEM (no re-DMA) across the whole (j, k) sweep.
                pl.BlockSpec((n, t_d), lambda i, j, k: (0, i)),
                pl.BlockSpec((t_n, t_d), lambda i, j, k: (k, j)),   # streamed z2 tile
                pl.BlockSpec((1, t_d), lambda i, j, k: (0, i)),     # mean1 row
                pl.BlockSpec((2, t_d), lambda i, j, k: (0, j)),     # [mean2; inv_std2/n]
                pl.BlockSpec((t_d, 1), lambda i, j, k: (i, 0)),     # inv_std1 column
            ],
            out_specs=pl.BlockSpec((8, 128), lambda i, j, k: (i, j)),
            scratch_shapes=[pltpu.VMEM((n, t_d), feed_dtype),       # centered z1 slab
                            pltpu.VMEM((t_d, t_d), jnp.float32)],   # f32 accumulator
        ),
        compiler_params=pltpu.CompilerParams(
            # j must stay "arbitrary": the centered slab is (re)filled at j == 0.
            dimension_semantics=("parallel", "arbitrary", "arbitrary"),
            vmem_limit_bytes=_vmem_limit(footprint, budget),
        ),
        cost_estimate=pl.CostEstimate(
            flops=2 * n * d * d,
            transcendentals=0,
            bytes_accessed=int((gi + 1) * n * d * itemsize + gi * gj * 8 * 128 * 4),
        ),
    )(z1, z2, mean1, s2, istd1_col)

    # Each (i, j) tile wrote its partial loss at [0, 0] of its (8, 128) block and zeros
    # elsewhere, so a plain sum recovers the scalar loss exactly.
    return jnp.sum(partials)


def _barlow_loss_ref(z1, z2, lmbda):
    # Pure-JAX reference reproducing the PyTorch semantics.
    z1 = z1.astype(jnp.float32)
    z2 = z2.astype(jnp.float32)
    n, d = z1.shape
    z1 = (z1 - z1.mean(0)) / z1.std(0, ddof=1)
    z2 = (z2 - z2.mean(0)) / z2.std(0, ddof=1)
    cor = jnp.matmul(z1.T, z2, precision=lax.Precision.HIGHEST) / n
    on_diag = jnp.sum((jnp.diagonal(cor) - 1.0) ** 2)
    off_diag = jnp.sum(cor ** 2) - jnp.sum(jnp.diagonal(cor) ** 2)
    return on_diag + lmbda * off_diag


if __name__ == "__main__":
    key = jax.random.PRNGKey(0)
    k1, k2, k3 = jax.random.split(key, 3)
    n, d = 256, 256
    col_scale = 0.5 + jax.random.uniform(k3, (1, d), dtype=jnp.float32)
    z1 = col_scale * jax.random.normal(k1, (n, d), dtype=jnp.float32) + 0.3
    z2 = 0.8 * z1 + 0.2 * jax.random.normal(k2, (n, d), dtype=jnp.float32) - 0.1
    lmbda = 0.005

    ref = jax.block_until_ready(_barlow_loss_ref(z1, z2, lmbda))

    # Multi-tile path: grid (2, 2, 2) exercises the resident z1 slab across j/k, the
    # k accumulator, the diag-gated finalize, and the parallel-i partial outputs.
    loss_tiled = jax.block_until_ready(
        barlow_loss(z1, z2, lmbda, d_tile=128, n_tile=128))
    # Default tile-picker path (single block for this small shape).
    loss_default = jax.block_until_ready(barlow_loss(z1, z2, lmbda))
    # bf16 MXU feed (recommended production setting on v5e/v6e/v7x); f32 accumulate.
    loss_bf16 = jax.block_until_ready(
        barlow_loss(z1, z2, lmbda, d_tile=128, n_tile=128, mxu_dtype=jnp.bfloat16))

    assert jnp.allclose(loss_tiled, ref, rtol=1e-3, atol=1e-3), (loss_tiled, ref)
    assert jnp.allclose(loss_default, ref, rtol=1e-3, atol=1e-3), (loss_default, ref)
    assert jnp.allclose(loss_bf16, ref, rtol=3e-2, atol=3e-2), (loss_bf16, ref)
    print("KERNEL_OK")
</pallas_src>

<mosaic_0001>
module attributes {stable_mosaic.version = 11 : i64} {
  func.func @_stats_kernel(%arg0: i32, %arg1: memref<256x256xf32, #tpu.memory_space<vmem>>, %arg2: memref<256x256xf32, #tpu.memory_space<vmem>>, %arg3: memref<2x256xf32, #tpu.memory_space<vmem>>, %arg4: memref<2x256xf32, #tpu.memory_space<vmem>>) attributes {dimension_semantics = [#tpu.dimension_semantics<parallel>], iteration_bounds = array<i64: 1>, scalar_prefetch = 0 : i64, scratch_operands = 0 : i64, tpu.core_type = #tpu.core_type<tc>, window_params = [{transform_indices = @transform_0, window_bounds = array<i64: 256, 256>}, {transform_indices = @transform_1, window_bounds = array<i64: 256, 256>}, {transform_indices = @transform_2, window_bounds = array<i64: 2, 256>}, {transform_indices = @transform_3, window_bounds = array<i64: 2, 256>}]} {
    %c0 = arith.constant 0 : index
    %c0_0 = arith.constant 0 : index
    %0 = vector.load %arg1[%c0, %c0_0] : memref<256x256xf32, #tpu.memory_space<vmem>>, vector<256x256xf32>
    %cst = arith.constant dense<0.000000e+00> : vector<256xf32>
    %1 = vector.multi_reduction <add>, %0, %cst [0] : vector<256x256xf32> to vector<256xf32>
    %2 = vector.shape_cast %1 : vector<256xf32> to vector<1x256xf32>
    %cst_1 = arith.constant 3.906250e-03 : f32
    %3 = vector.broadcast %cst_1 : f32 to vector<1x256xf32>
    %4 = arith.mulf %2, %3 : vector<1x256xf32>
    %5 = vector.broadcast %4 : vector<1x256xf32> to vector<256x256xf32>
    %6 = arith.subf %0, %5 : vector<256x256xf32>
    %7 = arith.mulf %6, %6 : vector<256x256xf32>
    %cst_2 = arith.constant dense<0.000000e+00> : vector<256xf32>
    %8 = vector.multi_reduction <add>, %7, %cst_2 [0] : vector<256x256xf32> to vector<256xf32>
    %9 = vector.shape_cast %8 : vector<256xf32> to vector<1x256xf32>
    %cst_3 = arith.constant 0.00392156886 : f32
    %10 = vector.broadcast %cst_3 : f32 to vector<1x256xf32>
    %11 = arith.mulf %9, %10 : vector<1x256xf32>
    %12 = math.rsqrt %11 : vector<1x256xf32>
    %c0_4 = arith.constant 0 : index
    %c0_5 = arith.constant 0 : index
    %13 = vector.load %arg2[%c0_4, %c0_5] : memref<256x256xf32, #tpu.memory_space<vmem>>, vector<256x256xf32>
    %cst_6 = arith.constant dense<0.000000e+00> : vector<256xf32>
    %14 = vector.multi_reduction <add>, %13, %cst_6 [0] : vector<256x256xf32> to vector<256xf32>
    %15 = vector.shape_cast %14 : vector<256xf32> to vector<1x256xf32>
    %cst_7 = arith.constant 3.906250e-03 : f32
    %16 = vector.broadcast %cst_7 : f32 to vector<1x256xf32>
    %17 = arith.mulf %15, %16 : vector<1x256xf32>
    %18 = vector.broadcast %17 : vector<1x256xf32> to vector<256x256xf32>
    %19 = arith.subf %13, %18 : vector<256x256xf32>
    %20 = arith.mulf %19, %19 : vector<256x256xf32>
    %cst_8 = arith.constant dense<0.000000e+00> : vector<256xf32>
    %21 = vector.multi_reduction <add>, %20, %cst_8 [0] : vector<256x256xf32> to vector<256xf32>
    %22 = vector.shape_cast %21 : vector<256xf32> to vector<1x256xf32>
    %cst_9 = arith.constant 0.00392156886 : f32
    %23 = vector.broadcast %cst_9 : f32 to vector<1x256xf32>
    %24 = arith.mulf %22, %23 : vector<1x256xf32>
    %25 = math.rsqrt %24 : vector<1x256xf32>
    %c0_10 = arith.constant 0 : index
    %c0_11 = arith.constant 0 : index
    %26 = vector.load %arg3[%c0_10, %c0_11] : memref<2x256xf32, #tpu.memory_space<vmem>>, vector<1x256xf32>
    tpu.vector_store %arg3[%c0_10, %c0_11], %4 {strides = array<i32>} : memref<2x256xf32, #tpu.memory_space<vmem>>, vector<1x256xf32>,
    %c1 = arith.constant 1 : index
    %c0_12 = arith.constant 0 : index
    %27 = vector.load %arg3[%c1, %c0_12] : memref<2x256xf32, #tpu.memory_space<vmem>>, vector<1x256xf32>
    tpu.vector_store %arg3[%c1, %c0_12], %12 {strides = array<i32>} : memref<2x256xf32, #tpu.memory_space<vmem>>, vector<1x256xf32>,
    %c0_13 = arith.constant 0 : index
    %c0_14 = arith.constant 0 : index
    %28 = vector.load %arg4[%c0_13, %c0_14] : memref<2x256xf32, #tpu.memory_space<vmem>>, vector<1x256xf32>
    tpu.vector_store %arg4[%c0_13, %c0_14], %17 {strides = array<i32>} : memref<2x256xf32, #tpu.memory_space<vmem>>, vector<1x256xf32>,
    %c1_15 = arith.constant 1 : index
    %c0_16 = arith.constant 0 : index
    %29 = vector.load %arg4[%c1_15, %c0_16] : memref<2x256xf32, #tpu.memory_space<vmem>>, vector<1x256xf32>
    tpu.vector_store %arg4[%c1_15, %c0_16], %25 {strides = array<i32>} : memref<2x256xf32, #tpu.memory_space<vmem>>, vector<1x256xf32>,
    return
  }
  func.func @transform_0(%arg0: i32) -> (i32, i32) {
    %c0_i32 = arith.constant 0 : i32
    %c0_i32_0 = arith.constant 0 : i32
    return %c0_i32, %arg0 : i32, i32
  }
  func.func @transform_1(%arg0: i32) -> (i32, i32) {
    %c0_i32 = arith.constant 0 : i32
    %c0_i32_0 = arith.constant 0 : i32
    return %c0_i32, %arg0 : i32, i32
  }
  func.func @transform_2(%arg0: i32) -> (i32, i32) {
    %c0_i32 = arith.constant 0 : i32
    %c0_i32_0 = arith.constant 0 : i32
    return %c0_i32, %arg0 : i32, i32
  }
  func.func @transform_3(%arg0: i32) -> (i32, i32) {
    %c0_i32 = arith.constant 0 : i32
    %c0_i32_0 = arith.constant 0 : i32
    return %c0_i32, %arg0 : i32, i32
  }
}

module attributes {stable_mosaic.version = 11 : i64} {
  func.func @_barlow_tile_kernel(%arg0: i32, %arg1: i32, %arg2: i32, %arg3: memref<256x128xf32, #tpu.memory_space<vmem>>, %arg4: memref<128x128xf32, #tpu.memory_space<vmem>>, %arg5: memref<1x128xf32, #tpu.memory_space<vmem>>, %arg6: memref<2x128xf32, #tpu.memory_space<vmem>>, %arg7: memref<128x1xf32, #tpu.memory_space<vmem>>, %arg8: memref<8x128xf32, #tpu.memory_space<vmem>>, %arg9: memref<256x128xf32, #tpu.memory_space<vmem>>, %arg10: memref<128x128xf32, #tpu.memory_space<vmem>>) attributes {dimension_semantics = [#tpu.dimension_semantics<parallel>, #tpu.dimension_semantics<arbitrary>, #tpu.dimension_semantics<arbitrary>], iteration_bounds = array<i64: 2, 2, 2>, scalar_prefetch = 0 : i64, scratch_operands = 2 : i64, tpu.core_type = #tpu.core_type<tc>, window_params = [{transform_indices = @transform_0, window_bounds = array<i64: 256, 128>}, {transform_indices = @transform_1, window_bounds = array<i64: 128, 128>}, {transform_indices = @transform_2, window_bounds = array<i64: 1, 128>}, {transform_indices = @transform_3, window_bounds = array<i64: 2, 128>}, {transform_indices = @transform_4, window_bounds = array<i64: 128, 1>}, {transform_indices = @transform_5, window_bounds = array<i64: 8, 128>}]} {
    %c0_i32 = arith.constant 0 : i32
    %0 = arith.cmpi eq, %arg1, %c0_i32 : i32
    %c0_i32_0 = arith.constant 0 : i32
    %1 = arith.cmpi eq, %arg2, %c0_i32_0 : i32
    %2 = arith.andi %0, %1 : i1
    %3 = arith.extui %2 : i1 to i32
    %c0_i32_1 = arith.constant 0 : i32
    %4 = arith.cmpi ne, %3, %c0_i32_1 : i32
    scf.if %4 {
      %c0_14 = arith.constant 0 : index
      %c0_15 = arith.constant 0 : index
      %23 = vector.load %arg3[%c0_14, %c0_15] : memref<256x128xf32, #tpu.memory_space<vmem>>, vector<256x128xf32>
      %c0_16 = arith.constant 0 : index
      %c0_17 = arith.constant 0 : index
      %24 = vector.load %arg5[%c0_16, %c0_17] : memref<1x128xf32, #tpu.memory_space<vmem>>, vector<1x128xf32>
      %25 = vector.broadcast %24 : vector<1x128xf32> to vector<256x128xf32>
      %26 = arith.subf %23, %25 : vector<256x128xf32>
      %c0_18 = arith.constant 0 : index
      %c0_19 = arith.constant 0 : index
      %27 = vector.load %arg9[%c0_18, %c0_19] : memref<256x128xf32, #tpu.memory_space<vmem>>, vector<256x128xf32>
      tpu.vector_store %arg9[%c0_18, %c0_19], %26 {strides = array<i32>} : memref<256x128xf32, #tpu.memory_space<vmem>>, vector<256x128xf32>,
    } else {
    }
    %c0_i32_2 = arith.constant 0 : i32
    %5 = arith.cmpi eq, %arg2, %c0_i32_2 : i32
    %6 = arith.extui %5 : i1 to i32
    %c0_i32_3 = arith.constant 0 : i32
    %7 = arith.cmpi ne, %6, %c0_i32_3 : i32
    scf.if %7 {
      %cst_14 = arith.constant 0.000000e+00 : f32
      %23 = vector.broadcast %cst_14 : f32 to vector<128x128xf32>
      %c0_15 = arith.constant 0 : index
      %c0_16 = arith.constant 0 : index
      %24 = vector.load %arg10[%c0_15, %c0_16] : memref<128x128xf32, #tpu.memory_space<vmem>>, vector<128x128xf32>
      tpu.vector_store %arg10[%c0_15, %c0_16], %23 {strides = array<i32>} : memref<128x128xf32, #tpu.memory_space<vmem>>, vector<128x128xf32>,
    } else {
    }
    %c0 = arith.constant 0 : index
    %c0_4 = arith.constant 0 : index
    %8 = vector.load %arg4[%c0, %c0_4] : memref<128x128xf32, #tpu.memory_space<vmem>>, vector<128x128xf32>
    %c0_5 = arith.constant 0 : index
    %c0_6 = arith.constant 0 : index
    %9 = vector.load %arg6[%c0_5, %c0_6] : memref<2x128xf32, #tpu.memory_space<vmem>>, vector<1x128xf32>
    %10 = vector.broadcast %9 : vector<1x128xf32> to vector<128x128xf32>
    %11 = arith.subf %8, %10 : vector<128x128xf32>
    %c128_i32 = arith.constant 128 : i32
    %12 = arith.muli %arg2, %c128_i32 : i32
    %13 = tpu.assume_multiple %12, 128 : i32
    %14 = arith.index_cast %13 : i32 to index
    %c0_7 = arith.constant 0 : index
    %15 = vector.load %arg9[%14, %c0_7] : memref<256x128xf32, #tpu.memory_space<vmem>>, vector<128x128xf32>
    %c0_8 = arith.constant 0 : index
    %c0_9 = arith.constant 0 : index
    %16 = vector.load %arg10[%c0_8, %c0_9] : memref<128x128xf32, #tpu.memory_space<vmem>>, vector<128x128xf32>
    %cst = arith.constant dense<0.000000e+00> : vector<128x128xf32>
    %17 = tpu.matmul %15, %11, %cst {dimension_numbers = #tpu.dot_dimension_numbers<[0], [0], [1], [1], [0, 1, 1, 1], [], []>} : vector<128x128xf32>, vector<128x128xf32>, vector<128x128xf32> -> vector<128x128xf32>
    %18 = arith.addf %16, %17 : vector<128x128xf32>
    %c0_10 = arith.constant 0 : index
    %c0_11 = arith.constant 0 : index
    %19 = vector.load %arg10[%c0_10, %c0_11] : memref<128x128xf32, #tpu.memory_space<vmem>>, vector<128x128xf32>
    tpu.vector_store %arg10[%c0_10, %c0_11], %18 {strides = array<i32>} : memref<128x128xf32, #tpu.memory_space<vmem>>, vector<128x128xf32>,
    %c1_i32 = arith.constant 1 : i32
    %20 = arith.cmpi eq, %arg2, %c1_i32 : i32
    %21 = arith.extui %20 : i1 to i32
    %cst_12 = arith.constant 5.000000e-03 : f32
    %c0_i32_13 = arith.constant 0 : i32
    %22 = arith.cmpi ne, %21, %c0_i32_13 : i32
    scf.if %22 {
      %c0_14 = arith.constant 0 : index
      %c0_15 = arith.constant 0 : index
      %23 = vector.load %arg10[%c0_14, %c0_15] : memref<128x128xf32, #tpu.memory_space<vmem>>, vector<128x128xf32>
      %c1 = arith.constant 1 : index
      %c0_16 = arith.constant 0 : index
      %24 = vector.load %arg6[%c1, %c0_16] : memref<2x128xf32, #tpu.memory_space<vmem>>, vector<1x128xf32>
      %25 = vector.broadcast %24 : vector<1x128xf32> to vector<128x128xf32>
      %26 = arith.mulf %23, %25 : vector<128x128xf32>
      %c0_17 = arith.constant 0 : index
      %c0_18 = arith.constant 0 : index
      %27 = vector.load %arg7[%c0_17, %c0_18] : memref<128x1xf32, #tpu.memory_space<vmem>>, vector<128x1xf32>
      %28 = vector.broadcast %27 : vector<128x1xf32> to vector<128x128xf32>
      %29 = arith.mulf %26, %28 : vector<128x128xf32>
      %30 = arith.mulf %29, %29 : vector<128x128xf32>
      %31 = vector.shape_cast %30 : vector<128x128xf32> to vector<1x128x128xf32>
      %cst_19 = arith.constant dense<0.000000e+00> : vector<1xf32>
      %32 = vector.multi_reduction <add>, %31, %cst_19 [1, 2] : vector<1x128x128xf32> to vector<1xf32>
      %33 = vector.shape_cast %32 : vector<1xf32> to vector<1x1x1xf32>
      %34 = vector.extract %33[0, 0, 0] : f32 from vector<1x1x1xf32>
      %35 = arith.mulf %cst_12, %34 : f32
      %36 = arith.cmpi ne, %arg0, %arg1 : i32
      %37 = arith.extui %36 : i1 to i32
      %c0_i32_20 = arith.constant 0 : i32
      %38 = arith.cmpi ne, %37, %c0_i32_20 : i32
      scf.if %38 {
        %42 = tpu.iota {dimensions = array<i32: 0>} : vector<8x128xi32>
        %43 = tpu.iota {dimensions = array<i32: 1>} : vector<8x128xi32>
        %c0_i32_22 = arith.constant 0 : i32
        %44 = vector.broadcast %c0_i32_22 : i32 to vector<8x128xi32>
        %45 = arith.cmpi eq, %42, %44 : vector<8x128xi32>
        %c0_i32_23 = arith.constant 0 : i32
        %46 = vector.broadcast %c0_i32_23 : i32 to vector<8x128xi32>
        %47 = arith.cmpi eq, %43, %46 : vector<8x128xi32>
        %48 = arith.andi %45, %47 : vector<8x128xi1>
        %cst_24 = arith.constant 0.000000e+00 : f32
        %49 = vector.broadcast %35 : f32 to vector<8x128xf32>
        %50 = vector.broadcast %cst_24 : f32 to vector<8x128xf32>
        %51 = arith.select %48, %49, %50 : vector<8x128xi1>, vector<8x128xf32>
        %c0_25 = arith.constant 0 : index
        %c0_26 = arith.constant 0 : index
        %52 = vector.load %arg8[%c0_25, %c0_26] : memref<8x128xf32, #tpu.memory_space<vmem>>, vector<8x128xf32>
        tpu.vector_store %arg8[%c0_25, %c0_26], %51 {strides = array<i32>} : memref<8x128xf32, #tpu.memory_space<vmem>>, vector<8x128xf32>,
      } else {
      }
      %39 = arith.cmpi eq, %arg0, %arg1 : i32
      %40 = arith.extui %39 : i1 to i32
      %c0_i32_21 = arith.constant 0 : i32
      %41 = arith.cmpi ne, %40, %c0_i32_21 : i32
      scf.if %41 {
        %42 = tpu.iota {dimensions = array<i32: 0>} : vector<128x128xi32>
        %43 = tpu.iota {dimensions = array<i32: 1>} : vector<128x128xi32>
        %44 = arith.cmpi eq, %42, %43 : vector<128x128xi32>
        %cst_22 = arith.constant 1.000000e+00 : f32
        %45 = vector.broadcast %cst_22 : f32 to vector<128x128xf32>
        %46 = arith.subf %29, %45 : vector<128x128xf32>
        %47 = arith.mulf %46, %46 : vector<128x128xf32>
        %48 = vector.broadcast %cst_12 : f32 to vector<128x128xf32>
        %49 = arith.mulf %48, %29 : vector<128x128xf32>
        %50 = arith.mulf %49, %29 : vector<128x128xf32>
        %51 = arith.subf %47, %50 : vector<128x128xf32>
        %cst_23 = arith.constant 0.000000e+00 : f32
        %52 = vector.broadcast %cst_23 : f32 to vector<128x128xf32>
        %53 = arith.select %44, %51, %52 : vector<128x128xi1>, vector<128x128xf32>
        %54 = vector.shape_cast %53 : vector<128x128xf32> to vector<1x128x128xf32>
        %cst_24 = arith.constant dense<0.000000e+00> : vector<1xf32>
        %55 = vector.multi_reduction <add>, %54, %cst_24 [1, 2] : vector<1x128x128xf32> to vector<1xf32>
        %56 = vector.shape_cast %55 : vector<1xf32> to vector<1x1x1xf32>
        %57 = vector.extract %56[0, 0, 0] : f32 from vector<1x1x1xf32>
        %58 = arith.addf %35, %57 : f32
        %59 = tpu.iota {dimensions = array<i32: 0>} : vector<8x128xi32>
        %60 = tpu.iota {dimensions = array<i32: 1>} : vector<8x128xi32>
        %c0_i32_25 = arith.constant 0 : i32
        %61 = vector.broadcast %c0_i32_25 : i32 to vector<8x128xi32>
        %62 = arith.cmpi eq, %59, %61 : vector<8x128xi32>
        %c0_i32_26 = arith.constant 0 : i32
        %63 = vector.broadcast %c0_i32_26 : i32 to vector<8x128xi32>
        %64 = arith.cmpi eq, %60, %63 : vector<8x128xi32>
        %65 = arith.andi %62, %64 : vector<8x128xi1>
        %cst_27 = arith.constant 0.000000e+00 : f32
        %66 = vector.broadcast %58 : f32 to vector<8x128xf32>
        %67 = vector.broadcast %cst_27 : f32 to vector<8x128xf32>
        %68 = arith.select %65, %66, %67 : vector<8x128xi1>, vector<8x128xf32>
        %c0_28 = arith.constant 0 : index
        %c0_29 = arith.constant 0 : index
        %69 = vector.load %arg8[%c0_28, %c0_29] : memref<8x128xf32, #tpu.memory_space<vmem>>, vector<8x128xf32>
        tpu.vector_store %arg8[%c0_28, %c0_29], %68 {strides = array<i32>} : memref<8x128xf32, #tpu.memory_space<vmem>>, vector<8x128xf32>,
      } else {
      }
    } else {
    }
    return
  }
  func.func @transform_0(%arg0: i32, %arg1: i32, %arg2: i32) -> (i32, i32) {
    %c0_i32 = arith.constant 0 : i32
    %c0_i32_0 = arith.constant 0 : i32
    return %c0_i32, %arg0 : i32, i32
  }
  func.func @transform_1(%arg0: i32, %arg1: i32, %arg2: i32) -> (i32, i32) {
    %c0_i32 = arith.constant 0 : i32
    return %arg2, %arg1 : i32, i32
  }
  func.func @transform_2(%arg0: i32, %arg1: i32, %arg2: i32) -> (i32, i32) {
    %c0_i32 = arith.constant 0 : i32
    %c0_i32_0 = arith.constant 0 : i32
    return %c0_i32, %arg0 : i32, i32
  }
  func.func @transform_3(%arg0: i32, %arg1: i32, %arg2: i32) -> (i32, i32) {
    %c0_i32 = arith.constant 0 : i32
    %c0_i32_0 = arith.constant 0 : i32
    return %c0_i32, %arg1 : i32, i32
  }
  func.func @transform_4(%arg0: i32, %arg1: i32, %arg2: i32) -> (i32, i32) {
    %c0_i32 = arith.constant 0 : i32
    %c0_i32_0 = arith.constant 0 : i32
    return %arg0, %c0_i32 : i32, i32
  }
  func.func @transform_5(%arg0: i32, %arg1: i32, %arg2: i32) -> (i32, i32) {
    %c0_i32 = arith.constant 0 : i32
    return %arg0, %arg1 : i32, i32
  }
}

</mosaic_0001>

<bundles_post_ra>
// kernel: barlow_loss.2
= control target key start
LH: loop header
LB: loop body
LE: loop exit
PB: predicated region body
PF: predicated region fallthrough
CT: control target
= control target key end

     0   :  { %9 = vsyncpa [#allocation3], 0  ;;  %s1626_s0 = inlined_call_operand.hbm [shape: f32[256,256], index: 0, kind: input, shape index: {}]   ;;  %s1627_s1 = inlined_call_operand.hbm [shape: f32[256,256], index: 1, kind: input, shape index: {}]   ;;  %s1628_s2 = inlined_call_operand.vmem [shape: f32[2,256], index: 2, kind: output, shape index: {0}]   ;;  %s1629_s3 = inlined_call_operand.vmem [shape: f32[2,256], index: 3, kind: output, shape index: {1}]  }
   0x1   :  { %10 = vsyncpa [#allocation5], 0  ;;  %s888_s12 = smov [#allocation2]   ;;  %s840_s16 = scalar_lea.hbm %s1626_s0, 8192 }
   0x2   :  { %s16_s13 = sshll.u32 %s888_s12, 4  ;;  %p841_p0 = scmp.ne.s32.totalorder %s1626_s0, %s840_s16  ;;  %s17_s13 = int_to_ptr.vmem [resolvable:$true] %s16_s13 }
   0x3   :  { %p844_p1 = scmp.lt.u32.totalorder %s840_s16, %s1626_s0 }
   0x5   :  { %p846_p2 = pnand %p844_p1, %p841_p0 }
   0x7   :  { %849 = shalt.err (!%p846_p2)
}
   0x8   :  { %s850_s21 = scalar_lea.vmem %s17_s13, 8192  ;;  %p855_p4 = scmp.lt.s32.totalorder %s17_s13, %s17_s13 }
   0x9   :  { %p851_p3 = scmp.ne.s32.totalorder %s17_s13, %s850_s21  ;;  %p856_p5 = scmp.lt.s32.totalorder %s850_s21, %s850_s21 }
   0xb   :  { %p857_p6 = por %p856_p5, %p855_p4 }
   0xd   :  { %p858_p7 = pnand %p857_p6, %p851_p3 }
   0xf   :  { %861 = shalt.err (!%p858_p7)
}
  0x10   :  { %s889_s22 = smov 256   ;;  %s890_s23 = smov 16  }
  0x11   :  { %22 = dma.hbm_to_vmem [thread:$0]  %s1626_s0, 8192, %s17_s13, [#allocation3], %s889_s22, %s889_s22, %s890_s23  }
  0x12   :  { %s891_s26 = smov [#allocation4]   ;;  %s862_s30 = scalar_lea.hbm %s1627_s1, 8192 }
  0x13   :  { %s28_s27 = sshll.u32 %s891_s26, 4  ;;  %p863_p8 = scmp.ne.s32.totalorder %s1627_s1, %s862_s30  ;;  %s29_s27 = int_to_ptr.vmem [resolvable:$true] %s28_s27 }
  0x14   :  { %p866_p9 = scmp.lt.u32.totalorder %s862_s30, %s1627_s1 }
  0x16   :  { %p868_p10 = pnand %p866_p9, %p863_p8 }
  0x18   :  { %871 = shalt.err (!%p868_p10)
}
  0x19   :  { %s872_s8 = scalar_lea.vmem %s29_s27, 8192  ;;  %p877_p12 = scmp.lt.s32.totalorder %s29_s27, %s29_s27 }
  0x1a   :  { %p873_p11 = scmp.ne.s32.totalorder %s29_s27, %s872_s8  ;;  %p878_p13 = scmp.lt.s32.totalorder %s872_s8, %s872_s8 }
  0x1c   :  { %p879_p0 = por %p878_p13, %p877_p12 }
  0x1e   :  { %p880_p1 = pnand %p879_p0, %p873_p11 }
  0x20   :  { %883 = shalt.err (!%p880_p1)
}
  0x21   :  { %34 = dma.hbm_to_vmem [thread:$0]  %s1627_s1, 8192, %s29_s27, [#allocation5], %s889_s22, %s889_s22, %s890_s23  }
  0x22   :  { %884 = dma.done.wait [#allocation3], 8192  }
  0x23   :  { %885 = vsyncadd [#allocation3], 4294959104 }
  0x24   :  { %886 = dma.done.wait [#allocation5], 8192  }
  0x25   :  { %887 = vsyncadd [#allocation5], 4294959104  ;;  %v937_v0 = vld [vmem:[#allocation2] sm:$0xff]  ;;  %v939_v1 = vld [vmem:[#allocation2 + $0x8] sm:$0xff] }
  0x26   :  { %v941_v2 = vld [vmem:[#allocation2 + $0x10] sm:$0xff]  ;;  %v943_v3 = vld [vmem:[#allocation2 + $0x18] sm:$0xff]  ;;  %v945_v4 = vld [vmem:[#allocation2 + $0x20] sm:$0xff] }
  0x27   :  { %v947_v5 = vld [vmem:[#allocation2 + $0x28] sm:$0xff]  ;;  %v105_v6 = vadd.f32 %v941_v2, %v937_v0  ;;  %v951_v7 = vld [vmem:[#allocation2 + $0x30] sm:$0xff]  ;;  %v142_v8 = vadd.f32 %v943_v3, %v939_v1  ;;  %v955_v9 = vld [vmem:[#allocation2 + $0x38] sm:$0xff] }
  0x28   :  { %v958_v11 = vld [vmem:[#allocation2 + $0x40] sm:$0xff]  ;;  %v961_v13 = vld [vmem:[#allocation2 + $0x48] sm:$0xff]  ;;  %v964_v15 = vld [vmem:[#allocation2 + $0x50] sm:$0xff] }
  0x29   :  { %v106_v10 = vadd.f32 %v105_v6, %v945_v4  ;;  %v143_v12 = vadd.f32 %v142_v8, %v947_v5  ;;  %v967_v17 = vld [vmem:[#allocation2 + $0x58] sm:$0xff]  ;;  %v970_v19 = vld [vmem:[#allocation2 + $0x60] sm:$0xff]  ;;  %v973_v21 = vld [vmem:[#allocation2 + $0x68] sm:$0xff] }
  0x2a   :  { %v976_v23 = vld [vmem:[#allocation2 + $0x70] sm:$0xff]  ;;  %v979_v25 = vld [vmem:[#allocation2 + $0x78] sm:$0xff]  ;;  %v982_v27 = vld [vmem:[#allocation2 + $0x80] sm:$0xff] }
  0x2b   :  { %v107_v14 = vadd.f32 %v106_v10, %v951_v7  ;;  %v144_v16 = vadd.f32 %v143_v12, %v955_v9  ;;  %v985_v29 = vld [vmem:[#allocation2 + $0x88] sm:$0xff]  ;;  %v988_v31 = vld [vmem:[#allocation2 + $0x90] sm:$0xff]  ;;  %v991_v33 = vld [vmem:[#allocation2 + $0x98] sm:$0xff] }
  0x2c   :  { %v994_v35 = vld [vmem:[#allocation2 + $0xa0] sm:$0xff]  ;;  %v997_v37 = vld [vmem:[#allocation2 + $0xa8] sm:$0xff]  ;;  %v1000_v39 = vld [vmem:[#allocation2 + $0xb0] sm:$0xff] }
  0x2d   :  { %v108_v18 = vadd.f32 %v107_v14, %v958_v11  ;;  %v145_v20 = vadd.f32 %v144_v16, %v961_v13  ;;  %v1003_v41 = vld [vmem:[#allocation2 + $0xb8] sm:$0xff]  ;;  %v1006_v43 = vld [vmem:[#allocation2 + $0xc0] sm:$0xff]  ;;  %v1008_v44 = vld [vmem:[#allocation2 + $0xc8] sm:$0xff] }
  0x2e   :  { %v1011_v46 = vld [vmem:[#allocation2 + $0xd0] sm:$0xff]  ;;  %v1014_v48 = vld [vmem:[#allocation4] sm:$0xff]  ;;  %v1016_v49 = vld [vmem:[#allocation4 + $0x8] sm:$0xff] }
  0x2f   :  { %v109_v22 = vadd.f32 %v108_v18, %v964_v15  ;;  %v146_v24 = vadd.f32 %v145_v20, %v967_v17  ;;  %1700 = vst [vmem:[#allocation8_spill] sm:$0xff] %v1014_v48  ;;  %1701 = vst [vmem:[#allocation9_spill] sm:$0xff] %v1016_v49  ;;  %v1019_v51 = vld [vmem:[#allocation4 + $0x10] sm:$0xff]  ;;  %v1021_v52 = vld [vmem:[#allocation4 + $0x18] sm:$0xff] }
  0x30   :  { %1702 = vst [vmem:[#allocation10_spill] sm:$0xff] %v1019_v51  ;;  %1703 = vst [vmem:[#allocation11_spill] sm:$0xff] %v1021_v52  ;;  %v1023_v53 = vld [vmem:[#allocation4 + $0x20] sm:$0xff]  ;;  %v1025_v54 = vld [vmem:[#allocation2 + $0xd8] sm:$0xff]  ;;  %v451_v57 = vadd.f32 %v1019_v51, %v1014_v48  ;;  %v488_v58 = vadd.f32 %v1021_v52, %v1016_v49 }
  0x31   :  { %v110_v26 = vadd.f32 %v109_v22, %v970_v19  ;;  %v147_v28 = vadd.f32 %v146_v24, %v973_v21  ;;  %1704 = vst [vmem:[#allocation12_spill] sm:$0xff] %v1023_v53  ;;  %v1028_v56 = vld [vmem:[#allocation4 + $0x28] sm:$0xff]  ;;  %v1034_v59 = vld [vmem:[#allocation2 + $0xe0] sm:$0xff]  ;;  %v1037_v61 = vld [vmem:[#allocation4 + $0x30] sm:$0xff] }
  0x32   :  { %1705 = vst [vmem:[#allocation13_spill] sm:$0xff] %v1028_v56  ;;  %1706 = vst [vmem:[#allocation14_spill] sm:$0xff] %v1037_v61  ;;  %v1039_v62 = vld [vmem:[#allocation4 + $0x38] sm:$0xff]  ;;  %v1041_v63 = vld [vmem:[#allocation2 + $0xe8] sm:$0xff]  ;;  %v452_v8 = vadd.f32 %v451_v57, %v1023_v53  ;;  %v489_v10 = vadd.f32 %v488_v58, %v1028_v56 }
  0x33   :  { %v111_v30 = vadd.f32 %v110_v26, %v976_v23  ;;  %v148_v32 = vadd.f32 %v147_v28, %v979_v25  ;;  %1707 = vst [vmem:[#allocation15_spill] sm:$0xff] %v1039_v62  ;;  %v1046_v12 = vld [vmem:[#allocation2 + $0xf0] sm:$0xff]  ;;  %v1049_v16 = vld [vmem:[#allocation4 + $0x40] sm:$0xff]  ;;  %v1051_v18 = vld [vmem:[#allocation4 + $0x48] sm:$0xff] }
  0x34   :  { %1708 = vst [vmem:[#allocation16_spill] sm:$0xff] %v1049_v16  ;;  %1709 = vst [vmem:[#allocation17_spill] sm:$0xff] %v1051_v18  ;;  %v1053_v20 = vld [vmem:[#allocation2 + $0xf8] sm:$0xff]  ;;  %v453_v24 = vadd.f32 %v452_v8, %v1037_v61  ;;  %v490_v26 = vadd.f32 %v489_v10, %v1039_v62  ;;  %v1058_v28 = vld [vmem:[#allocation2 + $0x100] sm:$0xff] }
  0x35   :  { %v112_v34 = vadd.f32 %v111_v30, %v982_v27  ;;  %v149_v36 = vadd.f32 %v148_v32, %v985_v29  ;;  %v1061_v32 = vld [vmem:[#allocation4 + $0x50] sm:$0xff]  ;;  %v1076_v57 = vld [vmem:[#allocation4 + $0x60] sm:$0xff]  ;;  %v1078_v58 = vld [vmem:[#allocation4 + $0x68] sm:$0xff] }
  0x36   :  { %1710 = vst [vmem:[#allocation18_spill] sm:$0xff] %v1061_v32  ;;  %1712 = vst [vmem:[#allocation20_spill] sm:$0xff] %v1076_v57  ;;  %v1082_v8 = vld [vmem:[#allocation2 + $0x120] sm:$0xff]  ;;  %v1116_v61 = vld [vmem:[#allocation4 + $0x88] sm:$0xff] }
  0x37   :  { %v113_v38 = vadd.f32 %v112_v34, %v988_v31  ;;  %v150_v40 = vadd.f32 %v149_v36, %v991_v33  ;;  %v1063_v34 = vld [vmem:[#allocation4 + $0x58] sm:$0xff]  ;;  %v1065_v36 = vld [vmem:[#allocation2 + $0x108] sm:$0xff]  ;;  %1713 = vst [vmem:[#allocation21_spill] sm:$0xff] %v1078_v58  ;;  %v1114_v62 = vld [vmem:[#allocation4 + $0x80] sm:$0xff] }
  0x38   :  { %1711 = vst [vmem:[#allocation19_spill] sm:$0xff] %v1063_v34  ;;  %1717 = vst [vmem:[#allocation25_spill] sm:$0xff] %v1114_v62  ;;  %v1121_v56 = vld [vmem:[#allocation2 + $0x168] sm:$0xff]  ;;  %v1124_v53 = vld [vmem:[#allocation2 + $0x170] sm:$0xff] }
  0x39   :  { %v114_v42 = vadd.f32 %v113_v38, %v994_v35  ;;  %v151_v45 = vadd.f32 %v150_v40, %v997_v37  ;;  %v454_v40 = vadd.f32 %v453_v24, %v1049_v16  ;;  %v1088_v24 = vld [vmem:[#allocation2 + $0x130] sm:$0xff]  ;;  %1718 = vst [vmem:[#allocation26_spill] sm:$0xff] %v1116_v61  ;;  %1720 = vst [vmem:[#allocation28_spill] sm:$0xff] %v1121_v56  ;;  %v1134_v51 = vld [vmem:[#allocation4 + $0x98] sm:$0xff] }
  0x3a   :  { %v1106_v16 = vld [vmem:[#allocation2 + $0x150] sm:$0xff]  ;;  %1721 = vst [vmem:[#allocation29_spill] sm:$0xff] %v1124_v53  ;;  %1724 = vst [vmem:[#allocation32_spill] sm:$0xff] %v1134_v51  ;;  %v1139_v49 = vld [vmem:[#allocation2 + $0x188] sm:$0xff] }
  0x3b   :  { %v115_v47 = vadd.f32 %v114_v42, %v1000_v39  ;;  %v152_v50 = vadd.f32 %v151_v45, %v1003_v41  ;;  %v491_v42 = vadd.f32 %v490_v26, %v1051_v18  ;;  %v1070_v45 = vld [vmem:[#allocation2 + $0x110] sm:$0xff]  ;;  %v1093_v18 = vld [vmem:[#allocation2 + $0x138] sm:$0xff]  ;;  %1726 = vst [vmem:[#allocation34_spill] sm:$0xff] %v1139_v49 }
  0x3c   :  { %v1132_v52 = vld [vmem:[#allocation4 + $0x90] sm:$0xff] }
  0x3d   :  { %v116_v55 = vadd.f32 %v115_v47, %v1006_v43  ;;  %v153_v60 = vadd.f32 %v152_v50, %v1008_v44  ;;  %v1073_v50 = vld [vmem:[#allocation2 + $0x118] sm:$0xff]  ;;  %1723 = vst [vmem:[#allocation31_spill] sm:$0xff] %v1132_v52  ;;  %v1142_v48 = vld [vmem:[#allocation2 + $0x190] sm:$0xff] }
  0x3e   :  { %1727 = vst [vmem:[#allocation35_spill] sm:$0xff] %v1142_v48 }
  0x3f   :  { %v117_v6 = vadd.f32 %v116_v55, %v1011_v46  ;;  %v154_v14 = vadd.f32 %v153_v60, %v1025_v54  ;;  %v455_v60 = vadd.f32 %v454_v40, %v1061_v32  ;;  %v1103_v32 = vld [vmem:[#allocation2 + $0x148] sm:$0xff] }
  0x41   :  { %v118_v22 = vadd.f32 %v117_v6, %v1034_v59  ;;  %v155_v30 = vadd.f32 %v154_v14, %v1041_v63  ;;  %v492_v6 = vadd.f32 %v491_v42, %v1063_v34  ;;  %v1085_v14 = vld [vmem:[#allocation2 + $0x128] sm:$0xff]  ;;  %v1096_v42 = vld [vmem:[#allocation4 + $0x70] sm:$0xff]  ;;  %v1098_v34 = vld [vmem:[#allocation4 + $0x78] sm:$0xff] }
  0x42   :  { %1714 = vst [vmem:[#allocation22_spill] sm:$0xff] %v1096_v42  ;;  %1715 = vst [vmem:[#allocation23_spill] sm:$0xff] %v1098_v34 }
  0x43   :  { %v119_v38 = vadd.f32 %v118_v22, %v1046_v12  ;;  %v156_v47 = vadd.f32 %v155_v30, %v1053_v20  ;;  %v456_v30 = vadd.f32 %v455_v60, %v1076_v57 }
  0x45   :  { %v120_v55 = vadd.f32 %v119_v38, %v1058_v28  ;;  %v157_v10 = vadd.f32 %v156_v47, %v1065_v36  ;;  %v493_v38 = vadd.f32 %v492_v6, %v1078_v58  ;;  %v1100_v47 = vld [vmem:[#allocation2 + $0x140] sm:$0xff]  ;;  %v457_v6 = vadd.f32 %v456_v30, %v1096_v42  ;;  %v1111_v58 = vld [vmem:[#allocation2 + $0x158] sm:$0xff] }
  0x46   :  { %1716 = vst [vmem:[#allocation24_spill] sm:$0xff] %v1111_v58 }
  0x47   :  { %v121_v22 = vadd.f32 %v120_v55, %v1070_v45  ;;  %v158_v26 = vadd.f32 %v157_v10, %v1073_v50 }
  0x49   :  { %v122_v40 = vadd.f32 %v121_v22, %v1082_v8  ;;  %v159_v55 = vadd.f32 %v158_v26, %v1085_v14  ;;  %v494_v22 = vadd.f32 %v493_v38, %v1098_v34  ;;  %v1118_v26 = vld [vmem:[#allocation2 + $0x160] sm:$0xff]  ;;  %v458_v38 = vadd.f32 %v457_v6, %v1114_v62  ;;  %v1129_v34 = vld [vmem:[#allocation2 + $0x178] sm:$0xff] }
  0x4a   :  { %1719 = vst [vmem:[#allocation27_spill] sm:$0xff] %v1118_v26  ;;  %1722 = vst [vmem:[#allocation30_spill] sm:$0xff] %v1129_v34 }
  0x4b   :  { %v123_v10 = vadd.f32 %v122_v40, %v1088_v24  ;;  %v160_v60 = vadd.f32 %v159_v55, %v1093_v18 }
  0x4d   :  { %v124_v57 = vadd.f32 %v123_v10, %v1100_v47  ;;  %v161_v40 = vadd.f32 %v160_v60, %v1103_v32  ;;  %v495_v10 = vadd.f32 %v494_v22, %v1116_v61  ;;  %v1136_v60 = vld [vmem:[#allocation2 + $0x180] sm:$0xff]  ;;  %v459_v22 = vadd.f32 %v458_v38, %v1132_v52  ;;  %v1147_v61 = vld [vmem:[#allocation2 + $0x198] sm:$0xff] }
  0x4e   :  { %1725 = vst [vmem:[#allocation33_spill] sm:$0xff] %v1136_v60 }
  0x4f   :  { %v125_v55 = vadd.f32 %v124_v57, %v1106_v16  ;;  %v162_v30 = vadd.f32 %v161_v40, %v1111_v58  ;;  %v1152_v58 = vld [vmem:[#allocation4 + $0xa8] sm:$0xff] }
  0x50   :  { %1729 = vst [vmem:[#allocation37_spill] sm:$0xff] %v1152_v58 }
  0x51   :  { %v126_v42 = vadd.f32 %v125_v55, %v1118_v26  ;;  %v163_v57 = vadd.f32 %v162_v30, %v1121_v56  ;;  %v496_v55 = vadd.f32 %v495_v10, %v1134_v51  ;;  %v1150_v26 = vld [vmem:[#allocation4 + $0xa0] sm:$0xff]  ;;  %v1165_v51 = vld [vmem:[#allocation2 + $0x1b8] sm:$0xff] }
  0x52   :  { %1728 = vst [vmem:[#allocation36_spill] sm:$0xff] %v1150_v26  ;;  %v1154_v30 = vld [vmem:[#allocation2 + $0x1a0] sm:$0xff]  ;;  %v460_v10 = vadd.f32 %v459_v22, %v1150_v26  ;;  %1733 = vst [vmem:[#allocation41_spill] sm:$0xff] %v1165_v51  ;;  %v1170_v56 = vld [vmem:[#allocation4 + $0xb8] sm:$0xff] }
  0x53   :  { %v127_v40 = vadd.f32 %v126_v42, %v1124_v53  ;;  %v164_v6 = vadd.f32 %v163_v57, %v1129_v34  ;;  %1730 = vst [vmem:[#allocation38_spill] sm:$0xff] %v1154_v30  ;;  %v1157_v53 = vld [vmem:[#allocation2 + $0x1a8] sm:$0xff]  ;;  %v1160_v34 = vld [vmem:[#allocation2 + $0x1b0] sm:$0xff]  ;;  %1735 = vst [vmem:[#allocation43_spill] sm:$0xff] %v1170_v56 }
  0x54   :  { %1731 = vst [vmem:[#allocation39_spill] sm:$0xff] %v1157_v53  ;;  %1732 = vst [vmem:[#allocation40_spill] sm:$0xff] %v1160_v34 }
  0x55   :  { %v128_v62 = vadd.f32 %v127_v40, %v1136_v60  ;;  %v165_v42 = vadd.f32 %v164_v6, %v1139_v49  ;;  %v497_v40 = vadd.f32 %v496_v55, %v1152_v58  ;;  %v1168_v60 = vld [vmem:[#allocation4 + $0xb0] sm:$0xff]  ;;  %v1176_v49 = vld [vmem:[#allocation2 + $0x1c8] sm:$0xff]  ;;  %v1181_v58 = vld [vmem:[#allocation4 + $0xc0] sm:$0xff] }
  0x56   :  { %1734 = vst [vmem:[#allocation42_spill] sm:$0xff] %v1168_v60  ;;  %1737 = vst [vmem:[#allocation45_spill] sm:$0xff] %v1176_v49  ;;  %v461_v55 = vadd.f32 %v460_v10, %v1168_v60  ;;  %v1195_v10 = vld [vmem:[#allocation4 + $0xd8] sm:$0xff]  ;;  %v1199_v60 = vld [vmem:[#allocation2 + $0x1e0] sm:$0xff] }
  0x57   :  { %v129_v57 = vadd.f32 %v128_v62, %v1142_v48  ;;  %v166_v38 = vadd.f32 %v165_v42, %v1147_v61  ;;  %v1174_v48 = vld [vmem:[#allocation2 + $0x1c0] sm:$0xff]  ;;  %v498_v42 = vadd.f32 %v497_v40, %v1170_v56  ;;  %1738 = vst [vmem:[#allocation46_spill] sm:$0xff] %v1181_v58  ;;  %1743 = vst [vmem:[#allocation51_spill] sm:$0xff] %v1195_v10 }
  0x58   :  { %1736 = vst [vmem:[#allocation44_spill] sm:$0xff] %v1174_v48  ;;  %1744 = vst [vmem:[#allocation52_spill] sm:$0xff] %v1199_v60 }
  0x59   :  { %v130_v52 = vadd.f32 %v129_v57, %v1154_v30  ;;  %v167_v6 = vadd.f32 %v166_v38, %v1157_v53  ;;  %v1183_v57 = vld [vmem:[#allocation4 + $0xc8] sm:$0xff]  ;;  %v1187_v53 = vld [vmem:[#allocation2 + $0x1d0] sm:$0xff]  ;;  %v1233_v30 = vld [vmem:[#allocation4 + $0x118] sm:$0xff] }
  0x5a   :  { %1739 = vst [vmem:[#allocation47_spill] sm:$0xff] %v1183_v57  ;;  %1740 = vst [vmem:[#allocation48_spill] sm:$0xff] %v1187_v53 }
  0x5b   :  { %v131_v62 = vadd.f32 %v130_v52, %v1160_v34  ;;  %v168_v22 = vadd.f32 %v167_v6, %v1165_v51  ;;  %v1189_v52 = vld [vmem:[#allocation2 + $0x1d8] sm:$0xff]  ;;  %v462_v34 = vadd.f32 %v461_v55, %v1181_v58  ;;  %v499_v6 = vadd.f32 %v498_v42, %v1183_v57  ;;  %v1193_v51 = vld [vmem:[#allocation4 + $0xd0] sm:$0xff]  ;;  %v1207_v55 = vld [vmem:[#allocation4 + $0xe8] sm:$0xff]  ;;  %1755 = vst [vmem:[#allocation63_spill] sm:$0xff] %v1233_v30 }
  0x5c   :  { %1741 = vst [vmem:[#allocation49_spill] sm:$0xff] %v1189_v52  ;;  %1742 = vst [vmem:[#allocation50_spill] sm:$0xff] %v1193_v51  ;;  %v1211_v58 = vld [vmem:[#allocation2 + $0x1f0] sm:$0xff] }
  0x5d   :  { %v132_v26 = vadd.f32 %v131_v62, %v1174_v48  ;;  %v169_v38 = vadd.f32 %v168_v22, %v1176_v49  ;;  %v1201_v62 = vld [vmem:[#allocation2 + $0x1e8] sm:$0xff]  ;;  %v463_v22 = vadd.f32 %v462_v34, %v1193_v51  ;;  %v500_v49 = vadd.f32 %v499_v6, %v1195_v10  ;;  %v1205_v48 = vld [vmem:[#allocation4 + $0xe0] sm:$0xff]  ;;  %1747 = vst [vmem:[#allocation55_spill] sm:$0xff] %v1207_v55  ;;  %v1219_v34 = vld [vmem:[#allocation4 + $0xf8] sm:$0xff] }
  0x5e   :  { %1745 = vst [vmem:[#allocation53_spill] sm:$0xff] %v1201_v62  ;;  %1746 = vst [vmem:[#allocation54_spill] sm:$0xff] %v1205_v48  ;;  %v1225_v51 = vld [vmem:[#allocation4 + $0x100] sm:$0xff] }
  0x5f   :  { %v133_v40 = vadd.f32 %v132_v26, %v1187_v53  ;;  %v170_v56 = vadd.f32 %v169_v38, %v1189_v52  ;;  %1748 = vst [vmem:[#allocation56_spill] sm:$0xff] %v1211_v58  ;;  %v1213_v26 = vld [vmem:[#allocation2 + $0x1f8] sm:$0xff]  ;;  %v464_v38 = vadd.f32 %v463_v22, %v1205_v48  ;;  %v501_v52 = vadd.f32 %v500_v49, %v1207_v55  ;;  %v1217_v53 = vld [vmem:[#allocation4 + $0xf0] sm:$0xff] }
  0x60   :  { %1749 = vst [vmem:[#allocation57_spill] sm:$0xff] %v1213_v26  ;;  %1750 = vst [vmem:[#allocation58_spill] sm:$0xff] %v1217_v53  ;;  %v1231_v48 = vld [vmem:[#allocation4 + $0x110] sm:$0xff] }
  0x61   :  { %v134_v42 = vadd.f32 %v133_v40, %v1199_v60  ;;  %v171_v57 = vadd.f32 %v170_v56, %v1201_v62  ;;  %1751 = vst [vmem:[#allocation59_spill] sm:$0xff] %v1219_v34  ;;  %v465_v40 = vadd.f32 %v464_v38, %v1217_v53  ;;  %v502_v56 = vadd.f32 %v501_v52, %v1219_v34  ;;  %v1227_v62 = vld [vmem:[#allocation4 + $0x108] sm:$0xff]  ;;  %v1237_v34 = vld [vmem:[#allocation4 + $0x120] sm:$0xff] }
  0x62   :  { %1752 = vst [vmem:[#allocation60_spill] sm:$0xff] %v1225_v51  ;;  %1753 = vst [vmem:[#allocation61_spill] sm:$0xff] %v1227_v62  ;;  %v1239_v53 = vld [vmem:[#allocation4 + $0x128] sm:$0xff] }
  0x63   :  { %v135_v6 = vadd.f32 %v134_v42, %v1211_v58  ;;  %v172_v10 = vadd.f32 %v171_v57, %v1213_v26  ;;  %v466_v49 = vadd.f32 %v465_v40, %v1225_v51  ;;  %v503_v55 = vadd.f32 %v502_v56, %v1227_v62  ;;  %1754 = vst [vmem:[#allocation62_spill] sm:$0xff] %v1231_v48  ;;  %v1243_v62 = vld [vmem:[#allocation4 + $0x130] sm:$0xff]  ;;  %v1245_v51 = vld [vmem:[#allocation4 + $0x138] sm:$0xff] }
  0x64   :  { %1756 = vst [vmem:[#allocation64_spill] sm:$0xff] %v1237_v34  ;;  %1757 = vst [vmem:[#allocation65_spill] sm:$0xff] %v1239_v53 }
  0x65   :  { %v136_v60 = vrot.slane %v135_v6, 4  ;;  %v173_v22 = vrot.slane %v172_v10, 4  ;;  %v467_v38 = vadd.f32 %v466_v49, %v1231_v48  ;;  %v504_v52 = vadd.f32 %v503_v55, %v1233_v30  ;;  %1758 = vst [vmem:[#allocation66_spill] sm:$0xff] %v1243_v62  ;;  %1759 = vst [vmem:[#allocation67_spill] sm:$0xff] %v1245_v51  ;;  %v1251_v49 = vld [vmem:[#allocation4 + $0x148] sm:$0xff] }
  0x66   :  { %1761 = vst [vmem:[#allocation69_spill] sm:$0xff] %v1251_v49 }
  0x67   :  { %v137_v42 = vadd.f32 %v136_v60, %v135_v6  ;;  %v174_v57 = vadd.f32 %v173_v22, %v172_v10  ;;  %v468_v40 = vadd.f32 %v467_v38, %v1237_v34  ;;  %v505_v56 = vadd.f32 %v504_v52, %v1239_v53  ;;  %v1249_v22 = vld [vmem:[#allocation4 + $0x140] sm:$0xff]  ;;  %v1255_v53 = vld [vmem:[#allocation4 + $0x150] sm:$0xff]  ;;  %v1257_v34 = vld [vmem:[#allocation4 + $0x158] sm:$0xff] }
  0x68   :  { %1760 = vst [vmem:[#allocation68_spill] sm:$0xff] %v1249_v22  ;;  %1762 = vst [vmem:[#allocation70_spill] sm:$0xff] %v1255_v53 }
  0x69   :  { %v138_v26 = vrot.slane %v137_v42, 2  ;;  %v175_v58 = vrot.slane %v174_v57, 2  ;;  %v469_v6 = vadd.f32 %v468_v40, %v1243_v62  ;;  %v506_v55 = vadd.f32 %v505_v56, %v1245_v51  ;;  %1763 = vst [vmem:[#allocation71_spill] sm:$0xff] %v1257_v34  ;;  %v1261_v40 = vld [vmem:[#allocation4 + $0x160] sm:$0xff]  ;;  %v1263_v56 = vld [vmem:[#allocation4 + $0x168] sm:$0xff] }
  0x6a   :  { %1764 = vst [vmem:[#allocation72_spill] sm:$0xff] %v1261_v40  ;;  %1765 = vst [vmem:[#allocation73_spill] sm:$0xff] %v1263_v56 }
  0x6b   :  { %v139_v60 = vadd.f32 %v138_v26, %v137_v42  ;;  %v176_v10 = vadd.f32 %v175_v58, %v174_v57  ;;  %v470_v38 = vadd.f32 %v469_v6, %v1249_v22  ;;  %v507_v52 = vadd.f32 %v506_v55, %v1251_v49  ;;  %v1271_v49 = vld [vmem:[#allocation4 + $0x170] sm:$0xff]  ;;  %v1317_v22 = vld [vmem:[#allocation4 + $0x1a0] sm:$0xff] }
  0x6c   :  { %1766 = vst [vmem:[#allocation74_spill] sm:$0xff] %v1271_v49 }
  0x6d   :  { %v140_v30 = vrot.slane %v139_v60, 1  ;;  %v177_v48 = vrot.slane %v176_v10, 1  ;;  %v471_v42 = vadd.f32 %v470_v38, %v1255_v53  ;;  %v508_v57 = vadd.f32 %v507_v52, %v1257_v34  ;;  %v1305_v53 = vld [vmem:[#allocation4 + $0x198] sm:$0xff] }
  0x6f   :  { %v141_v26 = vadd.f32 %v140_v30, %v139_v60  ;;  %v178_v58 = vadd.f32 %v177_v48, %v176_v10  ;;  %v472_v6 = vadd.f32 %v471_v42, %v1261_v40  ;;  %v509_v55 = vadd.f32 %v508_v57, %v1263_v56  ;;  %v1273_v30 = vld [vmem:[#allocation4 + $0x178] sm:$0xff]  ;;  %v1291_v57 = vld [vmem:[#allocation4 + $0x188] sm:$0xff] }
  0x70   :  { %1767 = vst [vmem:[#allocation75_spill] sm:$0xff] %v1273_v30  ;;  %1769 = vst [vmem:[#allocation77_spill] sm:$0xff] %v1291_v57 }
  0x71   :  { %v1265_v51 = vmul.f32 0.00390625, %v141_v26  ;;  %v1267_v62 = vmul.f32 0.00390625, %v178_v58  ;;  %v473_v52 = vadd.f32 %v472_v6, %v1271_v49  ;;  %v510_v26 = vadd.f32 %v509_v55, %v1273_v30 }
  0x73   :  { %v181_v48 = vsub.f32 %v937_v0, %v1265_v51  ;;  %v182_v60 = vsub.f32 %v939_v1, %v1267_v62  ;;  %v183_v10 = vsub.f32 %v941_v2, %v1265_v51  ;;  %v184_v38 = vsub.f32 %v943_v3, %v1267_v62  ;;  %v1289_v0 = vld [vmem:[#allocation4 + $0x180] sm:$0xff] }
  0x74   :  { %v185_v58 = vsub.f32 %v945_v4, %v1265_v51  ;;  %v186_v42 = vsub.f32 %v947_v5, %v1267_v62  ;;  %1768 = vst [vmem:[#allocation76_spill] sm:$0xff] %v1289_v0  ;;  %v187_v1 = vsub.f32 %v951_v7, %v1265_v51  ;;  %v188_v2 = vsub.f32 %v955_v9, %v1267_v62  ;;  %v1303_v7 = vld [vmem:[#allocation4 + $0x190] sm:$0xff] }
  0x75   :  { %v245_v3 = vmul.f32 %v181_v48, %v181_v48  ;;  %v246_v6 = vmul.f32 %v182_v60, %v182_v60  ;;  %v247_v49 = vmul.f32 %v183_v10, %v183_v10  ;;  %v248_v55 = vmul.f32 %v184_v38, %v184_v38 }
  0x76   :  { %v474_v30 = vadd.f32 %v473_v52, %v1289_v0  ;;  %v511_v4 = vadd.f32 %v510_v26, %v1291_v57  ;;  %v189_v5 = vsub.f32 %v958_v11, %v1265_v51  ;;  %v190_v56 = vsub.f32 %v961_v13, %v1267_v62 }
  0x77   :  { %v249_v40 = vmul.f32 %v185_v58, %v185_v58  ;;  %v250_v34 = vmul.f32 %v186_v42, %v186_v42  ;;  %v191_v9 = vsub.f32 %v964_v15, %v1265_v51  ;;  %v192_v48 = vsub.f32 %v967_v17, %v1267_v62  ;;  %v1319_v17 = vld [vmem:[#allocation4 + $0x1a8] sm:$0xff] }
  0x78   :  { %v251_v60 = vmul.f32 %v187_v1, %v187_v1  ;;  %v252_v10 = vmul.f32 %v188_v2, %v188_v2  ;;  %v309_v38 = vadd.f32 %v247_v49, %v245_v3  ;;  %v346_v52 = vadd.f32 %v248_v55, %v246_v6 }
  0x79   :  { %v193_v11 = vsub.f32 %v970_v19, %v1265_v51  ;;  %v194_v13 = vsub.f32 %v973_v21, %v1267_v62  ;;  %v475_v26 = vadd.f32 %v474_v30, %v1303_v7  ;;  %v512_v58 = vadd.f32 %v511_v4, %v1305_v53 }
  0x7a   :  { %v253_v42 = vmul.f32 %v189_v5, %v189_v5  ;;  %v254_v57 = vmul.f32 %v190_v56, %v190_v56  ;;  %v310_v15 = vadd.f32 %v309_v38, %v249_v40  ;;  %v347_v0 = vadd.f32 %v346_v52, %v250_v34  ;;  %v1331_v5 = vld [vmem:[#allocation4 + $0x1b0] sm:$0xff] }
  0x7b   :  { %v195_v49 = vsub.f32 %v976_v23, %v1265_v51  ;;  %v196_v19 = vsub.f32 %v979_v25, %v1267_v62  ;;  %v255_v1 = vmul.f32 %v191_v9, %v191_v9  ;;  %v256_v21 = vmul.f32 %v192_v48, %v192_v48  ;;  %v1333_v25 = vld [vmem:[#allocation4 + $0x1b8] sm:$0xff] }
  0x7c   :  { %v311_v2 = vadd.f32 %v310_v15, %v251_v60  ;;  %v348_v30 = vadd.f32 %v347_v0, %v252_v10  ;;  %v197_v3 = vsub.f32 %v982_v27, %v1265_v51  ;;  %v198_v34 = vsub.f32 %v985_v29, %v1267_v62 }
  0x7d   :  { %v476_v40 = vadd.f32 %v475_v26, %v1317_v22  ;;  %v513_v56 = vadd.f32 %v512_v58, %v1319_v17  ;;  %v257_v6 = vmul.f32 %v193_v11, %v193_v11  ;;  %v258_v55 = vmul.f32 %v194_v13, %v194_v13  ;;  %v1345_v58 = vld [vmem:[#allocation4 + $0x1c0] sm:$0xff] }
  0x7e   :  { %v312_v23 = vadd.f32 %v311_v2, %v253_v42  ;;  %v349_v4 = vadd.f32 %v348_v30, %v254_v57  ;;  %v199_v0 = vsub.f32 %v988_v31, %v1265_v51  ;;  %v200_v27 = vsub.f32 %v991_v33, %v1267_v62  ;;  %v1347_v33 = vld [vmem:[#allocation4 + $0x1c8] sm:$0xff] }
  0x7f   :  { %v259_v9 = vmul.f32 %v195_v49, %v195_v49  ;;  %v260_v29 = vmul.f32 %v196_v19, %v196_v19  ;;  %v201_v10 = vsub.f32 %v994_v35, %v1265_v51  ;;  %v202_v57 = vsub.f32 %v997_v37, %v1267_v62 }
  0x80   :  { %v313_v48 = vadd.f32 %v312_v23, %v255_v1  ;;  %v350_v60 = vadd.f32 %v349_v4, %v256_v21  ;;  %v477_v38 = vadd.f32 %v476_v40, %v1331_v5  ;;  %v514_v52 = vadd.f32 %v513_v56, %v1333_v25  ;;  %v1359_v56 = vld [vmem:[#allocation4 + $0x1d0] sm:$0xff] }
  0x81   :  { %v261_v11 = vmul.f32 %v197_v3, %v197_v3  ;;  %v262_v13 = vmul.f32 %v198_v34, %v198_v34  ;;  %v203_v42 = vsub.f32 %v1000_v39, %v1265_v51  ;;  %v204_v35 = vsub.f32 %v1003_v41, %v1267_v62  ;;  %v1361_v41 = vld [vmem:[#allocation4 + $0x1d8] sm:$0xff] }
  0x82   :  { %v314_v31 = vadd.f32 %v313_v48, %v257_v6  ;;  %v351_v26 = vadd.f32 %v350_v60, %v258_v55  ;;  %v263_v15 = vmul.f32 %v199_v0, %v199_v0  ;;  %v264_v37 = vmul.f32 %v200_v27, %v200_v27 }
  0x83   :  { %v205_v1 = vsub.f32 %v1006_v43, %v1265_v51  ;;  %v206_v21 = vsub.f32 %v1008_v44, %v1267_v62  ;;  %v478_v2 = vadd.f32 %v477_v38, %v1345_v58  ;;  %v515_v30 = vadd.f32 %v514_v52, %v1347_v33  ;;  %v1377_v38 = vld [vmem:[#allocation4 + $0x1e8] sm:$0xff] }
  0x84   :  { %v315_v49 = vadd.f32 %v314_v31, %v259_v9  ;;  %v352_v19 = vadd.f32 %v351_v26, %v260_v29  ;;  %v265_v3 = vmul.f32 %v201_v10, %v201_v10  ;;  %v266_v34 = vmul.f32 %v202_v57, %v202_v57  ;;  %v1375_v57 = vld [vmem:[#allocation4 + $0x1e0] sm:$0xff] }
  0x85   :  { %v207_v6 = vsub.f32 %v1011_v46, %v1265_v51  ;;  %v208_v43 = vsub.f32 %v1025_v54, %v1267_v62  ;;  %v735_v44 = vcombine.low %v1265_v51, %v1267_v62  ;;  %v267_v55 = vmul.f32 %v203_v42, %v203_v42 }
  0x86   :  { %v316_v39 = vadd.f32 %v315_v49, %v261_v11  ;;  %v353_v40 = vadd.f32 %v352_v19, %v262_v13  ;;  %v268_v23 = vmul.f32 %v204_v35, %v204_v35  ;;  %v209_v27 = vsub.f32 %v1034_v59, %v1265_v51 }
  0x87   :  { %v210_v9 = vsub.f32 %v1041_v63, %v1267_v62  ;;  %v479_v29 = vadd.f32 %v478_v2, %v1359_v56  ;;  %v516_v46 = vadd.f32 %v515_v30, %v1361_v41  ;;  %v269_v48 = vmul.f32 %v205_v1, %v205_v1  ;;  %v1389_v1 = vld [vmem:[#allocation4 + $0x1f0] sm:$0xff] }
  0x88   :  { %v317_v4 = vadd.f32 %v316_v39, %v263_v15  ;;  %v354_v0 = vadd.f32 %v353_v40, %v264_v37  ;;  %v270_v60 = vmul.f32 %v206_v21, %v206_v21  ;;  %v211_v52 = vsub.f32 %v1046_v12, %v1265_v51 }
  0x89   :  { %v212_v59 = vsub.f32 %v1053_v20, %v1267_v62  ;;  %v271_v11 = vmul.f32 %v207_v6, %v207_v6  ;;  %v272_v63 = vmul.f32 %v208_v43, %v208_v43  ;;  %v213_v26 = vsub.f32 %v1058_v28, %v1265_v51  ;;  %v1391_v20 = vld [vmem:[#allocation4 + $0x1f8] sm:$0xff] }
  0x8a   :  { %v318_v54 = vadd.f32 %v317_v4, %v265_v3  ;;  %v355_v10 = vadd.f32 %v354_v0, %v266_v34  ;;  %v214_v42 = vsub.f32 %v1065_v36, %v1267_v62  ;;  %v480_v35 = vadd.f32 %v479_v29, %v1375_v57 }
  0x8b   :  { %v517_v15 = vadd.f32 %v516_v46, %v1377_v38  ;;  %v273_v37 = vmul.f32 %v209_v27, %v209_v27  ;;  %v274_v49 = vmul.f32 %v210_v9, %v210_v9  ;;  %v215_v21 = vsub.f32 %v1070_v45, %v1265_v51 }
  0x8c   :  { %v319_v13 = vadd.f32 %v318_v54, %v267_v55  ;;  %v356_v31 = vadd.f32 %v355_v10, %v268_v23  ;;  %v216_v28 = vsub.f32 %v1073_v50, %v1267_v62  ;;  %v275_v2 = vmul.f32 %v211_v52, %v211_v52 }
  0x8d   :  { %v276_v36 = vmul.f32 %v212_v59, %v212_v59  ;;  %v217_v34 = vsub.f32 %v1082_v8, %v1265_v51  ;;  %v218_v39 = vsub.f32 %v1085_v14, %v1267_v62  ;;  %v481_v40 = vadd.f32 %v480_v35, %v1389_v1 }
  0x8e   :  { %v320_v12 = vadd.f32 %v319_v13, %v269_v48  ;;  %v357_v19 = vadd.f32 %v356_v31, %v270_v60  ;;  %v518_v6 = vadd.f32 %v517_v15, %v1391_v20  ;;  %v277_v43 = vmul.f32 %v213_v26, %v213_v26 }
  0x8f   :  { %v278_v55 = vmul.f32 %v214_v42, %v214_v42  ;;  %v219_v50 = vsub.f32 %v1088_v24, %v1265_v51  ;;  %v220_v4 = vsub.f32 %v1093_v18, %v1267_v62  ;;  %v279_v0 = vmul.f32 %v215_v21, %v215_v21  ;;  %v1770_v18 = vld [vmem:[#allocation24_spill] sm:$0xff] }
  0x90   :  { %v321_v30 = vadd.f32 %v320_v12, %v271_v11  ;;  %v358_v3 = vadd.f32 %v357_v19, %v272_v63  ;;  %v280_v27 = vmul.f32 %v216_v28, %v216_v28  ;;  %v221_v14 = vsub.f32 %v1100_v47, %v1265_v51  ;;  %v1771_v47 = vld [vmem:[#allocation27_spill] sm:$0xff]  ;;  %v1774_v28 = vld [vmem:[#allocation30_spill] sm:$0xff] }
  0x91   :  { %v222_v29 = vsub.f32 %v1103_v32, %v1267_v62  ;;  %v482_v46 = vrot.slane %v481_v40, 4  ;;  %v519_v48 = vrot.slane %v518_v6, 4  ;;  %v281_v60 = vmul.f32 %v217_v34, %v217_v34  ;;  %v1772_v32 = vld [vmem:[#allocation28_spill] sm:$0xff] }
  0x92   :  { %v322_v45 = vadd.f32 %v321_v30, %v273_v37  ;;  %v359_v23 = vadd.f32 %v358_v3, %v274_v49  ;;  %v282_v54 = vmul.f32 %v218_v39, %v218_v39  ;;  %v223_v24 = vsub.f32 %v1106_v16, %v1265_v51  ;;  %v1773_v16 = vld [vmem:[#allocation29_spill] sm:$0xff] }
  0x93   :  { %v224_v59 = vsub.f32 %v1770_v18, %v1267_v62  ;;  %v283_v11 = vmul.f32 %v219_v50, %v219_v50  ;;  %v284_v63 = vmul.f32 %v220_v4, %v220_v4  ;;  %v225_v26 = vsub.f32 %v1771_v47, %v1265_v51  ;;  %v1775_v39 = vld [vmem:[#allocation33_spill] sm:$0xff] }
  0x94   :  { %v323_v8 = vadd.f32 %v322_v45, %v275_v2  ;;  %v360_v9 = vadd.f32 %v359_v23, %v276_v36  ;;  %v226_v42 = vsub.f32 %v1772_v32, %v1267_v62  ;;  %v483_v35 = vadd.f32 %v482_v46, %v481_v40  ;;  %v1776_v40 = vld [vmem:[#allocation34_spill] sm:$0xff]  ;;  %v1782_v32 = vld [vmem:[#allocation44_spill] sm:$0xff] }
  0x95   :  { %v520_v15 = vadd.f32 %v519_v48, %v518_v6  ;;  %v285_v37 = vmul.f32 %v221_v14, %v221_v14  ;;  %v286_v49 = vmul.f32 %v222_v29, %v222_v29  ;;  %v227_v21 = vsub.f32 %v1773_v16, %v1265_v51  ;;  %v1784_v16 = vld [vmem:[#allocation48_spill] sm:$0xff] }
  0x96   :  { %v324_v10 = vadd.f32 %v323_v8, %v277_v43  ;;  %v361_v52 = vadd.f32 %v360_v9, %v278_v55  ;;  %v228_v2 = vsub.f32 %v1774_v28, %v1267_v62  ;;  %v287_v36 = vmul.f32 %v223_v24, %v223_v24 }
  0x97   :  { %v288_v30 = vmul.f32 %v224_v59, %v224_v59  ;;  %v229_v43 = vsub.f32 %v1775_v39, %v1265_v51  ;;  %v230_v6 = vsub.f32 %v1776_v40, %v1267_v62  ;;  %v484_v55 = vrot.slane %v483_v35, 2  ;;  %v1785_v39 = vld [vmem:[#allocation49_spill] sm:$0xff]  ;;  %v1786_v40 = vld [vmem:[#allocation52_spill] sm:$0xff] }
  0x98   :  { %v325_v13 = vadd.f32 %v324_v10, %v279_v0  ;;  %v362_v31 = vadd.f32 %v361_v52, %v280_v27  ;;  %v521_v45 = vrot.slane %v520_v15, 2  ;;  %v289_v23 = vmul.f32 %v225_v26, %v225_v26  ;;  %v1777_v27 = vld [vmem:[#allocation35_spill] sm:$0xff] }
  0x99   :  { %v290_v50 = vmul.f32 %v226_v42, %v226_v42  ;;  %v231_v8 = vsub.f32 %v1777_v27, %v1265_v51  ;;  %v232_v9 = vsub.f32 %v1147_v61, %v1267_v62  ;;  %v291_v14 = vmul.f32 %v227_v21, %v227_v21  ;;  %v1779_v10 = vld [vmem:[#allocation39_spill] sm:$0xff]  ;;  %v1781_v61 = vld [vmem:[#allocation41_spill] sm:$0xff] }
  0x9a   :  { %v326_v12 = vadd.f32 %v325_v13, %v281_v60  ;;  %v363_v19 = vadd.f32 %v362_v31, %v282_v54  ;;  %v292_v29 = vmul.f32 %v228_v2, %v228_v2  ;;  %v1778_v60 = vld [vmem:[#allocation38_spill] sm:$0xff]  ;;  %v234_v52 = vsub.f32 %v1779_v10, %v1267_v62  ;;  %v1780_v31 = vld [vmem:[#allocation40_spill] sm:$0xff] }
  0x9b   :  { %v233_v54 = vsub.f32 %v1778_v60, %v1265_v51  ;;  %v485_v24 = vadd.f32 %v484_v55, %v483_v35  ;;  %v522_v18 = vadd.f32 %v521_v45, %v520_v15  ;;  %v293_v59 = vmul.f32 %v229_v43, %v229_v43  ;;  %v1783_v35 = vld [vmem:[#allocation45_spill] sm:$0xff]  ;;  %v1788_v10 = vld [vmem:[#allocation56_spill] sm:$0xff] }
  0x9c   :  { %v327_v3 = vadd.f32 %v326_v12, %v283_v11  ;;  %v364_v34 = vadd.f32 %v363_v19, %v284_v63  ;;  %v294_v11 = vmul.f32 %v230_v6, %v230_v6  ;;  %v235_v47 = vsub.f32 %v1780_v31, %v1265_v51  ;;  %v1787_v55 = vld [vmem:[#allocation53_spill] sm:$0xff] }
  0x9d   :  { %v236_v26 = vsub.f32 %v1781_v61, %v1267_v62  ;;  %v237_v42 = vsub.f32 %v1782_v32, %v1265_v51  ;;  %v238_v15 = vsub.f32 %v1783_v35, %v1267_v62  ;;  %v239_v21 = vsub.f32 %v1784_v16, %v1265_v51  ;;  %v1790_v16 = vld [vmem:[#allocation8_spill] sm:$0xff] }
  0x9e   :  { %v328_v4 = vadd.f32 %v327_v3, %v285_v37  ;;  %v365_v0 = vadd.f32 %v364_v34, %v286_v49  ;;  %v295_v37 = vmul.f32 %v231_v8, %v231_v8  ;;  %v296_v49 = vmul.f32 %v232_v9, %v232_v9 }
  0x9f   :  { %v486_v28 = vrot.slane %v485_v24, 1  ;;  %v523_v2 = vrot.slane %v522_v18, 1  ;;  %v240_v43 = vsub.f32 %v1785_v39, %v1267_v62  ;;  %v241_v6 = vsub.f32 %v1786_v40, %v1265_v51  ;;  %v1794_v40 = vld [vmem:[#allocation12_spill] sm:$0xff] }
  0xa0   :  { %v329_v46 = vadd.f32 %v328_v4, %v287_v36  ;;  %v366_v48 = vadd.f32 %v365_v0, %v288_v30  ;;  %v297_v36 = vmul.f32 %v233_v54, %v233_v54  ;;  %v298_v30 = vmul.f32 %v234_v52, %v234_v52 }
  0xa1   :  { %v242_v45 = vsub.f32 %v1787_v55, %v1267_v62  ;;  %v301_v27 = vmul.f32 %v237_v42, %v237_v42  ;;  %v302_v8 = vmul.f32 %v238_v15, %v238_v15  ;;  %v487_v9 = vadd.f32 %v486_v28, %v485_v24  ;;  %v1791_v28 = vld [vmem:[#allocation9_spill] sm:$0xff] }
  0xa2   :  { %v330_v63 = vadd.f32 %v329_v46, %v289_v23  ;;  %v367_v13 = vadd.f32 %v366_v48, %v290_v50  ;;  %v299_v23 = vmul.f32 %v235_v47, %v235_v47  ;;  %v300_v50 = vmul.f32 %v236_v26, %v236_v26 }
  0xa3   :  { %v892_v48 = vmov 1966171168   ;;  %v739_v54 = vlaneseq  ;;  %v243_v52 = vsub.f32 %v1788_v10, %v1265_v51  ;;  %v305_v61 = vmul.f32 %v241_v6, %v241_v6 }
  0xa4   :  { %v331_v12 = vadd.f32 %v330_v63, %v291_v14  ;;  %v368_v19 = vadd.f32 %v367_v13, %v292_v29  ;;  %v524_v14 = vadd.f32 %v523_v2, %v522_v18  ;;  %v737_v60 = vunpack.c.l.s4 %v892_v48  ;;  %v1801_v48 = vld [vmem:[#allocation17_spill] sm:$0xff] }
  0xa5   :  { %v303_v63 = vmul.f32 %v239_v21, %v239_v21  ;;  %v304_v13 = vmul.f32 %v240_v43, %v240_v43  ;;  %v306_v26 = vmul.f32 %v242_v45, %v242_v45  ;;  %v1455_v32 = vmul.f32 0.00390625, %v487_v9  ;;  %v1800_v9 = vld [vmem:[#allocation16_spill] sm:$0xff] }
  0xa6   :  { %v332_v3 = vadd.f32 %v331_v12, %v293_v59  ;;  %v369_v34 = vadd.f32 %v368_v19, %v294_v11  ;;  %v1789_v59 = vld [vmem:[#allocation57_spill] sm:$0xff]  ;;  %v1457_v24 = vmul.f32 0.00390625, %v524_v14  ;;  %v307_v12 = vmul.f32 %v243_v52, %v243_v52 }
  0xa7   :  { %v244_v11 = vsub.f32 %v1789_v59, %v1267_v62  ;;  %v527_v21 = vsub.f32 %v1790_v16, %v1455_v32  ;;  %v531_v6 = vsub.f32 %v1794_v40, %v1455_v32  ;;  %vm1471_vm0 = vcmp.lt.s32.totalorder %v739_v54, 256 }
  0xa8   :  { %v333_v4 = vadd.f32 %v332_v3, %v295_v37  ;;  %v370_v0 = vadd.f32 %v369_v34, %v296_v49  ;;  %v738_v37 = vunpack.c.0.s8 %v737_v60  ;;  %v740_v49 = vshrl.u32 %v739_v54, 7  ;;  %v1793_v3 = vld [vmem:[#allocation11_spill] sm:$0xff]  ;;  %v1802_v54 = vld [vmem:[#allocation18_spill] sm:$0xff] }
  0xa9   :  { %v308_v19 = vmul.f32 %v244_v11, %v244_v11  ;;  %v528_v2 = vsub.f32 %v1791_v28, %v1457_v24  ;;  %v530_v34 = vsub.f32 %v1793_v3, %v1457_v24  ;;  %v535_v14 = vsub.f32 %v1800_v9, %v1455_v32 }
  0xaa   :  { %v334_v29 = vadd.f32 %v333_v4, %v297_v36  ;;  %v371_v46 = vadd.f32 %v370_v0, %v298_v30  ;;  %v1792_v36 = vld [vmem:[#allocation10_spill] sm:$0xff]  ;;  %v1469_v55 = vsub.s32 %v738_v37, %v740_v49  ;;  %v536_v60 = vsub.f32 %v1801_v48, %v1457_v24 }
  0xab   :  { %v529_v30 = vsub.f32 %v1792_v36, %v1455_v32  ;;  %v1798_v4 = vld [vmem:[#allocation14_spill] sm:$0xff]  ;;  %v537_v10 = vsub.f32 %v1802_v54, %v1455_v32  ;;  %v591_v52 = vmul.f32 %v527_v21, %v527_v21  ;;  %v592_v59 = vmul.f32 %v528_v2, %v528_v2 }
  0xac   :  { %v335_v31 = vadd.f32 %v334_v29, %v299_v23  ;;  %v372_v47 = vadd.f32 %v371_v46, %v300_v50  ;;  %v1797_v23 = vld [vmem:[#allocation13_spill] sm:$0xff]  ;;  %v533_v0 = vsub.f32 %v1798_v4, %v1455_v32  ;;  %v1806_v49 = vld [vmem:[#allocation22_spill] sm:$0xff]  ;;  %v778_v3 = vcombine.low %v1455_v32, %v1457_v24 }
  0xad   :  { %v532_v50 = vsub.f32 %v1797_v23, %v1457_v24  ;;  %v593_v11 = vmul.f32 %v529_v30, %v529_v30  ;;  %v742_v30 = vrot.slane %v735_v44, %v1469_v55  ;;  %v600_v40 = vmul.f32 %v536_v60, %v536_v60  ;;  %v1808_v60 = vld [vmem:[#allocation25_spill] sm:$0xff] }
  0xae   :  { %v336_v18 = vadd.f32 %v335_v31, %v301_v27  ;;  %v373_v42 = vadd.f32 %v372_v47, %v302_v8  ;;  %v1799_v27 = vld [vmem:[#allocation15_spill] sm:$0xff]  ;;  %v597_v21 = vmul.f32 %v533_v0, %v533_v0  ;;  %v785_v4 = vrot.slane %v778_v3, %v1469_v55 }
  0xaf   :  { %v534_v8 = vsub.f32 %v1799_v27, %v1457_v24  ;;  %v1803_v47 = vld [vmem:[#allocation19_spill] sm:$0xff]  ;;  %v655_v2 = vadd.f32 %v593_v11, %v591_v52  ;;  %v601_v51 = vmul.f32 %v537_v10, %v537_v10  ;;  %v543_v54 = vsub.f32 %v1808_v60, %v1455_v32  ;;  %v1809_v52 = vld [vmem:[#allocation26_spill] sm:$0xff] }
  0xb0   :  { %v337_v35 = vadd.f32 %v336_v18, %v303_v63  ;;  %v374_v15 = vadd.f32 %v373_v42, %v304_v13  ;;  %v594_v63 = vmul.f32 %v530_v34, %v530_v34  ;;  %v1805_v42 = vld [vmem:[#allocation21_spill] sm:$0xff]  ;;  %v1819_v60 = vld [vmem:[#allocation51_spill] sm:$0xff] }
  0xb1   :  { %v540_v37 = vsub.f32 %v1805_v42, %v1457_v24  ;;  %v598_v28 = vmul.f32 %v534_v8, %v534_v8  ;;  %v1807_v8 = vld [vmem:[#allocation23_spill] sm:$0xff]  ;;  %v1811_v42 = vld [vmem:[#allocation32_spill] sm:$0xff] }
  0xb2   :  { %v338_v39 = vadd.f32 %v337_v35, %v305_v61  ;;  %v375_v43 = vadd.f32 %v374_v15, %v306_v26  ;;  %v538_v61 = vsub.f32 %v1803_v47, %v1457_v24  ;;  %v1804_v26 = vld [vmem:[#allocation20_spill] sm:$0xff]  ;;  %v596_v35 = vmul.f32 %v532_v50, %v532_v50 }
  0xb3   :  { %v539_v18 = vsub.f32 %v1804_v26, %v1455_v32  ;;  %v692_v36 = vadd.f32 %v594_v63, %v592_v59  ;;  %v749_v50 = vrot.slane %v742_v30, %v1469_v55  ;;  %v542_v9 = vsub.f32 %v1807_v8, %v1457_v24 }
  0xb4   :  { %v339_v29 = vadd.f32 %v338_v39, %v307_v12  ;;  %v376_v46 = vadd.f32 %v375_v43, %v308_v19  ;;  %v541_v12 = vsub.f32 %v1806_v49, %v1455_v32  ;;  %v595_v19 = vmul.f32 %v531_v6, %v531_v6 }
  0xb5   :  { %v599_v43 = vmul.f32 %v535_v14, %v535_v14  ;;  %v693_v23 = vadd.f32 %v692_v36, %v596_v35  ;;  %v602_v62 = vmul.f32 %v538_v61, %v538_v61  ;;  %755 = vst.msk [vmem:[%s1628_s2] ss:$2 sm:$0x3] %vm1471_vm0, %v749_v50  ;;  %v792_v14 = vrot.slane %v785_v4, %v1469_v55  ;;  %v1810_v61 = vld [vmem:[#allocation31_spill] sm:$0xff] }
  0xb6   :  { %v340_v13 = vrot.slane %v339_v29, 4  ;;  %v377_v31 = vrot.slane %v376_v46, 4  ;;  %v656_v6 = vadd.f32 %v655_v2, %v595_v19  ;;  %v544_v59 = vsub.f32 %v1809_v52, %v1457_v24  ;;  %v1813_v2 = vld [vmem:[#allocation37_spill] sm:$0xff] }
  0xb7   :  { %v603_v10 = vmul.f32 %v539_v18, %v539_v18  ;;  %v604_v11 = vmul.f32 %v540_v37, %v540_v37  ;;  %794 = vst.msk [vmem:[%s1629_s3] ss:$2 sm:$0x3] %vm1471_vm0, %v792_v14  ;;  %v545_v26 = vsub.f32 %v1810_v61, %v1455_v32  ;;  %v546_v49 = vsub.f32 %v1811_v42, %v1457_v24 }
  0xb8   :  { %v341_v15 = vadd.f32 %v340_v13, %v339_v29  ;;  %v378_v16 = vadd.f32 %v377_v31, %v376_v46  ;;  %v657_v44 = vadd.f32 %v656_v6, %v597_v21  ;;  %v694_v29 = vadd.f32 %v693_v23, %v598_v28  ;;  %v1812_v21 = vld [vmem:[#allocation36_spill] sm:$0xff] }
  0xb9   :  { %v605_v19 = vmul.f32 %v541_v12, %v541_v12  ;;  %v606_v35 = vmul.f32 %v542_v9, %v542_v9  ;;  %v547_v28 = vsub.f32 %v1812_v21, %v1455_v32  ;;  %v548_v36 = vsub.f32 %v1813_v2, %v1457_v24  ;;  %v1815_v12 = vld [vmem:[#allocation43_spill] sm:$0xff] }
  0xba   :  { %v342_v34 = vrot.slane %v341_v15, 2  ;;  %v379_v39 = vrot.slane %v378_v16, 2  ;;  %v658_v63 = vadd.f32 %v657_v44, %v599_v43  ;;  %v695_v13 = vadd.f32 %v694_v29, %v600_v40  ;;  %v1814_v43 = vld [vmem:[#allocation42_spill] sm:$0xff]  ;;  %v1817_v9 = vld [vmem:[#allocation47_spill] sm:$0xff] }
  0xbb   :  { %v607_v30 = vmul.f32 %v543_v54, %v543_v54  ;;  %v608_v3 = vmul.f32 %v544_v59, %v544_v59  ;;  %v549_v40 = vsub.f32 %v1814_v43, %v1455_v32  ;;  %v550_v6 = vsub.f32 %v1815_v12, %v1457_v24 }
  0xbc   :  { %v343_v0 = vadd.f32 %v342_v34, %v341_v15  ;;  %v380_v27 = vadd.f32 %v379_v39, %v378_v16  ;;  %v659_v18 = vadd.f32 %v658_v63, %v601_v51  ;;  %v696_v37 = vadd.f32 %v695_v13, %v602_v62  ;;  %v1820_v63 = vld [vmem:[#allocation54_spill] sm:$0xff] }
  0xbd   :  { %v609_v23 = vmul.f32 %v545_v26, %v545_v26  ;;  %v610_v50 = vmul.f32 %v546_v49, %v546_v49  ;;  %v552_v51 = vsub.f32 %v1817_v9, %v1457_v24  ;;  %v611_v62 = vmul.f32 %v547_v28, %v547_v28 }
  0xbe   :  { %v344_v46 = vrot.slane %v343_v0, 1  ;;  %v381_v48 = vrot.slane %v380_v27, 1  ;;  %v660_v34 = vadd.f32 %v659_v18, %v603_v10  ;;  %v697_v39 = vadd.f32 %v696_v37, %v604_v11  ;;  %v1823_v18 = vld [vmem:[#allocation59_spill] sm:$0xff] }
  0xbf   :  { %v612_v44 = vmul.f32 %v548_v36, %v548_v36  ;;  %v554_v54 = vsub.f32 %v1819_v60, %v1457_v24  ;;  %v613_v52 = vmul.f32 %v549_v40, %v549_v40  ;;  %v614_v59 = vmul.f32 %v550_v6, %v550_v6  ;;  %v1824_v36 = vld [vmem:[#allocation60_spill] sm:$0xff] }
  0xc0   :  { %v345_v31 = vadd.f32 %v344_v46, %v343_v0  ;;  %v382_v47 = vadd.f32 %v381_v48, %v380_v27  ;;  %v661_v4 = vadd.f32 %v660_v34, %v605_v19  ;;  %v698_v0 = vadd.f32 %v697_v39, %v606_v35  ;;  %v1816_v27 = vld [vmem:[#allocation46_spill] sm:$0xff] }
  0xc1   :  { %v551_v8 = vsub.f32 %v1816_v27, %v1455_v32  ;;  %v1818_v46 = vld [vmem:[#allocation50_spill] sm:$0xff]  ;;  %v555_v13 = vsub.f32 %v1820_v63, %v1455_v32  ;;  %v616_v26 = vmul.f32 %v552_v51, %v552_v51  ;;  %v558_v37 = vsub.f32 %v1823_v18, %v1457_v24  ;;  %v1831_v63 = vld [vmem:[#allocation67_spill] sm:$0xff] }
  0xc2   :  { %v383_v15 = vmul.f32 0.003921569, %v345_v31  ;;  %v384_v16 = vmul.f32 0.003921569, %v382_v47  ;;  %v662_v29 = vadd.f32 %v661_v4, %v607_v30  ;;  %v699_v14 = vadd.f32 %v698_v0, %v608_v3  ;;  %v1821_v31 = vld [vmem:[#allocation55_spill] sm:$0xff]  ;;  %v1822_v19 = vld [vmem:[#allocation58_spill] sm:$0xff] }
  0xc3   :  { %v553_v48 = vsub.f32 %v1818_v46, %v1455_v32  ;;  %v556_v47 = vsub.f32 %v1821_v31, %v1457_v24  ;;  %v615_v61 = vmul.f32 %v551_v8, %v551_v8  ;;  %v557_v35 = vsub.f32 %v1822_v19, %v1455_v32  ;;  %v1825_v3 = vld [vmem:[#allocation61_spill] sm:$0xff]  ;;  %v1827_v4 = vld [vmem:[#allocation63_spill] sm:$0xff] }
  0xc4   :  { %832 = vrsqrt.f32 %v383_v15  ;;  %v663_v10 = vadd.f32 %v662_v29, %v609_v23  ;;  %v700_v11 = vadd.f32 %v699_v14, %v610_v50  ;;  %v559_v30 = vsub.f32 %v1824_v36, %v1455_v32  ;;  %v1826_v23 = vld [vmem:[#allocation62_spill] sm:$0xff]  ;;  %v1829_v14 = vld [vmem:[#allocation65_spill] sm:$0xff]  ;;  %v1835_v36 = vld [vmem:[#allocation71_spill] sm:$0xff] }
  0xc5   :  { %834 = vrsqrt.f32 %v384_v16  ;;  %v617_v15 = vmul.f32 %v553_v48, %v553_v48  ;;  %v618_v16 = vmul.f32 %v554_v54, %v554_v54  ;;  %v560_v34 = vsub.f32 %v1825_v3, %v1457_v24 }
  0xc6   :  { %v664_v42 = vadd.f32 %v663_v10, %v611_v62  ;;  %v701_v49 = vadd.f32 %v700_v11, %v612_v44  ;;  %v619_v43 = vmul.f32 %v555_v13, %v555_v13  ;;  %v620_v40 = vmul.f32 %v556_v47, %v556_v47  ;;  %v1828_v44 = vld [vmem:[#allocation64_spill] sm:$0xff]  ;;  %v1830_v10 = vld [vmem:[#allocation66_spill] sm:$0xff] }
  0xc7   :  { %v561_v50 = vsub.f32 %v1826_v23, %v1455_v32  ;;  %v562_v0 = vsub.f32 %v1827_v4, %v1457_v24  ;;  %v621_v8 = vmul.f32 %v557_v35, %v557_v35  ;;  %v622_v9 = vmul.f32 %v558_v37, %v558_v37  ;;  %v1833_v35 = vld [vmem:[#allocation69_spill] sm:$0xff] }
  0xc8   :  { %v665_v21 = vadd.f32 %v664_v42, %v613_v52  ;;  %v702_v28 = vadd.f32 %v701_v49, %v614_v59  ;;  %v563_v29 = vsub.f32 %v1828_v44, %v1455_v32  ;;  %v564_v46 = vsub.f32 %v1829_v14, %v1457_v24  ;;  %v1832_v49 = vld [vmem:[#allocation68_spill] sm:$0xff] }
  0xc9   :  { %v623_v60 = vmul.f32 %v559_v30, %v559_v30  ;;  %v624_v54 = vmul.f32 %v560_v34, %v560_v34  ;;  %v565_v11 = vsub.f32 %v1830_v10, %v1455_v32  ;;  %v566_v13 = vsub.f32 %v1831_v63, %v1457_v24 }
  0xca   :  { %v666_v12 = vadd.f32 %v665_v21, %v615_v61  ;;  %v703_v6 = vadd.f32 %v702_v28, %v616_v26  ;;  %v625_v47 = vmul.f32 %v561_v50, %v561_v50  ;;  %v626_v61 = vmul.f32 %v562_v0, %v562_v0  ;;  %v1834_v28 = vld [vmem:[#allocation70_spill] sm:$0xff] }
  0xcb   :  { %v567_v19 = vsub.f32 %v1832_v49, %v1455_v32  ;;  %v568_v18 = vsub.f32 %v1833_v35, %v1457_v24  ;;  %v627_v37 = vmul.f32 %v563_v29, %v563_v29  ;;  %v570_v30 = vsub.f32 %v1835_v36, %v1457_v24 }
  0xcc   :  { %v667_v51 = vadd.f32 %v666_v12, %v617_v15  ;;  %v704_v62 = vadd.f32 %v703_v6, %v618_v16  ;;  %v628_v15 = vmul.f32 %v564_v46, %v564_v46  ;;  %v629_v3 = vmul.f32 %v565_v11, %v565_v11  ;;  %v1837_v6 = vld [vmem:[#allocation73_spill] sm:$0xff] }
  0xcd   :  { %v630_v34 = vmul.f32 %v566_v13, %v566_v13  ;;  %v572_v23 = vsub.f32 %v1837_v6, %v1457_v24  ;;  %v631_v50 = vmul.f32 %v567_v19, %v567_v19  ;;  %v632_v4 = vmul.f32 %v568_v18, %v568_v18 }
  0xce   :  { %v833_v2 = vpop.eup %832  ;;  %v668_v52 = vadd.f32 %v667_v51, %v619_v43  ;;  %v705_v59 = vadd.f32 %v704_v62, %v620_v40  ;;  %v1836_v40 = vld [vmem:[#allocation72_spill] sm:$0xff]  ;;  %v1839_v51 = vld [vmem:[#allocation75_spill] sm:$0xff]  ;;  %v634_v29 = vmul.f32 %v570_v30, %v570_v30  ;;  %v577_v13 = vsub.f32 %v1303_v7, %v1455_v32 }
  0xcf   :  { %v835_v39 = vpop.eup %834  ;;  %v571_v12 = vsub.f32 %v1836_v40, %v1455_v32  ;;  %v574_v62 = vsub.f32 %v1839_v51, %v1457_v24  ;;  %v636_v10 = vmul.f32 %v572_v23, %v572_v23  ;;  %v579_v49 = vsub.f32 %v1317_v22, %v1455_v32 }
  0xd0   :  { %v758_v27 = vcombine.low %v833_v2, %v835_v39  ;;  %v669_v26 = vadd.f32 %v668_v52, %v621_v8  ;;  %v706_v42 = vadd.f32 %v705_v59, %v622_v9  ;;  %v569_v2 = vsub.f32 %v1834_v28, %v1455_v32  ;;  %v1838_v8 = vld [vmem:[#allocation74_spill] sm:$0xff] }
  0xd1   :  { %v573_v9 = vsub.f32 %v1838_v8, %v1455_v32  ;;  %v635_v59 = vmul.f32 %v571_v12, %v571_v12  ;;  %v580_v19 = vsub.f32 %v1319_v17, %v1457_v24  ;;  %v581_v7 = vsub.f32 %v1331_v5, %v1455_v32 }
  0xd2   :  { %v765_v48 = vrot.slane %v758_v27, %v1469_v55  ;;  %v670_v16 = vadd.f32 %v669_v26, %v623_v60  ;;  %v707_v21 = vadd.f32 %v706_v42, %v624_v54  ;;  %v633_v44 = vmul.f32 %v569_v2, %v569_v2  ;;  %v1841_v54 = vld [vmem:[#allocation77_spill] sm:$0xff] }
  0xd3   :  { %v576_v52 = vsub.f32 %v1841_v54, %v1457_v24  ;;  %v583_v22 = vsub.f32 %v1345_v58, %v1455_v32  ;;  %v584_v17 = vsub.f32 %v1347_v33, %v1457_v24  ;;  %v643_v36 = vmul.f32 %v579_v49, %v579_v49 }
  0xd4   :  { %v772_v31 = vrot.slane %v765_v48, %v1469_v55  ;;  %v671_v39 = vadd.f32 %v670_v16, %v625_v47  ;;  %v708_v43 = vadd.f32 %v707_v21, %v626_v61  ;;  %v1840_v48 = vld [vmem:[#allocation76_spill] sm:$0xff]  ;;  %v637_v47 = vmul.f32 %v573_v9, %v573_v9 }
  0xd5   :  { %v575_v60 = vsub.f32 %v1840_v48, %v1455_v32  ;;  %v638_v61 = vmul.f32 %v574_v62, %v574_v62  ;;  %v640_v18 = vmul.f32 %v576_v52, %v576_v52  ;;  %v641_v16 = vmul.f32 %v577_v13, %v577_v13 }
  0xd6   :  { %825 = vst.msk [vmem:[%s1628_s2 + $0x1] ss:$2 sm:$0x3] %vm1471_vm0, %v772_v31  ;;  %v672_v0 = vadd.f32 %v671_v39, %v627_v37  ;;  %v709_v27 = vadd.f32 %v708_v43, %v628_v15  ;;  %v578_v31 = vsub.f32 %v1305_v53, %v1457_v24  ;;  %v582_v53 = vsub.f32 %v1333_v25, %v1457_v24 }
  0xd7   :  { %v639_v35 = vmul.f32 %v575_v60, %v575_v60  ;;  %v644_v30 = vmul.f32 %v580_v19, %v580_v19  ;;  %v585_v5 = vsub.f32 %v1359_v56, %v1455_v32  ;;  %v586_v25 = vsub.f32 %v1361_v41, %v1457_v24 }
  0xd8   :  { %v673_v14 = vadd.f32 %v672_v0, %v629_v3  ;;  %v710_v46 = vadd.f32 %v709_v27, %v630_v34  ;;  %v642_v21 = vmul.f32 %v578_v31, %v578_v31  ;;  %v645_v39 = vmul.f32 %v581_v7, %v581_v7 }
  0xd9   :  { %v646_v43 = vmul.f32 %v582_v53, %v582_v53  ;;  %v587_v58 = vsub.f32 %v1375_v57, %v1455_v32  ;;  %v588_v33 = vsub.f32 %v1377_v38, %v1457_v24  ;;  %v647_v6 = vmul.f32 %v583_v22, %v583_v22 }
  0xda   :  { %v674_v11 = vadd.f32 %v673_v14, %v631_v50  ;;  %v711_v63 = vadd.f32 %v710_v46, %v632_v4  ;;  %v648_v23 = vmul.f32 %v584_v17, %v584_v17  ;;  %v589_v56 = vsub.f32 %v1389_v1, %v1455_v32 }
  0xdb   :  { %v590_v41 = vsub.f32 %v1391_v20, %v1457_v24  ;;  %v649_v0 = vmul.f32 %v585_v5, %v585_v5  ;;  %v650_v27 = vmul.f32 %v586_v25, %v586_v25  ;;  %v651_v51 = vmul.f32 %v587_v58, %v587_v58 }
  0xdc   :  { %v675_v26 = vadd.f32 %v674_v11, %v633_v44  ;;  %v712_v42 = vadd.f32 %v711_v63, %v634_v29  ;;  %v652_v62 = vmul.f32 %v588_v33, %v588_v33  ;;  %v653_v29 = vmul.f32 %v589_v56, %v589_v56 }
  0xdd   :  { %v654_v38 = vmul.f32 %v590_v41, %v590_v41 }
  0xde   :  { %v676_v37 = vadd.f32 %v675_v26, %v635_v59  ;;  %v713_v15 = vadd.f32 %v712_v42, %v636_v10 }
  0xe0   :  { %v677_v28 = vadd.f32 %v676_v37, %v637_v47  ;;  %v714_v2 = vadd.f32 %v713_v15, %v638_v61 }
  0xe2   :  { %v678_v3 = vadd.f32 %v677_v28, %v639_v35  ;;  %v715_v34 = vadd.f32 %v714_v2, %v640_v18 }
  0xe4   :  { %v679_v40 = vadd.f32 %v678_v3, %v641_v16  ;;  %v716_v12 = vadd.f32 %v715_v34, %v642_v21 }
  0xe6   :  { %v680_v50 = vadd.f32 %v679_v40, %v643_v36  ;;  %v717_v4 = vadd.f32 %v716_v12, %v644_v30 }
  0xe8   :  { %v681_v8 = vadd.f32 %v680_v50, %v645_v39  ;;  %v718_v9 = vadd.f32 %v717_v4, %v646_v43 }
  0xea   :  { %v682_v57 = vadd.f32 %v681_v8, %v647_v6  ;;  %v719_v44 = vadd.f32 %v718_v9, %v648_v23 }
  0xec   :  { %v683_v14 = vadd.f32 %v682_v57, %v649_v0  ;;  %v720_v46 = vadd.f32 %v719_v44, %v650_v27 }
  0xee   :  { %v684_v48 = vadd.f32 %v683_v14, %v651_v51  ;;  %v721_v60 = vadd.f32 %v720_v46, %v652_v62 }
  0xf0   :  { %v685_v54 = vadd.f32 %v684_v48, %v653_v29  ;;  %v722_v52 = vadd.f32 %v721_v60, %v654_v38 }
  0xf2   :  { %v686_v1 = vrot.slane %v685_v54, 4  ;;  %v723_v32 = vrot.slane %v722_v52, 4 }
  0xf4   :  { %v687_v59 = vadd.f32 %v686_v1, %v685_v54  ;;  %v724_v20 = vadd.f32 %v723_v32, %v722_v52 }
  0xf6   :  { %v688_v24 = vrot.slane %v687_v59, 2  ;;  %v725_v10 = vrot.slane %v724_v20, 2 }
  0xf8   :  { %v689_v11 = vadd.f32 %v688_v24, %v687_v59  ;;  %v726_v63 = vadd.f32 %v725_v10, %v724_v20 }
  0xfa   :  { %v690_v13 = vrot.slane %v689_v11, 1  ;;  %v727_v31 = vrot.slane %v726_v63, 1 }
  0xfc   :  { %v691_v47 = vadd.f32 %v690_v13, %v689_v11  ;;  %v728_v61 = vadd.f32 %v727_v31, %v726_v63 }
  0xfe   :  { %v729_v26 = vmul.f32 0.003921569, %v691_v47  ;;  %v730_v42 = vmul.f32 0.003921569, %v728_v61 }
 0x100   :  { %836 = vrsqrt.f32 %v729_v26 }
 0x101   :  { %838 = vrsqrt.f32 %v730_v42 }
 0x10a   :  { %v837_v49 = vpop.eup %836 }
 0x10b   :  { %v839_v19 = vpop.eup %838 }
 0x10c   :  { %v797_v35 = vcombine.low %v837_v49, %v839_v19 }
 0x10e   :  { %v804_v18 = vrot.slane %v797_v35, %v1469_v55 }
 0x110   :  { %v811_v37 = vrot.slane %v804_v18, %v1469_v55 }
 0x112   :  { %826 = vst.msk [vmem:[%s1629_s3 + $0x1] ss:$2 sm:$0x3] %vm1471_vm0, %v811_v37 }
 0x113   :  { %823 = vsyncpa [#allocation3], 1 }
 0x114   :  { %824 = vsyncpa [#allocation5], 1 }

// kernel: barlow_loss.3
= control target key start
LH: loop header
LB: loop body
LE: loop exit
PB: predicated region body
PF: predicated region fallthrough
CT: control target
= control target key end

     0   :  { %s2504_s0 = inlined_call_operand.vmem [shape: f32[256,256], index: 0, kind: input, shape index: {}]   ;;  %s2505_s1 = inlined_call_operand.vmem [shape: f32[256,256], index: 1, kind: input, shape index: {}]   ;;  %s2506_s2 = inlined_call_operand.vmem [shape: f32[1,256], index: 2, kind: input, shape index: {}]   ;;  %s2507_s3 = inlined_call_operand.vmem [shape: f32[2,256], index: 3, kind: input, shape index: {}]   ;;  %s2508_s4 = inlined_call_operand.vmem [shape: f32[256,1], index: 4, kind: input, shape index: {}]   ;;  %s2509_s5 = inlined_call_operand.vmem [shape: f32[16,256], index: 5, kind: output, shape index: {}]  }
   0x1   :  { %2516 = sst [smem:[#allocation12_spill]] %s2504_s0 }
   0x2   :  { %2517 = sst [smem:[#allocation13_spill]] %s2505_s1 }
   0x3   :  { %2518 = sst [smem:[#allocation14_spill]] %s2506_s2 }
   0x4   :  { %s1909_s18 = smov 0   ;;  %s1911_s19 = smov 0  }
   0x5   :  { %s1913_s20 = smov 0   ;;  %s1915_s21 = smov 0  }
   0x6   :  { %s1917_s22 = smov 0   ;;  %s1919_s23 = smov 0  }
   0x7   :  { %s1921_s24 = smov 0   ;;  %s1923_s25 = smov 0  }
   0x8   :  { %s1925_s26 = smov 0   ;;  %s1927_s27 = smov 0  }
   0x9   :  { %s1929_s28 = smov 0  }
   0xa LB: > { %2519 = sst [smem:[#allocation6_spill]] %s1863_s25  ;;  %s27_s29 = sadd.s32 1, %s1863_s25  ;;  %s1875_s28 = sphi %s1929_s28, %s15_s28   ;;  %s1871_s27 = sphi %s1927_s27, %s2535_s27   ;;  %s1867_s26 = sphi %s1925_s26, %s2534_s26   ;;  %s1863_s25 = sphi %s1923_s25, %s2533_s25   ;;  %s1859_s24 = sphi %s1921_s24, %s2532_s24   ;;  %s1855_s23 = sphi %s1919_s23, %s2531_s23   ;;  %s1851_s22 = sphi %s1917_s22, %s2530_s22   ;;  %s1847_s21 = sphi %s1915_s21, %s2539_s21   ;;  %s1843_s20 = sphi %s1913_s20, %s2538_s20   ;;  %s1839_s19 = sphi %s1911_s19, %s2537_s19   ;;  %s1835_s18 = sphi %s1909_s18, %s2536_s18  }
   0xb   : > { %2520 = sst [smem:[#allocation7_spill]] %s1867_s26  ;;  %p28_p0 = scmp.ge.s32.totalorder %s27_s29, 2 }
   0xc   : > { %2521 = sst [smem:[#allocation8_spill]] %s1871_s27  ;;  %s30_s30 = sadd.s32 1, %s1867_s26 }
   0xd   : > { %s34_s6 = sadd.s32 1, %s1871_s27  ;;  %p48_p1 = scmp.ne.s32.totalorder %s1847_s21, %s1843_s20 }
   0xe   : > { %s2541_s29 = smov (%p28_p0, %s27_s29), 0  ;;  %s2543_s30 = smov (!%p28_p0, %s30_s30), %s1867_s26 }
   0xf   : > { %2522 = sst [smem:[#allocation9_spill]] %s2541_s29  ;;  %p49_p2 = scmp.eq.s32.totalorder %s1875_s28, 0 }
  0x10   : > { %s64_s7 = ssub.s32 %s1863_s25, %s2541_s29  ;;  %p32_p3 = scmp.ge.s32.totalorder %s2543_s30, 2 }
  0x11   : > { %s69_s8 = sadd.s32 1, %s1839_s19  ;;  %p1976_p4 = por %p49_p2, %p48_p1 }
  0x12   : > { %p76_p5 = scmp.ne.s32.totalorder %s1839_s19, %s1835_s18  ;;  %s2545_s30 = smov (%p32_p3, %s2543_s30), 0 }
  0x13   : > { %2524 = sst [smem:[#allocation10_spill]] %s2545_s30  ;;  %s2547_s6 = smov (!%p32_p3, %s34_s6), %s1871_s27 }
  0x14   : > { %s65_s10 = ssub.s32 %s1867_s26, %s2545_s30  ;;  %p1987_p6 = por %p76_p5, %p49_p2 }
  0x15   : > { %p36_p7 = scmp.ge.s32.totalorder %s2547_s6, 2  ;;  %s66_s12 = sor.u32 %s65_s10, %s64_s7 }
  0x16   : > { %p67_p8 = scmp.eq.s32.totalorder %s66_s12, 0  ;;  %s41_s15 = sadd.s32 1, %s1847_s21 }
  0x17   : > { %s2549_s6 = smov (%p36_p7, %s2547_s6), 0  ;;  %p1515_p10 = scmp.ge.s32.totalorder %s1875_s28, 8 }
  0x18   : > { %2526 = sst [smem:[#allocation11_spill]] %s2549_s6  ;;  %s38_s14 = ssub.s32 %s1871_s27, %s2549_s6 }
  0x19   : > { %s1994_s13 = scalar_select %p67_p8, %s1839_s19, %s69_s8  }
  0x1a   : > { %p39_p9 = scmp.eq.s32.totalorder %s38_s14, 0  ;;  %208 = sbr.rel (%p1515_p10) target bundleno = 77 (0x4d), region = 16 }
  0x1c   : > { %s2000_s16 = scalar_select %p39_p9, %s1847_s21, %s41_s15  }
  0x21   : > { %211 = sbr.rel (!%p1976_p4) target bundleno = 59 (0x3b), region = 20  ;;  %s213_s17 = sand.u32 (%p1976_p4), 1, %s1847_s21  }
  0x22   : > { %s1517_s7 = sshll.u32 (%p1976_p4), %s1871_s27, 3  ;;  %s1516_s10 = sshll.u32 (%p1976_p4), %s213_s17, 8 }
  0x23   : > { %s2527_s0 = sld [smem:[#allocation12_spill]] (%p1976_p4)  ;;  %s2015_s9 = scalar_lea.vmem (%p1976_p4), [#allocation4], %s1516_s10 }
  0x29   : > { %s2010_s8 = scalar_lea.vmem %s2527_s0, %s1517_s7 }
  0x2a   : > { %v307_v0 = vld [vmem:[%s2010_s8] sm:$0xff]  ;;  %v309_v1 = vld [vmem:[%s2010_s8 + $0x10] sm:$0xff] }
  0x2b   : > { %v311_v2 = vld [vmem:[%s2010_s8 + $0x20] sm:$0xff]  ;;  %308 = vst [vmem:[%s2015_s9] sm:$0xff] %v307_v0  ;;  %310 = vst [vmem:[%s2015_s9 + $0x8] sm:$0xff] %v309_v1  ;;  %v313_v3 = vld [vmem:[%s2010_s8 + $0x30] sm:$0xff] }
  0x2c   : > { %312 = vst [vmem:[%s2015_s9 + $0x10] sm:$0xff] %v311_v2  ;;  %v315_v4 = vld [vmem:[%s2010_s8 + $0x40] sm:$0xff]  ;;  %v317_v5 = vld [vmem:[%s2010_s8 + $0x50] sm:$0xff]  ;;  %314 = vst [vmem:[%s2015_s9 + $0x18] sm:$0xff] %v313_v3 }
  0x2d   : > { %316 = vst [vmem:[%s2015_s9 + $0x20] sm:$0xff] %v315_v4  ;;  %318 = vst [vmem:[%s2015_s9 + $0x28] sm:$0xff] %v317_v5  ;;  %v319_v6 = vld [vmem:[%s2010_s8 + $0x60] sm:$0xff]  ;;  %v321_v7 = vld [vmem:[%s2010_s8 + $0x70] sm:$0xff] }
  0x2e   : > { %v323_v8 = vld [vmem:[%s2010_s8 + $0x80] sm:$0xff]  ;;  %320 = vst [vmem:[%s2015_s9 + $0x30] sm:$0xff] %v319_v6  ;;  %322 = vst [vmem:[%s2015_s9 + $0x38] sm:$0xff] %v321_v7  ;;  %v325_v9 = vld [vmem:[%s2010_s8 + $0x90] sm:$0xff] }
  0x2f   : > { %324 = vst [vmem:[%s2015_s9 + $0x40] sm:$0xff] %v323_v8  ;;  %v327_v10 = vld [vmem:[%s2010_s8 + $0xa0] sm:$0xff]  ;;  %v329_v11 = vld [vmem:[%s2010_s8 + $0xb0] sm:$0xff]  ;;  %326 = vst [vmem:[%s2015_s9 + $0x48] sm:$0xff] %v325_v9 }
  0x30   : > { %328 = vst [vmem:[%s2015_s9 + $0x50] sm:$0xff] %v327_v10  ;;  %330 = vst [vmem:[%s2015_s9 + $0x58] sm:$0xff] %v329_v11  ;;  %v331_v12 = vld [vmem:[%s2010_s8 + $0xc0] sm:$0xff]  ;;  %v333_v13 = vld [vmem:[%s2010_s8 + $0xd0] sm:$0xff] }
  0x31   : > { %v335_v14 = vld [vmem:[%s2010_s8 + $0xe0] sm:$0xff]  ;;  %332 = vst [vmem:[%s2015_s9 + $0x60] sm:$0xff] %v331_v12  ;;  %334 = vst [vmem:[%s2015_s9 + $0x68] sm:$0xff] %v333_v13  ;;  %v337_v15 = vld [vmem:[%s2010_s8 + $0xf0] sm:$0xff] }
  0x32   : > { %336 = vst [vmem:[%s2015_s9 + $0x70] sm:$0xff] %v335_v14  ;;  %v339_v16 = vld [vmem:[%s2010_s8 + $0x100] sm:$0xff]  ;;  %v341_v17 = vld [vmem:[%s2010_s8 + $0x110] sm:$0xff]  ;;  %338 = vst [vmem:[%s2015_s9 + $0x78] sm:$0xff] %v337_v15 }
  0x33   : > { %340 = vst [vmem:[%s2015_s9 + $0x80] sm:$0xff] %v339_v16  ;;  %342 = vst [vmem:[%s2015_s9 + $0x88] sm:$0xff] %v341_v17  ;;  %v343_v18 = vld [vmem:[%s2010_s8 + $0x120] sm:$0xff]  ;;  %v345_v19 = vld [vmem:[%s2010_s8 + $0x130] sm:$0xff] }
  0x34   : > { %v347_v20 = vld [vmem:[%s2010_s8 + $0x140] sm:$0xff]  ;;  %344 = vst [vmem:[%s2015_s9 + $0x90] sm:$0xff] %v343_v18  ;;  %346 = vst [vmem:[%s2015_s9 + $0x98] sm:$0xff] %v345_v19  ;;  %v349_v21 = vld [vmem:[%s2010_s8 + $0x150] sm:$0xff] }
  0x35   : > { %348 = vst [vmem:[%s2015_s9 + $0xa0] sm:$0xff] %v347_v20  ;;  %v351_v22 = vld [vmem:[%s2010_s8 + $0x160] sm:$0xff]  ;;  %v353_v23 = vld [vmem:[%s2010_s8 + $0x170] sm:$0xff]  ;;  %350 = vst [vmem:[%s2015_s9 + $0xa8] sm:$0xff] %v349_v21 }
  0x36   : > { %352 = vst [vmem:[%s2015_s9 + $0xb0] sm:$0xff] %v351_v22  ;;  %354 = vst [vmem:[%s2015_s9 + $0xb8] sm:$0xff] %v353_v23  ;;  %v355_v24 = vld [vmem:[%s2010_s8 + $0x180] sm:$0xff]  ;;  %v357_v25 = vld [vmem:[%s2010_s8 + $0x190] sm:$0xff] }
  0x37   : > { %v359_v26 = vld [vmem:[%s2010_s8 + $0x1a0] sm:$0xff]  ;;  %356 = vst [vmem:[%s2015_s9 + $0xc0] sm:$0xff] %v355_v24  ;;  %358 = vst [vmem:[%s2015_s9 + $0xc8] sm:$0xff] %v357_v25  ;;  %v361_v27 = vld [vmem:[%s2010_s8 + $0x1b0] sm:$0xff] }
  0x38   : > { %360 = vst [vmem:[%s2015_s9 + $0xd0] sm:$0xff] %v359_v26  ;;  %v363_v28 = vld [vmem:[%s2010_s8 + $0x1c0] sm:$0xff]  ;;  %v365_v29 = vld [vmem:[%s2010_s8 + $0x1d0] sm:$0xff]  ;;  %362 = vst [vmem:[%s2015_s9 + $0xd8] sm:$0xff] %v361_v27 }
  0x39   : > { %364 = vst [vmem:[%s2015_s9 + $0xe0] sm:$0xff] %v363_v28  ;;  %366 = vst [vmem:[%s2015_s9 + $0xe8] sm:$0xff] %v365_v29  ;;  %v367_v30 = vld [vmem:[%s2010_s8 + $0x1e0] sm:$0xff]  ;;  %v369_v31 = vld [vmem:[%s2010_s8 + $0x1f0] sm:$0xff] }
  0x3a   : > { %368 = vst [vmem:[%s2015_s9 + $0xf0] sm:$0xff] %v367_v30  ;;  %370 = vst [vmem:[%s2015_s9 + $0xf8] sm:$0xff] %v369_v31 }
  0x3b PF: > { %376 = sbr.rel (!%p1987_p6) target bundleno = 77 (0x4d), region = 58  ;;  %s378_s30 = sand.u32 (%p1987_p6), 1, %s1839_s19  }
  0x3c   : > { %s1556_s14 = sshll.u32 (%p1987_p6), %s1863_s25, 5  ;;  %s1518_s15 = sshll.u32 (%p1987_p6), %s378_s30, 7 }
  0x3d   : > { %s383_s17 = sadd.s32 (%p1987_p6), %s1867_s26, %s1556_s14  ;;  %s2528_s1 = sld [smem:[#allocation13_spill]] (%p1987_p6) }
  0x3e   : > { %s1521_s7 = sshll.u32 (%p1987_p6), %s383_s17, 3  ;;  %s380_s11 = scalar_lea.vmem (%p1987_p6), [#allocation5], %s1518_s15 }
  0x43   : > { %s2086_s0 = scalar_lea.vmem %s2528_s1, %s1521_s7 }
  0x44   : > { %v443_v32 = vld [vmem:[%s2086_s0] sm:$0xff]  ;;  %v445_v33 = vld [vmem:[%s2086_s0 + $0x10] sm:$0xff] }
  0x45   : > { %v447_v34 = vld [vmem:[%s2086_s0 + $0x20] sm:$0xff]  ;;  %444 = vst [vmem:[%s380_s11] sm:$0xff] %v443_v32  ;;  %446 = vst [vmem:[%s380_s11 + $0x8] sm:$0xff] %v445_v33  ;;  %v449_v35 = vld [vmem:[%s2086_s0 + $0x30] sm:$0xff] }
  0x46   : > { %448 = vst [vmem:[%s380_s11 + $0x10] sm:$0xff] %v447_v34  ;;  %v451_v36 = vld [vmem:[%s2086_s0 + $0x40] sm:$0xff]  ;;  %v453_v37 = vld [vmem:[%s2086_s0 + $0x50] sm:$0xff]  ;;  %450 = vst [vmem:[%s380_s11 + $0x18] sm:$0xff] %v449_v35 }
  0x47   : > { %452 = vst [vmem:[%s380_s11 + $0x20] sm:$0xff] %v451_v36  ;;  %454 = vst [vmem:[%s380_s11 + $0x28] sm:$0xff] %v453_v37  ;;  %v455_v38 = vld [vmem:[%s2086_s0 + $0x60] sm:$0xff]  ;;  %v457_v39 = vld [vmem:[%s2086_s0 + $0x70] sm:$0xff] }
  0x48   : > { %v459_v40 = vld [vmem:[%s2086_s0 + $0x80] sm:$0xff]  ;;  %456 = vst [vmem:[%s380_s11 + $0x30] sm:$0xff] %v455_v38  ;;  %458 = vst [vmem:[%s380_s11 + $0x38] sm:$0xff] %v457_v39  ;;  %v461_v41 = vld [vmem:[%s2086_s0 + $0x90] sm:$0xff] }
  0x49   : > { %460 = vst [vmem:[%s380_s11 + $0x40] sm:$0xff] %v459_v40  ;;  %v463_v42 = vld [vmem:[%s2086_s0 + $0xa0] sm:$0xff]  ;;  %v465_v43 = vld [vmem:[%s2086_s0 + $0xb0] sm:$0xff]  ;;  %462 = vst [vmem:[%s380_s11 + $0x48] sm:$0xff] %v461_v41 }
  0x4a   : > { %464 = vst [vmem:[%s380_s11 + $0x50] sm:$0xff] %v463_v42  ;;  %466 = vst [vmem:[%s380_s11 + $0x58] sm:$0xff] %v465_v43  ;;  %v467_v44 = vld [vmem:[%s2086_s0 + $0xc0] sm:$0xff]  ;;  %v469_v45 = vld [vmem:[%s2086_s0 + $0xd0] sm:$0xff] }
  0x4b   : > { %v471_v46 = vld [vmem:[%s2086_s0 + $0xe0] sm:$0xff]  ;;  %468 = vst [vmem:[%s380_s11 + $0x60] sm:$0xff] %v467_v44  ;;  %470 = vst [vmem:[%s380_s11 + $0x68] sm:$0xff] %v469_v45  ;;  %v473_v47 = vld [vmem:[%s2086_s0 + $0xf0] sm:$0xff] }
  0x4c   : > { %472 = vst [vmem:[%s380_s11 + $0x70] sm:$0xff] %v471_v46  ;;  %474 = vst [vmem:[%s380_s11 + $0x78] sm:$0xff] %v473_v47 }
  0x4d PF: > { %p1522_p11 = scmp.ge.s32.totalorder %s1875_s28, 1  ;;  %p501_p12 = scmp.lt.s32.totalorder %s1875_s28, 9 }
  0x4f   : > { %p502_p13 = pnand %p1522_p11, %p501_p12 }
  0x50   : > { %s508_s8 = sand.u32 (!%p502_p13), 1, %s1843_s20   ;;  %s515_s9 = sand.u32 (!%p502_p13), 1, %s1835_s18  }
  0x51   : > { %505 = sbr.rel (%p502_p13) target bundleno = 1070 (0x42e), region = 108  ;;  %s1523_s0 = sshll.u32 (!%p502_p13), %s508_s8, 8 }
  0x52   : > { %s1524_s30 = sshll.u32 (!%p502_p13), %s515_s9, 7  ;;  %p562_p0 = scmp.lt.s32.totalorder (!%p502_p13), %s1859_s24, 1 }
  0x53   : > { %p565_p1 = scmp.lt.s32.totalorder (!%p502_p13), %s1855_s23, 1  ;;  %s1526_s14 = sshll.u32 (!%p502_p13), %s1859_s24, 4 }
  0x54   : > { %p583_p2 = scmp.eq.s32.totalorder (!%p502_p13), %s1855_s23, 0  ;;  %s2529_s2 = sld [smem:[#allocation14_spill]] (!%p502_p13) }
  0x55   : > { %p570_p3 = scmp.lt.s32.totalorder (!%p502_p13), %s1526_s14, 31  ;;  %p584_p4 = scmp.eq.s32.totalorder (!%p502_p13), %s1851_s22, 0 }
  0x56   : > { %s2135_s6 = scalar_lea.vmem (!%p502_p13), [#allocation4], %s1523_s0 }
  0x57   : > { %p585_p5 = pnand (!%p502_p13), %p584_p4, %p583_p2 }
  0x58   : > { %s563_s15 = scalar_select %p562_p0, %s1859_s24, 1 }
  0x59   : > { %s566_s17 = scalar_select %p565_p1, %s1855_s23, 1 }
  0x5a   : > { %s564_s12 = scalar_lea.vmem %s2529_s2, %s563_s15  ;;  %s1528_s1 = sshll.u32 %s563_s15, 1  ;;  %v589_v48 = vld [vmem:[%s2135_s6] sm:$0xff] (!%p585_p5)  ;;  %v590_v50 = vld [vmem:[%s2135_s6 + $0x8] sm:$0xff] (!%p585_p5)  ;;  %v591_v53 = vld [vmem:[%s2135_s6 + $0x10] sm:$0xff] (!%p585_p5) }
  0x5b   : > { %s1525_s11 = sshll.u32 %s566_s17, 1  ;;  %s580_s8 = sadd.s32 %s1528_s1, %s566_s17  ;;  %v2140_v49 = vld [vmem:[%s564_s12] ss:$0 sm:$0xff] (!%p585_p5)  ;;  %v592_v54 = vld [vmem:[%s2135_s6 + $0x18] sm:$0xff] (!%p585_p5)  ;;  %v594_v59 = vld [vmem:[%s2135_s6 + $0x28] sm:$0xff] (!%p585_p5) }
  0x5c   : > { %s2120_s18 = scalar_lea.vmem %s2507_s3, %s1525_s11  ;;  %s2551_s14 = smov (!%p570_p3, %s1526_s14), 31  ;;  %v628_v51 = vsub.f32 (!%p585_p5), %v589_v48, %v2140_v49  ;;  %v629_v52 = vsub.f32 (!%p585_p5), %v590_v50, %v2140_v49  ;;  %v593_v55 = vld [vmem:[%s2135_s6 + $0x20] sm:$0xff] (!%p585_p5)  ;;  %v630_v56 = vsub.f32 (!%p585_p5), %v591_v53, %v2140_v49  ;;  %v631_v57 = vsub.f32 (!%p585_p5), %v592_v54, %v2140_v49  ;;  %v595_v60 = vld [vmem:[%s2135_s6 + $0x30] sm:$0xff] (!%p585_p5)  ;;  %v596_v61 = vld [vmem:[%s2135_s6 + $0x38] sm:$0xff] (!%p585_p5) }
  0x5d   : > { %s1529_s9 = sshll.u32 %s580_s8, 3  ;;  %s1527_s29 = sshll.u32 %s2551_s14, 3  ;;  %v632_v58 = vsub.f32 (!%p585_p5), %v593_v55, %v2140_v49  ;;  %v633_v62 = vsub.f32 (!%p585_p5), %v594_v59, %v2140_v49  ;;  %v634_v63 = vsub.f32 (!%p585_p5), %v595_v60, %v2140_v49  ;;  %v635_v0 = vsub.f32 (!%p585_p5), %v596_v61, %v2140_v49  ;;  %v597_v1 = vld [vmem:[%s2135_s6 + $0x40] sm:$0xff] (!%p585_p5)  ;;  %v598_v2 = vld [vmem:[%s2135_s6 + $0x48] sm:$0xff] (!%p585_p5)  ;;  %v599_v3 = vld [vmem:[%s2135_s6 + $0x50] sm:$0xff] (!%p585_p5) }
  0x5e   : > { %s2126_s25 = scalar_lea.vmem %s2509_s5, %s1529_s9  ;;  %s2131_s2 = scalar_lea.vmem %s2508_s4, %s1527_s29  ;;  %660 = vst [vmem:[#allocation2] sm:$0xff] (!%p585_p5), %v628_v51  ;;  %661 = vst [vmem:[#allocation2 + $0x8] sm:$0xff] (!%p585_p5), %v629_v52  ;;  %v636_v4 = vsub.f32 (!%p585_p5), %v597_v1, %v2140_v49  ;;  %v637_v5 = vsub.f32 (!%p585_p5), %v598_v2, %v2140_v49  ;;  %v638_v6 = vsub.f32 (!%p585_p5), %v599_v3, %v2140_v49  ;;  %v600_v7 = vld [vmem:[%s2135_s6 + $0x58] sm:$0xff] (!%p585_p5)  ;;  %v601_v8 = vld [vmem:[%s2135_s6 + $0x60] sm:$0xff] (!%p585_p5) }
  0x5f   : > { %s2137_s15 = scalar_lea.vmem [#allocation5], %s1524_s30  ;;  %588 = sbr.rel (%p585_p5) target bundleno = 110 (0x6e), region = 120  ;;  %662 = vst [vmem:[#allocation2 + $0x10] sm:$0xff] (!%p585_p5), %v630_v56  ;;  %663 = vst [vmem:[#allocation2 + $0x18] sm:$0xff] (!%p585_p5), %v631_v57  ;;  %v602_v9 = vld [vmem:[%s2135_s6 + $0x68] sm:$0xff] (!%p585_p5)  ;;  %v639_v10 = vsub.f32 (!%p585_p5), %v600_v7, %v2140_v49  ;;  %v640_v11 = vsub.f32 (!%p585_p5), %v601_v8, %v2140_v49  ;;  %v603_v13 = vld [vmem:[%s2135_s6 + $0x70] sm:$0xff] (!%p585_p5) }
  0x60   : > { %664 = vst [vmem:[#allocation2 + $0x20] sm:$0xff] (!%p585_p5), %v632_v58  ;;  %665 = vst [vmem:[#allocation2 + $0x28] sm:$0xff] (!%p585_p5), %v633_v62  ;;  %v641_v12 = vsub.f32 (!%p585_p5), %v602_v9, %v2140_v49  ;;  %v604_v14 = vld [vmem:[%s2135_s6 + $0x78] sm:$0xff] (!%p585_p5)  ;;  %v605_v15 = vld [vmem:[%s2135_s6 + $0x80] sm:$0xff] (!%p585_p5)  ;;  %v642_v16 = vsub.f32 (!%p585_p5), %v603_v13, %v2140_v49 }
  0x61   : > { %666 = vst [vmem:[#allocation2 + $0x30] sm:$0xff] (!%p585_p5), %v634_v63  ;;  %667 = vst [vmem:[#allocation2 + $0x38] sm:$0xff] (!%p585_p5), %v635_v0  ;;  %v643_v17 = vsub.f32 (!%p585_p5), %v604_v14, %v2140_v49  ;;  %v644_v18 = vsub.f32 (!%p585_p5), %v605_v15, %v2140_v49  ;;  %v606_v19 = vld [vmem:[%s2135_s6 + $0x88] sm:$0xff] (!%p585_p5)  ;;  %v607_v20 = vld [vmem:[%s2135_s6 + $0x90] sm:$0xff] (!%p585_p5) }
  0x62   : > { %668 = vst [vmem:[#allocation2 + $0x40] sm:$0xff] (!%p585_p5), %v636_v4  ;;  %669 = vst [vmem:[#allocation2 + $0x48] sm:$0xff] (!%p585_p5), %v637_v5  ;;  %v608_v21 = vld [vmem:[%s2135_s6 + $0x98] sm:$0xff] (!%p585_p5)  ;;  %v645_v22 = vsub.f32 (!%p585_p5), %v606_v19, %v2140_v49  ;;  %v646_v23 = vsub.f32 (!%p585_p5), %v607_v20, %v2140_v49  ;;  %v609_v25 = vld [vmem:[%s2135_s6 + $0xa0] sm:$0xff] (!%p585_p5) }
  0x63   : > { %670 = vst [vmem:[#allocation2 + $0x50] sm:$0xff] (!%p585_p5), %v638_v6  ;;  %671 = vst [vmem:[#allocation2 + $0x58] sm:$0xff] (!%p585_p5), %v639_v10  ;;  %v647_v24 = vsub.f32 (!%p585_p5), %v608_v21, %v2140_v49  ;;  %v610_v26 = vld [vmem:[%s2135_s6 + $0xa8] sm:$0xff] (!%p585_p5)  ;;  %v611_v27 = vld [vmem:[%s2135_s6 + $0xb0] sm:$0xff] (!%p585_p5)  ;;  %v648_v28 = vsub.f32 (!%p585_p5), %v609_v25, %v2140_v49 }
  0x64   : > { %672 = vst [vmem:[#allocation2 + $0x60] sm:$0xff] (!%p585_p5), %v640_v11  ;;  %673 = vst [vmem:[#allocation2 + $0x68] sm:$0xff] (!%p585_p5), %v641_v12  ;;  %v649_v29 = vsub.f32 (!%p585_p5), %v610_v26, %v2140_v49  ;;  %v650_v30 = vsub.f32 (!%p585_p5), %v611_v27, %v2140_v49  ;;  %v612_v31 = vld [vmem:[%s2135_s6 + $0xb8] sm:$0xff] (!%p585_p5)  ;;  %v613_v32 = vld [vmem:[%s2135_s6 + $0xc0] sm:$0xff] (!%p585_p5) }
  0x65   : > { %674 = vst [vmem:[#allocation2 + $0x70] sm:$0xff] (!%p585_p5), %v642_v16  ;;  %675 = vst [vmem:[#allocation2 + $0x78] sm:$0xff] (!%p585_p5), %v643_v17  ;;  %v614_v33 = vld [vmem:[%s2135_s6 + $0xc8] sm:$0xff] (!%p585_p5)  ;;  %v651_v34 = vsub.f32 (!%p585_p5), %v612_v31, %v2140_v49  ;;  %v652_v35 = vsub.f32 (!%p585_p5), %v613_v32, %v2140_v49  ;;  %v615_v37 = vld [vmem:[%s2135_s6 + $0xd0] sm:$0xff] (!%p585_p5) }
  0x66   : > { %676 = vst [vmem:[#allocation2 + $0x80] sm:$0xff] %v644_v18  ;;  %677 = vst [vmem:[#allocation2 + $0x88] sm:$0xff] %v645_v22  ;;  %v653_v36 = vsub.f32 %v614_v33, %v2140_v49  ;;  %v616_v38 = vld [vmem:[%s2135_s6 + $0xd8] sm:$0xff]  ;;  %v617_v39 = vld [vmem:[%s2135_s6 + $0xe0] sm:$0xff]  ;;  %v654_v40 = vsub.f32 %v615_v37, %v2140_v49 }
  0x67   : > { %678 = vst [vmem:[#allocation2 + $0x90] sm:$0xff] %v646_v23  ;;  %679 = vst [vmem:[#allocation2 + $0x98] sm:$0xff] %v647_v24  ;;  %v655_v41 = vsub.f32 %v616_v38, %v2140_v49  ;;  %v656_v42 = vsub.f32 %v617_v39, %v2140_v49  ;;  %v618_v43 = vld [vmem:[%s2135_s6 + $0xe8] sm:$0xff]  ;;  %v619_v44 = vld [vmem:[%s2135_s6 + $0xf0] sm:$0xff] }
  0x68   : > { %680 = vst [vmem:[#allocation2 + $0xa0] sm:$0xff] %v648_v28  ;;  %681 = vst [vmem:[#allocation2 + $0xa8] sm:$0xff] %v649_v29  ;;  %v620_v45 = vld [vmem:[%s2135_s6 + $0xf8] sm:$0xff]  ;;  %v657_v46 = vsub.f32 %v618_v43, %v2140_v49  ;;  %v658_v47 = vsub.f32 %v619_v44, %v2140_v49 }
  0x69   : > { %682 = vst [vmem:[#allocation2 + $0xb0] sm:$0xff] %v650_v30  ;;  %683 = vst [vmem:[#allocation2 + $0xb8] sm:$0xff] %v651_v34  ;;  %v659_v48 = vsub.f32 %v620_v45, %v2140_v49 }
  0x6a   : > { %684 = vst [vmem:[#allocation2 + $0xc0] sm:$0xff] %v652_v35  ;;  %685 = vst [vmem:[#allocation2 + $0xc8] sm:$0xff] %v653_v36 }
  0x6b   : > { %686 = vst [vmem:[#allocation2 + $0xd0] sm:$0xff] %v654_v40  ;;  %687 = vst [vmem:[#allocation2 + $0xd8] sm:$0xff] %v655_v41 }
  0x6c   : > { %688 = vst [vmem:[#allocation2 + $0xe0] sm:$0xff] %v656_v42  ;;  %689 = vst [vmem:[#allocation2 + $0xe8] sm:$0xff] %v657_v46 }
  0x6d   : > { %690 = vst [vmem:[#allocation2 + $0xf0] sm:$0xff] %v658_v47  ;;  %691 = vst [vmem:[#allocation2 + $0xf8] sm:$0xff] %v659_v48 }
  0x6e PF: > { %p1531_p6 = scmp.ne.s32.totalorder %s1851_s22, 0 }
  0x6f   : > { %v1877_v50 = vmov (!%p1531_p6), 0.0  }
  0x70   : > { %694 = sbr.rel (%p1531_p6) target bundleno = 120 (0x78), region = 124  ;;  %695 = vst [vmem:[#allocation3] sm:$0xff] (!%p1531_p6), %v1877_v50  ;;  %696 = vst [vmem:[#allocation3 + $0x8] sm:$0xff] (!%p1531_p6), %v1877_v50 }
  0x71   : > { %697 = vst [vmem:[#allocation3 + $0x10] sm:$0xff] (!%p1531_p6), %v1877_v50  ;;  %698 = vst [vmem:[#allocation3 + $0x18] sm:$0xff] (!%p1531_p6), %v1877_v50 }
  0x72   : > { %699 = vst [vmem:[#allocation3 + $0x20] sm:$0xff] (!%p1531_p6), %v1877_v50  ;;  %700 = vst [vmem:[#allocation3 + $0x28] sm:$0xff] (!%p1531_p6), %v1877_v50 }
  0x73   : > { %701 = vst [vmem:[#allocation3 + $0x30] sm:$0xff] (!%p1531_p6), %v1877_v50  ;;  %702 = vst [vmem:[#allocation3 + $0x38] sm:$0xff] (!%p1531_p6), %v1877_v50 }
  0x74   : > { %703 = vst [vmem:[#allocation3 + $0x40] sm:$0xff] (!%p1531_p6), %v1877_v50  ;;  %704 = vst [vmem:[#allocation3 + $0x48] sm:$0xff] (!%p1531_p6), %v1877_v50 }
  0x75   : > { %705 = vst [vmem:[#allocation3 + $0x50] sm:$0xff] (!%p1531_p6), %v1877_v50  ;;  %706 = vst [vmem:[#allocation3 + $0x58] sm:$0xff] (!%p1531_p6), %v1877_v50 }
  0x76   : > { %707 = vst [vmem:[#allocation3 + $0x60] sm:$0xff] (!%p1531_p6), %v1877_v50  ;;  %708 = vst [vmem:[#allocation3 + $0x68] sm:$0xff] (!%p1531_p6), %v1877_v50 }
  0x77   : > { %709 = vst [vmem:[#allocation3 + $0x70] sm:$0xff] %v1877_v50  ;;  %710 = vst [vmem:[#allocation3 + $0x78] sm:$0xff] %v1877_v50 }
  0x78 PF: > { %s1533_s1 = sshll.u32 %s1851_s22, 7  ;;  %v711_v49 = vld [vmem:[%s2137_s15] sm:$0xff]  ;;  %v712_v51 = vld [vmem:[%s2137_s15 + $0x8] sm:$0xff]  ;;  %v713_v55 = vld [vmem:[%s2137_s15 + $0x10] sm:$0xff]  ;;  %p1534_p7 = scmp.ne.s32.totalorder %s1851_s22, 1 }
  0x79   : > { %v2210_v52 = vld [vmem:[%s2120_s18] ss:$0 sm:$0xff]  ;;  %v714_v56 = vld [vmem:[%s2137_s15 + $0x18] sm:$0xff]  ;;  %s2216_s26 = scalar_lea.vmem [#allocation2], %s1533_s1  ;;  %v716_v2 = vld [vmem:[%s2137_s15 + $0x28] sm:$0xff]  ;;  %p1536_p8 = scmp.eq.s32.totalorder (!%p1534_p7), %s1859_s24, %s1855_s23 }
  0x7a   : > { %v732_v53 = vsub.f32 %v711_v49, %v2210_v52  ;;  %v733_v54 = vsub.f32 %v712_v51, %v2210_v52  ;;  %v750_v57 = vld [vmem:[%s2216_s26] sm:$0xff]  ;;  %v734_v58 = vsub.f32 %v713_v55, %v2210_v52  ;;  %v735_v59 = vsub.f32 %v714_v56, %v2210_v52  ;;  %v751_v62 = vld [vmem:[%s2216_s26 + $0x8] sm:$0xff]  ;;  %v752_v1 = vld [vmem:[%s2216_s26 + $0x10] sm:$0xff] }
  0x7b   : > { %782 = vxpose.xlu0.b32.start [1/16] %v750_v57, 128  ;;  %v715_v61 = vld [vmem:[%s2137_s15 + $0x20] sm:$0xff]  ;;  %v717_v3 = vld [vmem:[%s2137_s15 + $0x30] sm:$0xff]  ;;  %v737_v4 = vsub.f32 %v716_v2, %v2210_v52  ;;  %v718_v5 = vld [vmem:[%s2137_s15 + $0x38] sm:$0xff] }
  0x7c   : > { %v1645_v60 = vpack.c.bf16 %v733_v54, %v732_v53  ;;  %v1649_v63 = vpack.c.bf16 %v735_v59, %v734_v58  ;;  %v736_v0 = vsub.f32 %v715_v61, %v2210_v52  ;;  %v738_v6 = vsub.f32 %v717_v3, %v2210_v52  ;;  %v719_v7 = vld [vmem:[%s2137_s15 + $0x40] sm:$0xff]  ;;  %v720_v8 = vld [vmem:[%s2137_s15 + $0x48] sm:$0xff]  ;;  %v753_v14 = vld [vmem:[%s2216_s26 + $0x18] sm:$0xff] }
  0x7d   : > { %v739_v9 = vsub.f32 %v718_v5, %v2210_v52  ;;  %v740_v12 = vsub.f32 %v719_v7, %v2210_v52  ;;  %v741_v13 = vsub.f32 %v720_v8, %v2210_v52  ;;  %v721_v15 = vld [vmem:[%s2137_s15 + $0x50] sm:$0xff]  ;;  %v722_v16 = vld [vmem:[%s2137_s15 + $0x58] sm:$0xff]  ;;  %v754_v20 = vld [vmem:[%s2216_s26 + $0x20] sm:$0xff] }
  0x7e   : > { %1646 = vmatprep.subr.bf16.mxu0 %v1645_v60  ;;  %1677 = vmatprep.subr.bf16.mxu1 %v1645_v60  ;;  %v1653_v10 = vpack.c.bf16 %v737_v4, %v736_v0  ;;  %v742_v18 = vsub.f32 %v721_v15, %v2210_v52  ;;  %v743_v19 = vsub.f32 %v722_v16, %v2210_v52  ;;  %v723_v21 = vld [vmem:[%s2137_s15 + $0x60] sm:$0xff]  ;;  %v724_v22 = vld [vmem:[%s2137_s15 + $0x68] sm:$0xff]  ;;  %v725_v27 = vld [vmem:[%s2137_s15 + $0x70] sm:$0xff] }
  0x7f   : > { %1648 = vmatpush3.bf16.msra.mxu0 %v1645_v60  ;;  %1685 = vmatpush3.bf16.msra.mxu1 %v1645_v60  ;;  %v1657_v11 = vpack.c.bf16 %v739_v9, %v738_v6  ;;  %v1661_v17 = vpack.c.bf16 %v741_v13, %v740_v12  ;;  %v744_v24 = vsub.f32 %v723_v21, %v2210_v52  ;;  %v755_v26 = vld [vmem:[%s2216_s26 + $0x28] sm:$0xff]  ;;  %v726_v28 = vld [vmem:[%s2137_s15 + $0x78] sm:$0xff]  ;;  %v756_v32 = vld [vmem:[%s2216_s26 + $0x30] sm:$0xff] }
  0x80   : > { %783 = vxpose.xlu0.b32.cont [2/16] %v751_v62, 128  ;;  %1650 = vmatprep.subr.bf16.mxu0 %v1649_v63  ;;  %v1665_v23 = vpack.c.bf16 %v743_v19, %v742_v18  ;;  %v745_v25 = vsub.f32 %v724_v22, %v2210_v52  ;;  %v746_v30 = vsub.f32 %v725_v27, %v2210_v52  ;;  %v757_v34 = vld [vmem:[%s2216_s26 + $0x38] sm:$0xff]  ;;  %v758_v35 = vld [vmem:[%s2216_s26 + $0x40] sm:$0xff]  ;;  %v759_v36 = vld [vmem:[%s2216_s26 + $0x48] sm:$0xff] }
  0x81   : > { %1678 = vmatprep.subr.bf16.mxu1 %v1649_v63  ;;  %v747_v31 = vsub.f32 %v726_v28, %v2210_v52  ;;  %v760_v37 = vld [vmem:[%s2216_s26 + $0x50] sm:$0xff]  ;;  %v761_v38 = vld [vmem:[%s2216_s26 + $0x58] sm:$0xff]  ;;  %v762_v39 = vld [vmem:[%s2216_s26 + $0x60] sm:$0xff] }
  0x82   : > { %v1669_v29 = vpack.c.bf16 %v745_v25, %v744_v24  ;;  %v763_v40 = vld [vmem:[%s2216_s26 + $0x68] sm:$0xff]  ;;  %v764_v41 = vld [vmem:[%s2216_s26 + $0x70] sm:$0xff]  ;;  %v765_v42 = vld [vmem:[%s2216_s26 + $0x78] sm:$0xff] }
  0x83   : > { %1652 = vmatpush3.bf16.msra.mxu0 %v1649_v63  ;;  %1686 = vmatpush3.bf16.msra.mxu1 %v1649_v63  ;;  %v1673_v33 = vpack.c.bf16 %v747_v31, %v746_v30  ;;  %v767_v59 = vld [vmem:[#allocation3 + $0x8] sm:$0xff]  ;;  %v766_v60 = vld [vmem:[#allocation3] sm:$0xff]  ;;  %v768_v2 = vld [vmem:[#allocation3 + $0x10] sm:$0xff] }
  0x84   : > { %784 = vxpose.xlu0.b32.cont [3/16] %v752_v1, 128  ;;  %1654 = vmatprep.subr.bf16.mxu0 %v1653_v10  ;;  %v769_v1 = vld [vmem:[#allocation3 + $0x18] sm:$0xff]  ;;  %v771_v7 = vld [vmem:[#allocation3 + $0x28] sm:$0xff]  ;;  %v770_v8 = vld [vmem:[#allocation3 + $0x20] sm:$0xff] }
  0x85   : > { %1679 = vmatprep.subr.bf16.mxu1 %v1653_v10  ;;  %v773_v13 = vld [vmem:[#allocation3 + $0x38] sm:$0xff]  ;;  %v775_v19 = vld [vmem:[#allocation3 + $0x48] sm:$0xff] }
  0x86   : > { %v777_v25 = vld [vmem:[#allocation3 + $0x58] sm:$0xff]  ;;  %v779_v31 = vld [vmem:[#allocation3 + $0x68] sm:$0xff] }
  0x87   : > { %1656 = vmatpush3.bf16.msra.mxu0 %v1653_v10  ;;  %1687 = vmatpush3.bf16.msra.mxu1 %v1653_v10 }
  0x88   : > { %785 = vxpose.xlu0.b32.cont [4/16] %v753_v14, 128  ;;  %1658 = vmatprep.subr.bf16.mxu0 %v1657_v11  ;;  %v772_v14 = vld [vmem:[#allocation3 + $0x30] sm:$0xff] }
  0x89   : > { %1680 = vmatprep.subr.bf16.mxu1 %v1657_v11 }
  0x8b   : > { %1660 = vmatpush3.bf16.msra.mxu0 %v1657_v11  ;;  %1688 = vmatpush3.bf16.msra.mxu1 %v1657_v11 }
  0x8c   : > { %786 = vxpose.xlu0.b32.cont [5/16] %v754_v20, 128  ;;  %1662 = vmatprep.subr.bf16.mxu0 %v1661_v17  ;;  %v774_v20 = vld [vmem:[#allocation3 + $0x40] sm:$0xff] }
  0x8d   : > { %1681 = vmatprep.subr.bf16.mxu1 %v1661_v17 }
  0x8f   : > { %1664 = vmatpush3.bf16.msra.mxu0 %v1661_v17  ;;  %1689 = vmatpush3.bf16.msra.mxu1 %v1661_v17 }
  0x90   : > { %787 = vxpose.xlu0.b32.cont [6/16] %v755_v26, 128  ;;  %1666 = vmatprep.subr.bf16.mxu0 %v1665_v23  ;;  %v776_v26 = vld [vmem:[#allocation3 + $0x50] sm:$0xff] }
  0x91   : > { %1682 = vmatprep.subr.bf16.mxu1 %v1665_v23 }
  0x93   : > { %1668 = vmatpush3.bf16.msra.mxu0 %v1665_v23  ;;  %1690 = vmatpush3.bf16.msra.mxu1 %v1665_v23 }
  0x94   : > { %788 = vxpose.xlu0.b32.cont [7/16] %v756_v32, 128  ;;  %1670 = vmatprep.subr.bf16.mxu0 %v1669_v29  ;;  %v778_v32 = vld [vmem:[#allocation3 + $0x60] sm:$0xff] }
  0x95   : > { %1683 = vmatprep.subr.bf16.mxu1 %v1669_v29 }
  0x97   : > { %1672 = vmatpush3.bf16.msra.mxu0 %v1669_v29  ;;  %1691 = vmatpush3.bf16.msra.mxu1 %v1669_v29 }
  0x98   : > { %789 = vxpose.xlu0.b32.cont [8/16] %v757_v34, 128  ;;  %1674 = vmatprep.subr.bf16.mxu0 %v1673_v33 }
  0x99   : > { %1684 = vmatprep.subr.bf16.mxu1 %v1673_v33 }
  0x9b   : > { %1676 = vmatpush3.bf16.msra.mxu0 %v1673_v33  ;;  %1692 = vmatpush3.bf16.msra.mxu1 %v1673_v33 }
  0x9c   : > { %790 = vxpose.xlu0.b32.cont [9/16] %v758_v35, 128 }
  0xa0   : > { %791 = vxpose.xlu0.b32.cont [10/16] %v759_v36, 128 }
  0xa4   : > { %792 = vxpose.xlu0.b32.cont [11/16] %v760_v37, 128  ;;  %v781_v37 = vld [vmem:[#allocation3 + $0x78] sm:$0xff] }
  0xa8   : > { %793 = vxpose.xlu0.b32.cont [12/16] %v761_v38, 128  ;;  %v780_v38 = vld [vmem:[#allocation3 + $0x70] sm:$0xff] }
  0xac   : > { %794 = vxpose.xlu0.b32.cont [13/16] %v762_v39, 128 }
  0xb0   : > { %795 = vxpose.xlu0.b32.cont [14/16] %v763_v40, 128 }
  0xb4   : > { %796 = vxpose.xlu0.b32.cont [15/16] %v764_v41, 128 }
  0xb8   : > { %797 = vxpose.xlu0.b32.end [16/16] %v765_v42, 128 }
  0xfc   : > { %v798_v43 = vpop.trf.xlu0 }
  0xfd   : > { %1621 = vmatprep.mubr.f32.mxu0 %v798_v43  ;;  %v1034_v43 = vld [vmem:[%s2131_s2 + $0x10] sm:$0xff] (!%p1534_p7) }
 0x100   : > { %v799_v44 = vpop.trf.xlu0 }
 0x101   : > { %1622 = vmatmul.mubr.f32.vlgmr.msra.gmra.mrb[0].mxu0 %v799_v44  ;;  %v1032_v44 = vld [vmem:[%s2131_s2] sm:$0xff] (!%p1534_p7) }
 0x104   : > { %v800_v45 = vpop.trf.xlu0 }
 0x105   : > { %1624 = vmatprep.mubr.f32.mxu0 %v800_v45  ;;  %v1878_v45 = vmov (!%p1534_p7), 0  }
 0x106   : > { %1788 = vset.pattern.permute.xlu1 (!%p1534_p7), %v1878_v45  ;;  %1787 = vset.pattern.permute.xlu0 (!%p1534_p7), %v1878_v45 }
 0x107   : > { %1060 = vperm.xlu1 (!%p1534_p7), %1788, %v1034_v43   ;;  %1050 = vperm.xlu0 (!%p1534_p7), %1787, %v1032_v44  }
 0x108   : > { %v801_v46 = vpop.trf.xlu0 }
 0x109   : > { %1625 = vmatmul.mubr.f32.gmra.mrb[2].mxu0 %v801_v46  ;;  %v1035_v46 = vld [vmem:[%s2131_s2 + $0x18] sm:$0xff] (!%p1534_p7) }
 0x10b   : > { %1065 = vperm.xlu1 (!%p1534_p7), %1788, %v1035_v46  }
 0x10c   : > { %v802_v47 = vpop.trf.xlu0 }
 0x10d   : > { %1627 = vmatprep.mubr.f32.mxu0 %v802_v47  ;;  %v1033_v47 = vld [vmem:[%s2131_s2 + $0x8] sm:$0xff] (!%p1534_p7) }
 0x10e   : > { %1055 = vperm.xlu0 (!%p1534_p7), %1787, %v1033_v47  }
 0x110   : > { %v803_v48 = vpop.trf.xlu0 }
 0x111   : > { %1628 = vmatmul.mubr.f32.gmra.mrb[4].mxu0 %v803_v48  ;;  %v1037_v48 = vld [vmem:[%s2131_s2 + $0x28] sm:$0xff] (!%p1534_p7) }
 0x112   : > { %1075 = vperm.xlu1 (!%p1534_p7), %1788, %v1037_v48  }
 0x114   : > { %v804_v50 = vpop.trf.xlu0 }
 0x115   : > { %1630 = vmatprep.mubr.f32.mxu0 %v804_v50  ;;  %v1036_v50 = vld [vmem:[%s2131_s2 + $0x20] sm:$0xff] (!%p1534_p7) }
 0x116   : > { %1070 = vperm.xlu0 (!%p1534_p7), %1787, %v1036_v50  }
 0x118   : > { %v805_v49 = vpop.trf.xlu0 }
 0x119   : > { %1631 = vmatmul.mubr.f32.gmra.mrb[6].mxu0 %v805_v49  ;;  %v1039_v49 = vld [vmem:[%s2131_s2 + $0x38] sm:$0xff] (!%p1534_p7) }
 0x11a   : > { %1085 = vperm.xlu1 (!%p1534_p7), %1788, %v1039_v49  }
 0x11c   : > { %v806_v51 = vpop.trf.xlu0 }
 0x11d   : > { %1633 = vmatprep.mubr.f32.mxu1 %v806_v51  ;;  %v1038_v51 = vld [vmem:[%s2131_s2 + $0x30] sm:$0xff] (!%p1534_p7) }
 0x11e   : > { %1080 = vperm.xlu0 (!%p1534_p7), %1787, %v1038_v51  }
 0x120   : > { %v807_v52 = vpop.trf.xlu0 }
 0x121   : > { %1634 = vmatmul.mubr.f32.vlgmr.msra.gmra.mrb[0].mxu1 %v807_v52  ;;  %v1041_v52 = vld [vmem:[%s2131_s2 + $0x48] sm:$0xff] (!%p1534_p7) }
 0x122   : > { %1095 = vperm.xlu1 (!%p1534_p7), %1788, %v1041_v52  }
 0x124   : > { %v808_v53 = vpop.trf.xlu0 }
 0x125   : > { %1636 = vmatprep.mubr.f32.mxu1 %v808_v53  ;;  %v1040_v53 = vld [vmem:[%s2131_s2 + $0x40] sm:$0xff] (!%p1534_p7) }
 0x126   : > { %1090 = vperm.xlu0 (!%p1534_p7), %1787, %v1040_v53  }
 0x128   : > { %v809_v54 = vpop.trf.xlu0 }
 0x129   : > { %1637 = vmatmul.mubr.f32.gmra.mrb[2].mxu1 %v809_v54  ;;  %v1043_v54 = vld [vmem:[%s2131_s2 + $0x58] sm:$0xff] (!%p1534_p7) }
 0x12a   : > { %1105 = vperm.xlu1 (!%p1534_p7), %1788, %v1043_v54  }
 0x12c   : > { %v810_v55 = vpop.trf.xlu0 }
 0x12d   : > { %1639 = vmatprep.mubr.f32.mxu1 %v810_v55  ;;  %v1042_v55 = vld [vmem:[%s2131_s2 + $0x50] sm:$0xff] (!%p1534_p7) }
 0x12e   : > { %1100 = vperm.xlu0 (!%p1534_p7), %1787, %v1042_v55  }
 0x130   : > { %v811_v56 = vpop.trf.xlu0 }
 0x131   : > { %1640 = vmatmul.mubr.f32.gmra.mrb[4].mxu1 %v811_v56  ;;  %v1045_v56 = vld [vmem:[%s2131_s2 + $0x68] sm:$0xff] (!%p1534_p7) }
 0x132   : > { %1115 = vperm.xlu1 (!%p1534_p7), %1788, %v1045_v56  }
 0x134   : > { %v812_v57 = vpop.trf.xlu0 }
 0x135   : > { %1642 = vmatprep.mubr.f32.mxu1 %v812_v57  ;;  %v1044_v57 = vld [vmem:[%s2131_s2 + $0x60] sm:$0xff] (!%p1534_p7) }
 0x136   : > { %1110 = vperm.xlu0 (!%p1534_p7), %1787, %v1044_v57  }
 0x138   : > { %v813_v58 = vpop.trf.xlu0 }
 0x139   : > { %1643 = vmatmul.mubr.f32.gmra.mrb[6].mxu1 %v813_v58  ;;  %v1047_v58 = vld [vmem:[%s2131_s2 + $0x78] sm:$0xff] (!%p1534_p7) }
 0x13a   : > { %1125 = vperm.xlu1 (!%p1534_p7), %1788, %v1047_v58  }
 0x1d4   : > { %v1623_v61 = vpop.f32.mrb[0].mxu0 }
 0x1d5   : > { %v960_v62 = vadd.f32 %v1623_v61, %v767_v59  ;;  %v880_v63 = vpop.f32.mrb[1].mxu0  ;;  %v1046_v59 = vld [vmem:[%s2131_s2 + $0x70] sm:$0xff] (!%p1534_p7) }
 0x1d6   : > { %v959_v0 = vadd.f32 %v880_v63, %v766_v60  ;;  %1120 = vperm.xlu0 (!%p1534_p7), %1787, %v1046_v59   ;;  %v2278_v60 = vld [vmem:[%s2120_s18 + $0x1] ss:$0 sm:$0xff] (!%p1534_p7) }
 0x1d7   : > { %976 = vst [vmem:[#allocation3 + $0x8] sm:$0xff] %v960_v62 }
 0x1d8   : > { %975 = vst [vmem:[#allocation3] sm:$0xff] %v959_v0 }
 0x1dc   : > { %v1626_v3 = vpop.f32.mrb[2].mxu0 }
 0x1dd   : > { %v962_v4 = vadd.f32 %v1626_v3, %v769_v1  ;;  %v890_v5 = vpop.f32.mrb[3].mxu0  ;;  %v1061_v1 = vpop.permute.xlu1 (!%p1534_p7), %1060 }
 0x1de   : > { %v961_v6 = vadd.f32 %v890_v5, %v768_v2  ;;  %v996_v63 = vld [vmem:[#allocation3 + $0x8] sm:$0xff] (!%p1534_p7)  ;;  %v1051_v2 = vpop.permute.xlu0 (!%p1534_p7), %1050 }
 0x1df   : > { %978 = vst [vmem:[#allocation3 + $0x18] sm:$0xff] %v962_v4  ;;  %v995_v61 = vld [vmem:[#allocation3] sm:$0xff] (!%p1534_p7)  ;;  %v1017_v5 = vmul.f32 (!%p1534_p7), %v2278_v60, %v996_v63 }
 0x1e0   : > { %977 = vst [vmem:[#allocation3 + $0x10] sm:$0xff] %v961_v6  ;;  %v1016_v0 = vmul.f32 (!%p1534_p7), %v2278_v60, %v995_v61 }
 0x1e4   : > { %v1629_v9 = vpop.f32.mrb[4].mxu0 }
 0x1e5   : > { %v964_v10 = vadd.f32 %v1629_v9, %v771_v7  ;;  %v900_v11 = vpop.f32.mrb[5].mxu0  ;;  %v2283_v7 = vmul.f32 (!%p1534_p7), %v1051_v2, %v1016_v0  ;;  %v1066_v9 = vpop.permute.xlu1 (!%p1534_p7), %1065 }
 0x1e6   : > { %v963_v12 = vadd.f32 %v900_v11, %v770_v8  ;;  %v998_v3 = vld [vmem:[#allocation3 + $0x18] sm:$0xff] (!%p1534_p7) }
 0x1e7   : > { %980 = vst [vmem:[#allocation3 + $0x28] sm:$0xff] %v964_v10  ;;  %v997_v62 = vld [vmem:[#allocation3 + $0x10] sm:$0xff] (!%p1534_p7)  ;;  %v1019_v8 = vmul.f32 (!%p1534_p7), %v2278_v60, %v998_v3  ;;  %v1056_v10 = vpop.permute.xlu0 (!%p1534_p7), %1055 }
 0x1e8   : > { %979 = vst [vmem:[#allocation3 + $0x20] sm:$0xff] %v963_v12  ;;  %v1018_v4 = vmul.f32 (!%p1534_p7), %v2278_v60, %v997_v62 }
 0x1ea   : > { %v2286_v12 = vmul.f32 (!%p1534_p7), %v1061_v1, %v1018_v4 }
 0x1ec   : > { %v1632_v15 = vpop.f32.mrb[6].mxu0 }
 0x1ed   : > { %v966_v16 = vadd.f32 %v1632_v15, %v773_v13  ;;  %v910_v17 = vpop.f32.mrb[7].mxu0  ;;  %v2288_v13 = vmul.f32 (!%p1534_p7), %v1056_v10, %v1017_v5 }
 0x1ee   : > { %v965_v18 = vadd.f32 %v910_v17, %v772_v14  ;;  %v1000_v11 = vld [vmem:[#allocation3 + $0x28] sm:$0xff] (!%p1534_p7)  ;;  %v2293_v17 = vmul.f32 (!%p1534_p7), %v1066_v9, %v1019_v8 }
 0x1ef   : > { %982 = vst [vmem:[#allocation3 + $0x38] sm:$0xff] %v966_v16  ;;  %v999_v6 = vld [vmem:[#allocation3 + $0x20] sm:$0xff] (!%p1534_p7)  ;;  %v1144_v16 = vmul.f32 (!%p1534_p7), %v2283_v7, %v2283_v7 }
 0x1f0   : > { %981 = vst [vmem:[#allocation3 + $0x30] sm:$0xff] %v965_v18  ;;  %v1020_v14 = vmul.f32 (!%p1534_p7), %v2278_v60, %v999_v6  ;;  %v1145_v18 = vmul.f32 (!%p1534_p7), %v2288_v13, %v2288_v13 }
 0x1f4   : > { %v1635_v21 = vpop.f32.mrb[0].mxu1 }
 0x1f5   : > { %v968_v22 = vadd.f32 %v1635_v21, %v775_v19  ;;  %v920_v23 = vpop.f32.mrb[1].mxu1  ;;  %v1021_v19 = vmul.f32 (!%p1534_p7), %v2278_v60, %v1000_v11  ;;  %v1071_v21 = vpop.permute.xlu0 (!%p1534_p7), %1070 }
 0x1f6   : > { %v967_v24 = vadd.f32 %v920_v23, %v774_v20  ;;  %v1076_v20 = vpop.permute.xlu1 (!%p1534_p7), %1075  ;;  %v1146_v23 = vmul.f32 (!%p1534_p7), %v2286_v12, %v2286_v12 }
 0x1f7   : > { %984 = vst [vmem:[#allocation3 + $0x48] sm:$0xff] %v968_v22  ;;  %v1001_v15 = vld [vmem:[#allocation3 + $0x30] sm:$0xff] (!%p1534_p7)  ;;  %v1002_v22 = vld [vmem:[#allocation3 + $0x38] sm:$0xff] (!%p1534_p7) }
 0x1f8   : > { %983 = vst [vmem:[#allocation3 + $0x40] sm:$0xff] %v967_v24  ;;  %v1160_v24 = vadd.f32 (!%p1534_p7), %v1145_v18, %v1144_v16 }
 0x1fc   : > { %v1638_v27 = vpop.f32.mrb[2].mxu1 }
 0x1fd   : > { %v970_v28 = vadd.f32 %v1638_v27, %v777_v25  ;;  %v930_v29 = vpop.f32.mrb[3].mxu1  ;;  %v2300_v25 = vmul.f32 (!%p1534_p7), %v1071_v21, %v1020_v14 }
 0x1fe   : > { %v969_v30 = vadd.f32 %v930_v29, %v776_v26  ;;  %v1022_v26 = vmul.f32 (!%p1534_p7), %v2278_v60, %v1001_v15  ;;  %v1161_v29 = vadd.f32 (!%p1534_p7), %v1160_v24, %v1146_v23 }
 0x1ff   : > { %986 = vst [vmem:[#allocation3 + $0x58] sm:$0xff] %v970_v28  ;;  %v1003_v27 = vld [vmem:[#allocation3 + $0x40] sm:$0xff] (!%p1534_p7)  ;;  %v1147_v28 = vmul.f32 (!%p1534_p7), %v2293_v17, %v2293_v17 }
 0x200   : > { %985 = vst [vmem:[#allocation3 + $0x50] sm:$0xff] %v969_v30  ;;  %v2305_v30 = vmul.f32 (!%p1534_p7), %v1076_v20, %v1021_v19 }
 0x204   : > { %v1641_v33 = vpop.f32.mrb[4].mxu1 }
 0x205   : > { %v972_v34 = vadd.f32 %v1641_v33, %v779_v31  ;;  %v940_v35 = vpop.f32.mrb[5].mxu1  ;;  %v1023_v31 = vmul.f32 (!%p1534_p7), %v2278_v60, %v1002_v22  ;;  %v1081_v33 = vpop.permute.xlu0 (!%p1534_p7), %1080 }
 0x206   : > { %v971_v36 = vadd.f32 %v940_v35, %v778_v32  ;;  %v1086_v32 = vpop.permute.xlu1 (!%p1534_p7), %1085  ;;  %v1148_v35 = vmul.f32 (!%p1534_p7), %v2300_v25, %v2300_v25  ;;  %v1006_v46 = vld [vmem:[#allocation3 + $0x58] sm:$0xff] (!%p1534_p7) }
 0x207   : > { %988 = vst [vmem:[#allocation3 + $0x68] sm:$0xff] %v972_v34  ;;  %v1004_v34 = vld [vmem:[#allocation3 + $0x48] sm:$0xff] (!%p1534_p7)  ;;  %v1027_v55 = vmul.f32 (!%p1534_p7), %v2278_v60, %v1006_v46 }
 0x208   : > { %987 = vst [vmem:[#allocation3 + $0x60] sm:$0xff] %v971_v36  ;;  %v1162_v36 = vadd.f32 (!%p1534_p7), %v1161_v29, %v1147_v28  ;;  %v1025_v43 = vmul.f32 (!%p1534_p7), %v2278_v60, %v1004_v34 }
 0x209   : > { %v1091_v45 = vpop.permute.xlu0 (!%p1534_p7), %1090 }
 0x20a   : > { %994 = sbr.rel (%p1534_p7) target bundleno = 1070 (0x42e), region = 128  ;;  %v1096_v44 = vpop.permute.xlu1 (!%p1534_p7), %1095 }
 0x20b   : > { %v2325_v54 = vmul.f32 (!%p1534_p7), %v1096_v44, %v1025_v43 }
 0x20c   : > { %v1644_v39 = vpop.f32.mrb[6].mxu1 }
 0x20d   : > { %v974_v40 = vadd.f32 %v1644_v39, %v781_v37  ;;  %v950_v41 = vpop.f32.mrb[7].mxu1  ;;  %v2310_v37 = vmul.f32 (!%p1534_p7), %v1081_v33, %v1022_v26  ;;  %v1005_v39 = vld [vmem:[#allocation3 + $0x50] sm:$0xff] (!%p1534_p7)  ;;  %v1101_v57 = vpop.permute.xlu0 (!%p1534_p7), %1100  ;;  %v1153_v1 = vmul.f32 (!%p1534_p7), %v2325_v54, %v2325_v54 }
 0x20e   : > { %v973_v42 = vadd.f32 %v950_v41, %v780_v38  ;;  %v1024_v38 = vmul.f32 (!%p1534_p7), %v2278_v60, %v1003_v27  ;;  %v1163_v41 = vadd.f32 (!%p1534_p7), %v1162_v36, %v1148_v35  ;;  %v1026_v49 = vmul.f32 (!%p1534_p7), %v2278_v60, %v1005_v39  ;;  %v1106_v56 = vpop.permute.xlu1 (!%p1534_p7), %1105  ;;  %v1008_v58 = vld [vmem:[#allocation3 + $0x68] sm:$0xff] (!%p1534_p7) }
 0x20f   : > { %990 = vst [vmem:[#allocation3 + $0x78] sm:$0xff] %v974_v40  ;;  %v1149_v40 = vmul.f32 (!%p1534_p7), %v2305_v30, %v2305_v30  ;;  %v1150_v47 = vmul.f32 (!%p1534_p7), %v2310_v37, %v2310_v37  ;;  %v1007_v51 = vld [vmem:[#allocation3 + $0x60] sm:$0xff] (!%p1534_p7)  ;;  %v2335_v3 = vmul.f32 (!%p1534_p7), %v1106_v56, %v1027_v55  ;;  %v1029_v4 = vmul.f32 (!%p1534_p7), %v2278_v60, %v1008_v58 }
 0x210   : > { %989 = vst [vmem:[#allocation3 + $0x70] sm:$0xff] %v973_v42  ;;  %v2315_v42 = vmul.f32 (!%p1534_p7), %v1086_v32, %v1023_v31  ;;  %v2320_v50 = vmul.f32 (!%p1534_p7), %v1091_v45, %v1024_v38  ;;  %v2330_v62 = vmul.f32 (!%p1534_p7), %v1101_v57, %v1026_v49  ;;  %v1028_v63 = vmul.f32 (!%p1534_p7), %v2278_v60, %v1007_v51 }
 0x211   : > { %v1164_v48 = vadd.f32 %v1163_v41, %v1149_v40  ;;  %v1111_v6 = vpop.permute.xlu0 %1110  ;;  %v1155_v15 = vmul.f32 %v2335_v3, %v2335_v3  ;;  %v1189_v43 = vlaneseq (!%p1536_p8) }
 0x212   : > { %v1151_v52 = vmul.f32 %v2315_v42, %v2315_v42  ;;  %v1152_v59 = vmul.f32 %v2320_v50, %v2320_v50  ;;  %v1116_v5 = vpop.permute.xlu1 %1115  ;;  %v1154_v9 = vmul.f32 %v2330_v62, %v2330_v62  ;;  %v2340_v11 = vmul.f32 %v1111_v6, %v1028_v63 }
 0x213   : > { %v1165_v53 = vadd.f32 %v1164_v48, %v1150_v47  ;;  %v2345_v18 = vmul.f32 %v1116_v5, %v1029_v4  ;;  %v1190_v44 = vshrl.u32 (!%p1536_p8), %v1189_v43, 7  ;;  %v1192_v45 = vand.u32 (!%p1536_p8), 127, %v1189_v43 }
 0x214   : > { %v1156_v22 = vmul.f32 %v2340_v11, %v2340_v11 }
 0x215   : > { %v1166_v61 = vadd.f32 %v1165_v53, %v1151_v52  ;;  %v1157_v26 = vmul.f32 %v2345_v18, %v2345_v18  ;;  %vm1193_vm0 = vcmp.eq.s32.totalorder (!%p1536_p8), %v1190_v44, 0  ;;  %vm1194_vm1 = vcmp.eq.s32.totalorder (!%p1536_p8), %v1192_v45, 0 }
 0x216   : > { %v1010_v8 = vld [vmem:[#allocation3 + $0x78] sm:$0xff]  ;;  %v1126_v20 = vpop.permute.xlu1 %1125  ;;  %vm1195_vm2 = vmand (!%p1536_p8), %vm1193_vm0, %vm1194_vm1 }
 0x217   : > { %v1009_v0 = vld [vmem:[#allocation3 + $0x70] sm:$0xff]  ;;  %v1167_v2 = vadd.f32 %v1166_v61, %v1152_v59  ;;  %v1031_v19 = vmul.f32 %v2278_v60, %v1010_v8 }
 0x218   : > { %v1030_v14 = vmul.f32 %v2278_v60, %v1009_v0 }
 0x219   : > { %v1168_v10 = vadd.f32 %v1167_v2, %v1153_v1  ;;  %v2354_v28 = vmul.f32 %v1126_v20, %v1031_v19 }
 0x21b   : > { %v1169_v16 = vadd.f32 %v1168_v10, %v1154_v9  ;;  %v1159_v60 = vmul.f32 %v2354_v28, %v2354_v28 }
 0x21d   : > { %v1170_v23 = vadd.f32 %v1169_v16, %v1155_v15 }
 0x21f   : > { %v1171_v27 = vadd.f32 %v1170_v23, %v1156_v22 }
 0x221   : > { %v1172_v31 = vadd.f32 %v1171_v27, %v1157_v26 }
 0x255   : > { %v1121_v21 = vpop.permute.xlu0 %1120 }
 0x256   : > { %v2350_v24 = vmul.f32 %v1121_v21, %v1030_v14 }
 0x258   : > { %v1158_v29 = vmul.f32 %v2350_v24, %v2350_v24 }
 0x25a   : > { %v1173_v32 = vadd.f32 %v1172_v31, %v1158_v29 }
 0x25c   : > { %v1174_v33 = vadd.f32 %v1173_v32, %v1159_v60 }
 0x25e   : > { %1175 = vadd.xlane.f32.xlu0 %v1174_v33 }
 0x2eb   : > { %v1176_v34 = vpop.xlane.xlu0 %1175 }
 0x2ec   : > { %v1177_v35 = vrot.slane %v1176_v34, 4 }
 0x2ee   : > { %v1178_v36 = vadd.f32 %v1177_v35, %v1176_v34 }
 0x2f0   : > { %v1179_v38 = vrot.slane %v1178_v36, 2 }
 0x2f2   : > { %v1180_v39 = vadd.f32 %v1179_v38, %v1178_v36 }
 0x2f4   : > { %v1181_v40 = vrot.slane %v1180_v39, 1 }
 0x2f6   : > { %v1182_v41 = vadd.f32 %v1181_v40, %v1180_v39 }
 0x2f8   : > { %1693 = vpush %v1182_v41 }
 0x324   : > { %1188 = sbr.rel (%p1536_p8) target bundleno = 815 (0x32f), region = 132 }
 0x329   : > { %s2360_s2 = spop %1693 }
 0x32a   : > { %s1184_s22 = smul.f32 0.005, %s2360_s2 }
 0x32c   : > { %v1196_v46 = vstv %s1184_s22 }
 0x32d   : > { %v1197_v47 = vsel %vm1195_vm2, %v1196_v46, 0.0 }
 0x32e   : > { %1198 = vst [vmem:[%s2126_s25] sm:$0xff] %v1197_v47 }
 0x32f PF: > { %p1537_p9 = scmp.ne.s32.totalorder %s1859_s24, %s1855_s23 }
 0x330   : > { %v1203_v48 = vlaneseq (!%p1537_p9)  ;;  %v1538_v49 = vadd.f32 (!%p1537_p9), -1.0, %v2283_v7  ;;  %v1539_v51 = vadd.f32 (!%p1537_p9), -1.0, %v2288_v13  ;;  %v1270_v52 = vmul.f32 (!%p1537_p9), 0.005, %v2283_v7 }
 0x331   : > { %1202 = sbr.rel (%p1537_p9) target bundleno = 1070 (0x42e), region = 136  ;;  %v1271_v53 = vmul.f32 (!%p1537_p9), 0.005, %v2288_v13  ;;  %v1540_v56 = vadd.f32 (!%p1537_p9), -1.0, %v2286_v12  ;;  %v1541_v57 = vadd.f32 (!%p1537_p9), -1.0, %v2293_v17  ;;  %v1542_v58 = vadd.f32 (!%p1537_p9), -1.0, %v2300_v25 }
 0x332   : > { %v2374_v55 = vshrl.u32 (!%p1537_p9), %v1203_v48, 7  ;;  %v1543_v59 = vadd.f32 (!%p1537_p9), -1.0, %v2305_v30  ;;  %v1272_v61 = vmul.f32 (!%p1537_p9), 0.005, %v2286_v12  ;;  %v2381_v63 = vand.u32 (!%p1537_p9), 127, %v1203_v48 }
 0x333   : > { %v1544_v0 = vadd.f32 (!%p1537_p9), -1.0, %v2310_v37  ;;  %v1545_v1 = vadd.f32 (!%p1537_p9), -1.0, %v2315_v42  ;;  %v1254_v2 = vmul.f32 (!%p1537_p9), %v1538_v49, %v1538_v49  ;;  %v1255_v4 = vmul.f32 (!%p1537_p9), %v1539_v51, %v1539_v51 }
 0x334   : > { %v1273_v5 = vmul.f32 (!%p1537_p9), 0.005, %v2293_v17  ;;  %v1286_v6 = vmul.f32 (!%p1537_p9), %v1270_v52, %v2283_v7  ;;  %v1287_v8 = vmul.f32 (!%p1537_p9), %v1271_v53, %v2288_v13  ;;  %v1205_v9 = vadd.s32 (!%p1537_p9), 8, %v2374_v55 }
 0x335   : > { %v1546_v10 = vadd.f32 (!%p1537_p9), -1.0, %v2320_v50  ;;  %v1547_v14 = vadd.f32 (!%p1537_p9), -1.0, %v2325_v54  ;;  %v2392_v15 = vadd.f32 (!%p1537_p9), -1.0, %v2330_v62  ;;  %v2395_v16 = vadd.f32 (!%p1537_p9), -1.0, %v2335_v3 }
 0x336   : > { %v1256_v19 = vmul.f32 (!%p1537_p9), %v1540_v56, %v1540_v56  ;;  %v1274_v20 = vmul.f32 (!%p1537_p9), 0.005, %v2300_v25  ;;  %v1288_v21 = vmul.f32 (!%p1537_p9), %v1272_v61, %v2286_v12  ;;  %v1206_v7 = vadd.s32 (!%p1537_p9), 16, %v2374_v55 }
 0x337   : > { %v1207_v13 = vadd.s32 (!%p1537_p9), 24, %v2374_v55  ;;  %v2402_v22 = vadd.f32 (!%p1537_p9), -1.0, %v2340_v11  ;;  %v1257_v23 = vmul.f32 (!%p1537_p9), %v1541_v57, %v1541_v57  ;;  %v1275_v26 = vmul.f32 (!%p1537_p9), 0.005, %v2305_v30 }
 0x338   : > { %v1289_v27 = vmul.f32 %v1273_v5, %v2293_v17  ;;  %v1302_v29 = vsub.f32 %v1254_v2, %v1286_v6  ;;  %v1303_v31 = vsub.f32 %v1255_v4, %v1287_v8  ;;  %v1208_v60 = vadd.s32 32, %v2374_v55 }
 0x339   : > { %v1209_v32 = vadd.s32 40, %v2374_v55  ;;  %vm1222_vm3 = vcmp.eq.s32.totalorder %v2374_v55, %v2381_v63  ;;  %vm1223_vm4 = vcmp.eq.s32.totalorder %v1205_v9, %v2381_v63  ;;  %v1258_v12 = vmul.f32 %v1542_v58, %v1542_v58 }
 0x33a   : > { %v1276_v33 = vmul.f32 0.005, %v2310_v37  ;;  %v1290_v34 = vmul.f32 %v1274_v20, %v2300_v25  ;;  %v1304_v35 = vsub.f32 %v1256_v19, %v1288_v21  ;;  %v1210_v36 = vadd.s32 48, %v2374_v55 }
 0x33b   : > { %vm1224_vm5 = vcmp.eq.s32.totalorder %v1206_v7, %v2381_v63  ;;  %v1259_v17 = vmul.f32 %v1543_v59, %v1543_v59  ;;  %v1277_v38 = vmul.f32 0.005, %v2315_v42  ;;  %v1291_v39 = vmul.f32 %v1275_v26, %v2305_v30 }
 0x33c   : > { %v1305_v40 = vsub.f32 %v1257_v23, %v1289_v27  ;;  %v1318_v41 = vsel %vm1222_vm3, %v1302_v29, 0.0  ;;  %v1319_v43 = vsel %vm1223_vm4, %v1303_v31, 0.0  ;;  %v1211_v44 = vadd.s32 56, %v2374_v55 }
 0x33d   : > { %v1212_v45 = vadd.s32 64, %v2374_v55  ;;  %vm1225_vm6 = vcmp.eq.s32.totalorder %v1207_v13, %v2381_v63  ;;  %v1260_v25 = vmul.f32 %v1544_v0, %v1544_v0  ;;  %v1278_v46 = vmul.f32 0.005, %v2320_v50 }
 0x33e   : > { %v1292_v47 = vmul.f32 %v1276_v33, %v2310_v37  ;;  %v1306_v48 = vsub.f32 %v1258_v12, %v1290_v34  ;;  %v1320_v49 = vsel %vm1224_vm5, %v1304_v35, 0.0  ;;  %v1213_v51 = vadd.s32 72, %v2374_v55 }
 0x33f   : > { %vm1226_vm7 = vcmp.eq.s32.totalorder %v1208_v60, %v2381_v63  ;;  %v1261_v30 = vmul.f32 %v1545_v1, %v1545_v1  ;;  %v1334_v52 = vadd.f32 %v1319_v43, %v1318_v41  ;;  %v1279_v53 = vmul.f32 0.005, %v2325_v54 }
 0x340   : > { %v1293_v56 = vmul.f32 %v1277_v38, %v2315_v42  ;;  %v1307_v57 = vsub.f32 %v1259_v17, %v1291_v39  ;;  %v1321_v58 = vsel %vm1225_vm6, %v1305_v40, 0.0  ;;  %v1214_v59 = vadd.s32 80, %v2374_v55 }
 0x341   : > { %vm1227_vm8 = vcmp.eq.s32.totalorder %v1209_v32, %v2381_v63  ;;  %v1262_v61 = vmul.f32 %v1546_v10, %v1546_v10  ;;  %v1335_v37 = vadd.f32 %v1334_v52, %v1320_v49  ;;  %v1280_v0 = vmul.f32 0.005, %v2330_v62 }
 0x342   : > { %v1294_v2 = vmul.f32 %v1278_v46, %v2320_v50  ;;  %v1308_v4 = vsub.f32 %v1260_v25, %v1292_v47  ;;  %v1322_v5 = vsel %vm1226_vm7, %v1306_v48, 0.0  ;;  %v1215_v1 = vadd.s32 88, %v2374_v55 }
 0x343   : > { %vm1228_vm9 = vcmp.eq.s32.totalorder %v1210_v36, %v2381_v63  ;;  %v1263_v6 = vmul.f32 %v1547_v14, %v1547_v14  ;;  %v1336_v42 = vadd.f32 %v1335_v37, %v1321_v58  ;;  %v1281_v8 = vmul.f32 0.005, %v2335_v3 }
 0x344   : > { %v1295_v9 = vmul.f32 %v1279_v53, %v2325_v54  ;;  %v1309_v19 = vsub.f32 %v1261_v30, %v1293_v56  ;;  %v1323_v20 = vsel %vm1227_vm8, %v1307_v57, 0.0  ;;  %v1216_v10 = vadd.s32 96, %v2374_v55 }
 0x345   : > { %vm1229_vm10 = vcmp.eq.s32.totalorder %v1211_v44, %v2381_v63  ;;  %v1264_v50 = vmul.f32 %v2392_v15, %v2392_v15  ;;  %v1337_v21 = vadd.f32 %v1336_v42, %v1322_v5  ;;  %v1282_v7 = vmul.f32 0.005, %v2340_v11 }
 0x346   : > { %v1296_v13 = vmul.f32 %v1280_v0, %v2330_v62  ;;  %v1310_v14 = vsub.f32 %v1262_v61, %v1294_v2  ;;  %v1324_v23 = vsel %vm1228_vm9, %v1308_v4, 0.0  ;;  %vm1230_vm11 = vcmp.eq.s32.totalorder %v1212_v45, %v2381_v63 }
 0x347   : > { %v1551_v54 = vadd.f32 -1.0, %v2345_v18  ;;  %v1265_v26 = vmul.f32 %v2395_v16, %v2395_v16  ;;  %v1338_v27 = vadd.f32 %v1337_v21, %v1323_v20  ;;  %v1283_v29 = vmul.f32 0.005, %v2345_v18 }
 0x348   : > { %v1297_v31 = vmul.f32 %v1281_v8, %v2335_v3  ;;  %v1311_v15 = vsub.f32 %v1263_v6, %v1295_v9  ;;  %v1325_v60 = vsel %vm1229_vm10, %v1309_v19, 0.0  ;;  %vm1231_vm12 = vcmp.eq.s32.totalorder %v1213_v51, %v2381_v63 }
 0x349   : > { %v1552_v62 = vadd.f32 -1.0, %v2350_v24  ;;  %v1266_v32 = vmul.f32 %v2402_v22, %v2402_v22  ;;  %v1339_v12 = vadd.f32 %v1338_v27, %v1324_v23  ;;  %v1284_v33 = vmul.f32 0.005, %v2350_v24 }
 0x34a   : > { %v1298_v34 = vmul.f32 %v1282_v7, %v2340_v11  ;;  %v1312_v16 = vsub.f32 %v1264_v50, %v1296_v13  ;;  %v1326_v35 = vsel %vm1230_vm11, %v1310_v14, 0.0  ;;  %vm1232_vm13 = vcmp.eq.s32.totalorder %v1214_v59, %v2381_v63 }
 0x34b   : > { %v1553_v3 = vadd.f32 -1.0, %v2354_v28  ;;  %v1267_v36 = vmul.f32 %v1551_v54, %v1551_v54  ;;  %v1340_v17 = vadd.f32 %v1339_v12, %v1325_v60  ;;  %v1285_v38 = vmul.f32 0.005, %v2354_v28 }
 0x34c   : > { %v1299_v39 = vmul.f32 %v1283_v29, %v2345_v18  ;;  %v1313_v40 = vsub.f32 %v1265_v26, %v1297_v31  ;;  %v1327_v41 = vsel %vm1231_vm12, %v1311_v15, 0.0  ;;  %v1217_v22 = vadd.s32 104, %v2374_v55 }
 0x34d   : > { %vm1233_vm14 = vcmp.eq.s32.totalorder %v1215_v1, %v2381_v63  ;;  %v1341_v43 = vadd.f32 %v1340_v17, %v1326_v35  ;;  %v1268_v11 = vmul.f32 %v1552_v62, %v1552_v62  ;;  %v1300_v44 = vmul.f32 %v1284_v33, %v2350_v24 }
 0x34e   : > { %v1314_v45 = vsub.f32 %v1266_v32, %v1298_v34  ;;  %v1328_v25 = vsel %vm1232_vm13, %v1312_v16, 0.0  ;;  %v1218_v46 = vadd.s32 112, %v2374_v55  ;;  %vm1234_vm15 = vcmp.eq.s32.totalorder %v1216_v10, %v2381_v63 }
 0x34f   : > { %v1342_v47 = vadd.f32 %v1341_v43, %v1327_v41  ;;  %v1269_v48 = vmul.f32 %v1553_v3, %v1553_v3  ;;  %v1301_v18 = vmul.f32 %v1285_v38, %v2354_v28  ;;  %v1315_v49 = vsub.f32 %v1267_v36, %v1299_v39 }
 0x350   : > { %v1329_v51 = vsel %vm1233_vm14, %v1313_v40, 0.0  ;;  %v1219_v30 = vadd.s32 120, %v2374_v55  ;;  %vm1235_vm0 = vcmp.eq.s32.totalorder %v1217_v22, %v2381_v63  ;;  %v1316_v53 = vsub.f32 %v1268_v11, %v1300_v44 }
 0x351   : > { %v1343_v52 = vadd.f32 %v1342_v47, %v1328_v25  ;;  %v1330_v56 = vsel %vm1234_vm15, %v1314_v45, 0.0  ;;  %vm1236_vm1 = vcmp.eq.s32.totalorder %v1218_v46, %v2381_v63  ;;  %v1317_v57 = vsub.f32 %v1269_v48, %v1301_v18 }
 0x352   : > { %v1331_v58 = vsel %vm1235_vm0, %v1315_v49, 0.0  ;;  %vm1237_vm2 = vcmp.eq.s32.totalorder %v1219_v30, %v2381_v63  ;;  %v1332_v61 = vsel %vm1236_vm1, %v1316_v53, 0.0  ;;  %vm1359_vm3 = vcmp.eq.s32.totalorder %v2374_v55, 0 }
 0x353   : > { %v1344_v24 = vadd.f32 %v1343_v52, %v1329_v51  ;;  %v1333_v28 = vsel %vm1237_vm2, %v1317_v57, 0.0  ;;  %vm1360_vm4 = vcmp.eq.s32.totalorder %v2381_v63, 0 }
 0x354   : > { %vm1361_vm5 = vmand %vm1359_vm3, %vm1360_vm4 }
 0x355   : > { %v1345_v59 = vadd.f32 %v1344_v24, %v1330_v56 }
 0x357   : > { %v1346_v37 = vadd.f32 %v1345_v59, %v1331_v58 }
 0x359   : > { %v1347_v0 = vadd.f32 %v1346_v37, %v1332_v61 }
 0x35b   : > { %v1348_v2 = vadd.f32 %v1347_v0, %v1333_v28 }
 0x35d   : > { %1349 = vadd.xlane.f32.xlu0 %v1348_v2 }
 0x3ea   : > { %v1350_v4 = vpop.xlane.xlu0 %1349 }
 0x3eb   : > { %v1351_v5 = vrot.slane %v1350_v4, 4 }
 0x3ed   : > { %v1352_v1 = vadd.f32 %v1351_v5, %v1350_v4 }
 0x3ef   : > { %v1353_v6 = vrot.slane %v1352_v1, 2 }
 0x3f1   : > { %v1354_v42 = vadd.f32 %v1353_v6, %v1352_v1 }
 0x3f3   : > { %v1355_v8 = vrot.slane %v1354_v42, 1 }
 0x3f5   : > { %v1356_v9 = vadd.f32 %v1355_v8, %v1354_v42 }
 0x3f7   : > { %1695 = vpush %v1356_v9 }
 0x428   : > { %s1696_s23 = spop %1695 }
 0x429   : > { %s1358_s24 = sadd.f32 %s1696_s23, %s1184_s22 }
 0x42b   : > { %v1362_v19 = vstv %s1358_s24 }
 0x42c   : > { %v1363_v20 = vsel %vm1361_vm5, %v1362_v19, 0.0 }
 0x42d   : > { %1364 = vst [vmem:[%s2126_s25] sm:$0xff] %v1363_v20 }
 0x42e PF: > { %s15_s28 = sadd.s32 1, %s1875_s28   ;;  %s2530_s22 = sld [smem:[#allocation6_spill]] }
 0x42f   : > { %p12_p10 = scmp.ge.s32.totalorder %s15_s28, 10   ;;  %s2531_s23 = sld [smem:[#allocation7_spill]] }
 0x430   : > { %s2532_s24 = sld [smem:[#allocation8_spill]]  ;;  %s2533_s25 = sld [smem:[#allocation9_spill]] }
 0x431   : > { %s2534_s26 = sld [smem:[#allocation10_spill]]  ;;  %s2535_s27 = sld [smem:[#allocation11_spill]] }
 0x432   : > { %s2536_s18 = smov %s1839_s19  ;;  %s2537_s19 = smov %s1994_s13 }
 0x433   : > { %s2538_s20 = smov %s1847_s21  ;;  %s2539_s21 = smov %s2000_s16 }
 0x434   :  { %14 = sbr.rel (!%p12_p10) target bundleno = 10 (0xa), region = 189 }

</bundles_post_ra>
